<compile_context>
chip_gen: v7x
topology: tpu7x:2x2x1
jax: 0.10.0
libtpu: 0.0.40
codegen_flags: <defaults>
</compile_context>

<pallas_src>
import functools

import numpy as np

import jax
import jax.numpy as jnp
from jax.experimental import pallas as pl
from jax.experimental.pallas import tpu as pltpu


# Tap order matches PyTorch Conv2d weight layout: t = ky*3 + kx, offset (dy,dx).
_TAPS = tuple((ky - 1, kx - 1) for ky in range(3) for kx in range(3))
_CIN_PAD = 8  # pad the 3 RGB input channels up to 8 (sublane-aligned)


# ----------------------------------------------------------------------------
# Fused kernel: conv1..conv7 + LE-curve recursion, one batch element per step
# ----------------------------------------------------------------------------
def _fused_kernel(
    x_ref, masks_ref,
    w1_ref, b1_ref, w2_ref, b2_ref, w3_ref, b3_ref, w4_ref, b4_ref,
    w5a_ref, w5b_ref, b5_ref, w6a_ref, w6b_ref, b6_ref,
    w7a_ref, w7b_ref, b7_ref,
    e1_ref, e_ref, xr_ref,
    *, H, W):
  HW = H * W
  masks = masks_ref[...]                       # (9, HW) f32 tap-validity masks

  def im2col(a):
    """a: (C, HW) f32 activation -> (9*C, HW) bf16 stack of shifted taps."""
    cols = []
    for t, (dy, dx) in enumerate(_TAPS):
      s = dy * W + dx
      if s == 0:                               # center tap: no shift, no mask
        cols.append(a)
      else:
        shifted = pltpu.roll(a, shift=(-s) % HW, axis=1)
        cols.append(shifted * masks[t:t + 1, :])
    # All pieces have 8/32 rows -> sublane-aligned concat; one bf16 cast.
    return jnp.concatenate(cols, axis=0).astype(jnp.bfloat16)

  def conv(parts, b_ref, act):
    """parts: [(patches_bf16, w_ref), ...]; returns f32 (Cout, HW)."""
    acc = None
    for p, w_ref in parts:
      y = jnp.dot(w_ref[...], p, preferred_element_type=jnp.float32)
      acc = y if acc is None else acc + y
    acc = acc + b_ref[...]                     # (Cout, 1) lane-broadcast bias
    if act == "relu":
      return jnp.maximum(acc, 0.0)
    return jnp.tanh(acc)

  x8 = x_ref[0]                                # (8, HW) f32, rows 3..7 are zero
  x = x8[:3, :]                                # (3, HW) RGB for the LE curve

  p0 = im2col(x8)
  x1 = conv([(p0, w1_ref)], b1_ref, "relu")
  p1 = im2col(x1)
  x2 = conv([(p1, w2_ref)], b2_ref, "relu")
  p2 = im2col(x2)
  x3 = conv([(p2, w3_ref)], b3_ref, "relu")
  p3 = im2col(x3)
  x4 = conv([(p3, w4_ref)], b4_ref, "relu")
  p4 = im2col(x4)
  x5 = conv([(p3, w5a_ref), (p4, w5b_ref)], b5_ref, "relu")   # conv5(cat(x3,x4))
  p5 = im2col(x5)
  x6 = conv([(p2, w6a_ref), (p5, w6b_ref)], b6_ref, "relu")   # conv6(cat(x2,x5))
  p6 = im2col(x6)
  x_r = conv([(p1, w7a_ref), (p6, w7b_ref)], b7_ref, "tanh")  # conv7(cat(x1,x6))

  # LE-curve recursion (all f32).
  def le_step(v, i):
    ri = x_r[3 * i:3 * (i + 1), :]
    return v + ri * (v * v - v)

  v = x
  for i in range(3):                           # r1, r2, r3
    v = le_step(v, i)
  e1 = le_step(v, 3)                           # r4 -> enhance_image_1
  v = e1
  for i in range(4, 7):                        # r5, r6, r7
    v = le_step(v, i)
  e = le_step(v, 7)                            # r8 -> enhance_image

  e1_ref[0] = e1
  e_ref[0] = e
  xr_ref[0] = x_r                              # r == x_r exactly


# ----------------------------------------------------------------------------
# Wrapper: weight/mask prep + pallas_call
# ----------------------------------------------------------------------------
def _prep_weight(w):
  """PyTorch (Cout, Cin, 3, 3) -> (Cout, 9*Cin) bf16, column = (ky*3+kx)*Cin + cin."""
  cout, cin = w.shape[0], w.shape[1]
  return jnp.transpose(w, (0, 2, 3, 1)).reshape(cout, 9 * cin).astype(jnp.bfloat16)


def _tap_masks(H, W):
  """(9, H*W) f32: 1 where the tap reads a valid pixel, 0 at image borders."""
  hh, ww = np.meshgrid(np.arange(H), np.arange(W), indexing="ij")
  m = np.zeros((9, H * W), np.float32)
  for t, (dy, dx) in enumerate(_TAPS):
    ok = (hh + dy >= 0) & (hh + dy < H) & (ww + dx >= 0) & (ww + dx < W)
    m[t] = ok.reshape(-1).astype(np.float32)
  return jnp.asarray(m)


def enhance_net_forward(x_nchw, params):
  N, C, H, W = x_nchw.shape
  assert C == 3
  HW = H * W
  nf = params["e_conv2"][0].shape[0]           # number_f = 32

  # Pad input channels 3 -> 8 once (matching weight columns are zero).
  x_flat = x_nchw.reshape(N, 3, HW).astype(jnp.float32)
  x_pad = jnp.concatenate(
      [x_flat, jnp.zeros((N, _CIN_PAD - 3, HW), jnp.float32)], axis=1)

  w1, b1 = params["e_conv1"]
  w1p = jnp.zeros((w1.shape[0], _CIN_PAD, 3, 3), w1.dtype).at[:, :3].set(w1)
  w2, b2 = params["e_conv2"]
  w3, b3 = params["e_conv3"]
  w4, b4 = params["e_conv4"]
  w5, b5 = params["e_conv5"]
  w6, b6 = params["e_conv6"]
  w7, b7 = params["e_conv7"]

  bias = lambda b: b.reshape(-1, 1).astype(jnp.float32)
  weight_args = [
      _prep_weight(w1p), bias(b1),
      _prep_weight(w2), bias(b2),
      _prep_weight(w3), bias(b3),
      _prep_weight(w4), bias(b4),
      _prep_weight(w5[:, :nf]), _prep_weight(w5[:, nf:]), bias(b5),
      _prep_weight(w6[:, :nf]), _prep_weight(w6[:, nf:]), bias(b6),
      _prep_weight(w7[:, :nf]), _prep_weight(w7[:, nf:]), bias(b7),
  ]
  masks = _tap_masks(H, W)

  ins = [x_pad, masks] + weight_args
  in_specs = [
      pl.BlockSpec((1, _CIN_PAD, HW), lambda n: (n, 0, 0)),
      pl.BlockSpec((9, HW), lambda n: (0, 0)),
  ] + [pl.BlockSpec(a.shape, lambda n: (0, 0)) for a in weight_args]

  out_shape = (
      jax.ShapeDtypeStruct((N, 3, HW), jnp.float32),
      jax.ShapeDtypeStruct((N, 3, HW), jnp.float32),
      jax.ShapeDtypeStruct((N, 24, HW), jnp.float32),
  )
  out_specs = [
      pl.BlockSpec((1, 3, HW), lambda n: (n, 0, 0)),
      pl.BlockSpec((1, 3, HW), lambda n: (n, 0, 0)),
      pl.BlockSpec((1, 24, HW), lambda n: (n, 0, 0)),
  ]

  # Advisory cost estimate for the XLA scheduler.
  macs_per_px = (_CIN_PAD * 9 * 32 + 3 * 288 * 32 + 2 * 576 * 32 + 576 * 24)
  flops = int(2 * macs_per_px * HW * N + 8 * 4 * 3 * HW * N)
  transc = int(24 * HW * N)
  bytes_acc = int(sum(int(a.size) * a.dtype.itemsize for a in ins)
                  + (3 + 3 + 24) * HW * N * 4)

  # VMEM budget derived from the per-step footprint (double-buffered I/O +
  # resident weights + live in-kernel temporaries), clamped to sane bounds so
  # it stays legal on v7x (64 MiB physical) while leaving pipeline headroom.
  weight_bytes = sum(int(a.size) * a.dtype.itemsize for a in weight_args)
  io_bytes = (_CIN_PAD + 3 + 3 + 24 + 9) * HW * 4
  live_tmp = 6 * (9 * 64 * HW * 2) + 8 * (64 * HW * 4)
  vmem_est = 2 * (weight_bytes + io_bytes) + live_tmp
  vmem_limit = int(min(max(2 * vmem_est, 32 << 20), 100 << 20))

  e1, e, xr = pl.pallas_call(
      functools.partial(_fused_kernel, H=H, W=W),
      out_shape=out_shape,
      grid_spec=pltpu.PrefetchScalarGridSpec(
          num_scalar_prefetch=0,
          grid=(N,),
          in_specs=in_specs,
          out_specs=out_specs),
      compiler_params=pltpu.CompilerParams(
          dimension_semantics=("parallel",),
          vmem_limit_bytes=vmem_limit),
      cost_estimate=pl.CostEstimate(
          flops=flops, transcendentals=transc, bytes_accessed=bytes_acc),
  )(*ins)

  # (N, C, HW) is already channel-major -> plain reshape gives NCHW.
  to_img = lambda t: t.reshape(N, t.shape[1], H, W)
  return to_img(e1), to_img(e), to_img(xr)


# ----------------------------------------------------------------------------
# Parameter init (deterministic, synthetic) and plain-JAX reference
# ----------------------------------------------------------------------------
def init_params(key):
  number_f = 32
  shapes = {
      "e_conv1": (number_f, 3),
      "e_conv2": (number_f, number_f),
      "e_conv3": (number_f, number_f),
      "e_conv4": (number_f, number_f),
      "e_conv5": (number_f, number_f * 2),
      "e_conv6": (number_f, number_f * 2),
      "e_conv7": (24, number_f * 2),
  }
  params = {}
  for name, (cout, cin) in shapes.items():
    key, kw, kb = jax.random.split(key, 3)
    scale = 1.0 / jnp.sqrt(cin * 9.0)
    w = jax.random.normal(kw, (cout, cin, 3, 3), jnp.float32) * scale
    b = jax.random.normal(kb, (cout,), jnp.float32) * 0.01
    params[name] = (w, b)
  return params


def _reference_forward(x_nchw, params):
  """Plain-JAX reference with the same bf16 matmul inputs / f32 accumulation."""
  def conv(x, wb):
    w, b = wb
    y = jax.lax.conv_general_dilated(
        x.astype(jnp.bfloat16), w.astype(jnp.bfloat16),
        window_strides=(1, 1), padding=((1, 1), (1, 1)),
        dimension_numbers=("NCHW", "OIHW", "NCHW"),
        preferred_element_type=jnp.float32)
    return y + b[None, :, None, None]

  relu = lambda t: jnp.maximum(t, 0.0)
  x = x_nchw.astype(jnp.float32)
  x1 = relu(conv(x, params["e_conv1"]))
  x2 = relu(conv(x1, params["e_conv2"]))
  x3 = relu(conv(x2, params["e_conv3"]))
  x4 = relu(conv(x3, params["e_conv4"]))
  x5 = relu(conv(jnp.concatenate([x3, x4], 1), params["e_conv5"]))
  x6 = relu(conv(jnp.concatenate([x2, x5], 1), params["e_conv6"]))
  x_r = jnp.tanh(conv(jnp.concatenate([x1, x6], 1), params["e_conv7"]))

  rs = [x_r[:, 3 * i:3 * (i + 1)] for i in range(8)]
  v = x
  for i in range(3):
    v = v + rs[i] * (v * v - v)
  e1 = v + rs[3] * (v * v - v)
  v = e1
  for i in range(4, 7):
    v = v + rs[i] * (v * v - v)
  e = v + rs[7] * (v * v - v)
  return e1, e, x_r


if __name__ == "__main__":
  key = jax.random.PRNGKey(0)
  key, kx = jax.random.split(key)
  # Module requires 3 input channels (RGB image); small spatial size.
  x = jax.random.uniform(kx, (2, 3, 16, 16), jnp.float32)  # NCHW, in [0,1)
  params = init_params(key)

  fwd = jax.jit(functools.partial(enhance_net_forward, params=params))
  e1, e, r = fwd(x)
  jax.block_until_ready((e1, e, r))

  assert e1.shape == (2, 3, 16, 16)
  assert e.shape == (2, 3, 16, 16)
  assert r.shape == (2, 24, 16, 16)

  # Cross-check against the plain-JAX reference (same bf16 matmul inputs).
  re1, re, rr = _reference_forward(x, params)
  np.testing.assert_allclose(np.asarray(e1), np.asarray(re1), atol=2e-2, rtol=2e-2)
  np.testing.assert_allclose(np.asarray(e), np.asarray(re), atol=2e-2, rtol=2e-2)
  np.testing.assert_allclose(np.asarray(r), np.asarray(rr), atol=2e-2, rtol=2e-2)

  print("KERNEL_OK")
</pallas_src>

<mosaic_0001>
module attributes {stable_mosaic.version = 11 : i64} {
  func.func @_fused_kernel(%arg0: i32, %arg1: memref<1x8x256xf32, #tpu.memory_space<vmem>>, %arg2: memref<9x256xf32, #tpu.memory_space<vmem>>, %arg3: memref<32x72xbf16, #tpu.memory_space<vmem>>, %arg4: memref<32x1xf32, #tpu.memory_space<vmem>>, %arg5: memref<32x288xbf16, #tpu.memory_space<vmem>>, %arg6: memref<32x1xf32, #tpu.memory_space<vmem>>, %arg7: memref<32x288xbf16, #tpu.memory_space<vmem>>, %arg8: memref<32x1xf32, #tpu.memory_space<vmem>>, %arg9: memref<32x288xbf16, #tpu.memory_space<vmem>>, %arg10: memref<32x1xf32, #tpu.memory_space<vmem>>, %arg11: memref<32x288xbf16, #tpu.memory_space<vmem>>, %arg12: memref<32x288xbf16, #tpu.memory_space<vmem>>, %arg13: memref<32x1xf32, #tpu.memory_space<vmem>>, %arg14: memref<32x288xbf16, #tpu.memory_space<vmem>>, %arg15: memref<32x288xbf16, #tpu.memory_space<vmem>>, %arg16: memref<32x1xf32, #tpu.memory_space<vmem>>, %arg17: memref<24x288xbf16, #tpu.memory_space<vmem>>, %arg18: memref<24x288xbf16, #tpu.memory_space<vmem>>, %arg19: memref<24x1xf32, #tpu.memory_space<vmem>>, %arg20: memref<1x3x256xf32, #tpu.memory_space<vmem>>, %arg21: memref<1x3x256xf32, #tpu.memory_space<vmem>>, %arg22: memref<1x24x256xf32, #tpu.memory_space<vmem>>) attributes {dimension_semantics = [#tpu.dimension_semantics<parallel>], iteration_bounds = array<i64: 2>, scalar_prefetch = 0 : i64, scratch_operands = 0 : i64, tpu.core_type = #tpu.core_type<tc>, window_params = [{transform_indices = @transform_0, window_bounds = array<i64: 1, 8, 256>}, {pipeline_mode = #tpu.pipeline_mode<synchronous>, transform_indices = @transform_1, window_bounds = array<i64: 9, 256>}, {pipeline_mode = #tpu.pipeline_mode<synchronous>, transform_indices = @transform_2, window_bounds = array<i64: 32, 72>}, {pipeline_mode = #tpu.pipeline_mode<synchronous>, transform_indices = @transform_3, window_bounds = array<i64: 32, 1>}, {pipeline_mode = #tpu.pipeline_mode<synchronous>, transform_indices = @transform_4, window_bounds = array<i64: 32, 288>}, {pipeline_mode = #tpu.pipeline_mode<synchronous>, transform_indices = @transform_5, window_bounds = array<i64: 32, 1>}, {pipeline_mode = #tpu.pipeline_mode<synchronous>, transform_indices = @transform_6, window_bounds = array<i64: 32, 288>}, {pipeline_mode = #tpu.pipeline_mode<synchronous>, transform_indices = @transform_7, window_bounds = array<i64: 32, 1>}, {pipeline_mode = #tpu.pipeline_mode<synchronous>, transform_indices = @transform_8, window_bounds = array<i64: 32, 288>}, {pipeline_mode = #tpu.pipeline_mode<synchronous>, transform_indices = @transform_9, window_bounds = array<i64: 32, 1>}, {pipeline_mode = #tpu.pipeline_mode<synchronous>, transform_indices = @transform_10, window_bounds = array<i64: 32, 288>}, {pipeline_mode = #tpu.pipeline_mode<synchronous>, transform_indices = @transform_11, window_bounds = array<i64: 32, 288>}, {pipeline_mode = #tpu.pipeline_mode<synchronous>, transform_indices = @transform_12, window_bounds = array<i64: 32, 1>}, {pipeline_mode = #tpu.pipeline_mode<synchronous>, transform_indices = @transform_13, window_bounds = array<i64: 32, 288>}, {pipeline_mode = #tpu.pipeline_mode<synchronous>, transform_indices = @transform_14, window_bounds = array<i64: 32, 288>}, {pipeline_mode = #tpu.pipeline_mode<synchronous>, transform_indices = @transform_15, window_bounds = array<i64: 32, 1>}, {pipeline_mode = #tpu.pipeline_mode<synchronous>, transform_indices = @transform_16, window_bounds = array<i64: 24, 288>}, {pipeline_mode = #tpu.pipeline_mode<synchronous>, transform_indices = @transform_17, window_bounds = array<i64: 24, 288>}, {pipeline_mode = #tpu.pipeline_mode<synchronous>, transform_indices = @transform_18, window_bounds = array<i64: 24, 1>}, {transform_indices = @transform_19, window_bounds = array<i64: 1, 3, 256>}, {transform_indices = @transform_20, window_bounds = array<i64: 1, 3, 256>}, {transform_indices = @transform_21, window_bounds = array<i64: 1, 24, 256>}]} {
    %c0 = arith.constant 0 : index
    %c0_0 = arith.constant 0 : index
    %0 = vector.load %arg2[%c0, %c0_0] : memref<9x256xf32, #tpu.memory_space<vmem>>, vector<9x256xf32>
    %c0_1 = arith.constant 0 : index
    %c0_2 = arith.constant 0 : index
    %c0_3 = arith.constant 0 : index
    %1 = vector.load %arg1[%c0_1, %c0_2, %c0_3] : memref<1x8x256xf32, #tpu.memory_space<vmem>>, vector<1x8x256xf32>
    %2 = vector.shape_cast %1 : vector<1x8x256xf32> to vector<8x256xf32>
    %3 = vector.extract_strided_slice %2 {offsets = [0, 0], sizes = [3, 256], strides = [1, 1]} : vector<8x256xf32> to vector<3x256xf32>
    %c17_i32 = arith.constant 17 : i32
    %4 = tpu.dynamic_rotate %2 by %c17_i32 dim 1 : vector<8x256xf32>, i32 -> vector<8x256xf32>
    %5 = vector.extract_strided_slice %0 {offsets = [0, 0], sizes = [1, 256], strides = [1, 1]} : vector<9x256xf32> to vector<1x256xf32>
    %6 = vector.broadcast %5 : vector<1x256xf32> to vector<8x256xf32>
    %7 = arith.mulf %4, %6 : vector<8x256xf32>
    %c16_i32 = arith.constant 16 : i32
    %8 = tpu.dynamic_rotate %2 by %c16_i32 dim 1 : vector<8x256xf32>, i32 -> vector<8x256xf32>
    %9 = vector.extract_strided_slice %0 {offsets = [1, 0], sizes = [1, 256], strides = [1, 1]} : vector<9x256xf32> to vector<1x256xf32>
    %10 = vector.broadcast %9 : vector<1x256xf32> to vector<8x256xf32>
    %11 = arith.mulf %8, %10 : vector<8x256xf32>
    %c15_i32 = arith.constant 15 : i32
    %12 = tpu.dynamic_rotate %2 by %c15_i32 dim 1 : vector<8x256xf32>, i32 -> vector<8x256xf32>
    %13 = vector.extract_strided_slice %0 {offsets = [2, 0], sizes = [1, 256], strides = [1, 1]} : vector<9x256xf32> to vector<1x256xf32>
    %14 = vector.broadcast %13 : vector<1x256xf32> to vector<8x256xf32>
    %15 = arith.mulf %12, %14 : vector<8x256xf32>
    %c1_i32 = arith.constant 1 : i32
    %16 = tpu.dynamic_rotate %2 by %c1_i32 dim 1 : vector<8x256xf32>, i32 -> vector<8x256xf32>
    %17 = vector.extract_strided_slice %0 {offsets = [3, 0], sizes = [1, 256], strides = [1, 1]} : vector<9x256xf32> to vector<1x256xf32>
    %18 = vector.broadcast %17 : vector<1x256xf32> to vector<8x256xf32>
    %19 = arith.mulf %16, %18 : vector<8x256xf32>
    %c255_i32 = arith.constant 255 : i32
    %20 = tpu.dynamic_rotate %2 by %c255_i32 dim 1 : vector<8x256xf32>, i32 -> vector<8x256xf32>
    %21 = vector.extract_strided_slice %0 {offsets = [5, 0], sizes = [1, 256], strides = [1, 1]} : vector<9x256xf32> to vector<1x256xf32>
    %22 = vector.broadcast %21 : vector<1x256xf32> to vector<8x256xf32>
    %23 = arith.mulf %20, %22 : vector<8x256xf32>
    %c241_i32 = arith.constant 241 : i32
    %24 = tpu.dynamic_rotate %2 by %c241_i32 dim 1 : vector<8x256xf32>, i32 -> vector<8x256xf32>
    %25 = vector.extract_strided_slice %0 {offsets = [6, 0], sizes = [1, 256], strides = [1, 1]} : vector<9x256xf32> to vector<1x256xf32>
    %26 = vector.broadcast %25 : vector<1x256xf32> to vector<8x256xf32>
    %27 = arith.mulf %24, %26 : vector<8x256xf32>
    %c240_i32 = arith.constant 240 : i32
    %28 = tpu.dynamic_rotate %2 by %c240_i32 dim 1 : vector<8x256xf32>, i32 -> vector<8x256xf32>
    %29 = vector.extract_strided_slice %0 {offsets = [7, 0], sizes = [1, 256], strides = [1, 1]} : vector<9x256xf32> to vector<1x256xf32>
    %30 = vector.broadcast %29 : vector<1x256xf32> to vector<8x256xf32>
    %31 = arith.mulf %28, %30 : vector<8x256xf32>
    %c239_i32 = arith.constant 239 : i32
    %32 = tpu.dynamic_rotate %2 by %c239_i32 dim 1 : vector<8x256xf32>, i32 -> vector<8x256xf32>
    %33 = vector.extract_strided_slice %0 {offsets = [8, 0], sizes = [1, 256], strides = [1, 1]} : vector<9x256xf32> to vector<1x256xf32>
    %34 = vector.broadcast %33 : vector<1x256xf32> to vector<8x256xf32>
    %35 = arith.mulf %32, %34 : vector<8x256xf32>
    %36 = tpu.concatenate %7, %11, %15, %19, %2, %23, %27, %31, %35 in 0 : vector<8x256xf32>, vector<8x256xf32>, vector<8x256xf32>, vector<8x256xf32>, vector<8x256xf32>, vector<8x256xf32>, vector<8x256xf32>, vector<8x256xf32>, vector<8x256xf32> -> vector<72x256xf32>
    %37 = arith.truncf %36 : vector<72x256xf32> to vector<72x256xbf16>
    %c0_4 = arith.constant 0 : index
    %c0_5 = arith.constant 0 : index
    %38 = vector.load %arg3[%c0_4, %c0_5] : memref<32x72xbf16, #tpu.memory_space<vmem>>, vector<32x72xbf16>
    %cst = arith.constant dense<0.000000e+00> : vector<32x256xf32>
    %39 = tpu.matmul %38, %37, %cst {dimension_numbers = #tpu.dot_dimension_numbers<[1], [0], [0], [1], [0, 0, 1, 1], [], []>} : vector<32x72xbf16>, vector<72x256xbf16>, vector<32x256xf32> -> vector<32x256xf32>
    %c0_6 = arith.constant 0 : index
    %c0_7 = arith.constant 0 : index
    %40 = vector.load %arg4[%c0_6, %c0_7] : memref<32x1xf32, #tpu.memory_space<vmem>>, vector<32x1xf32>
    %41 = vector.broadcast %40 : vector<32x1xf32> to vector<32x256xf32>
    %42 = arith.addf %39, %41 : vector<32x256xf32>
    %cst_8 = arith.constant 0.000000e+00 : f32
    %43 = vector.broadcast %cst_8 : f32 to vector<32x256xf32>
    %44 = arith.maximumf %42, %43 : vector<32x256xf32>
    %c17_i32_9 = arith.constant 17 : i32
    %45 = tpu.dynamic_rotate %44 by %c17_i32_9 dim 1 : vector<32x256xf32>, i32 -> vector<32x256xf32>
    %46 = vector.extract_strided_slice %0 {offsets = [0, 0], sizes = [1, 256], strides = [1, 1]} : vector<9x256xf32> to vector<1x256xf32>
    %47 = vector.broadcast %46 : vector<1x256xf32> to vector<32x256xf32>
    %48 = arith.mulf %45, %47 : vector<32x256xf32>
    %c16_i32_10 = arith.constant 16 : i32
    %49 = tpu.dynamic_rotate %44 by %c16_i32_10 dim 1 : vector<32x256xf32>, i32 -> vector<32x256xf32>
    %50 = vector.extract_strided_slice %0 {offsets = [1, 0], sizes = [1, 256], strides = [1, 1]} : vector<9x256xf32> to vector<1x256xf32>
    %51 = vector.broadcast %50 : vector<1x256xf32> to vector<32x256xf32>
    %52 = arith.mulf %49, %51 : vector<32x256xf32>
    %c15_i32_11 = arith.constant 15 : i32
    %53 = tpu.dynamic_rotate %44 by %c15_i32_11 dim 1 : vector<32x256xf32>, i32 -> vector<32x256xf32>
    %54 = vector.extract_strided_slice %0 {offsets = [2, 0], sizes = [1, 256], strides = [1, 1]} : vector<9x256xf32> to vector<1x256xf32>
    %55 = vector.broadcast %54 : vector<1x256xf32> to vector<32x256xf32>
    %56 = arith.mulf %53, %55 : vector<32x256xf32>
    %c1_i32_12 = arith.constant 1 : i32
    %57 = tpu.dynamic_rotate %44 by %c1_i32_12 dim 1 : vector<32x256xf32>, i32 -> vector<32x256xf32>
    %58 = vector.extract_strided_slice %0 {offsets = [3, 0], sizes = [1, 256], strides = [1, 1]} : vector<9x256xf32> to vector<1x256xf32>
    %59 = vector.broadcast %58 : vector<1x256xf32> to vector<32x256xf32>
    %60 = arith.mulf %57, %59 : vector<32x256xf32>
    %c255_i32_13 = arith.constant 255 : i32
    %61 = tpu.dynamic_rotate %44 by %c255_i32_13 dim 1 : vector<32x256xf32>, i32 -> vector<32x256xf32>
    %62 = vector.extract_strided_slice %0 {offsets = [5, 0], sizes = [1, 256], strides = [1, 1]} : vector<9x256xf32> to vector<1x256xf32>
    %63 = vector.broadcast %62 : vector<1x256xf32> to vector<32x256xf32>
    %64 = arith.mulf %61, %63 : vector<32x256xf32>
    %c241_i32_14 = arith.constant 241 : i32
    %65 = tpu.dynamic_rotate %44 by %c241_i32_14 dim 1 : vector<32x256xf32>, i32 -> vector<32x256xf32>
    %66 = vector.extract_strided_slice %0 {offsets = [6, 0], sizes = [1, 256], strides = [1, 1]} : vector<9x256xf32> to vector<1x256xf32>
    %67 = vector.broadcast %66 : vector<1x256xf32> to vector<32x256xf32>
    %68 = arith.mulf %65, %67 : vector<32x256xf32>
    %c240_i32_15 = arith.constant 240 : i32
    %69 = tpu.dynamic_rotate %44 by %c240_i32_15 dim 1 : vector<32x256xf32>, i32 -> vector<32x256xf32>
    %70 = vector.extract_strided_slice %0 {offsets = [7, 0], sizes = [1, 256], strides = [1, 1]} : vector<9x256xf32> to vector<1x256xf32>
    %71 = vector.broadcast %70 : vector<1x256xf32> to vector<32x256xf32>
    %72 = arith.mulf %69, %71 : vector<32x256xf32>
    %c239_i32_16 = arith.constant 239 : i32
    %73 = tpu.dynamic_rotate %44 by %c239_i32_16 dim 1 : vector<32x256xf32>, i32 -> vector<32x256xf32>
    %74 = vector.extract_strided_slice %0 {offsets = [8, 0], sizes = [1, 256], strides = [1, 1]} : vector<9x256xf32> to vector<1x256xf32>
    %75 = vector.broadcast %74 : vector<1x256xf32> to vector<32x256xf32>
    %76 = arith.mulf %73, %75 : vector<32x256xf32>
    %77 = tpu.concatenate %48, %52, %56, %60, %44, %64, %68, %72, %76 in 0 : vector<32x256xf32>, vector<32x256xf32>, vector<32x256xf32>, vector<32x256xf32>, vector<32x256xf32>, vector<32x256xf32>, vector<32x256xf32>, vector<32x256xf32>, vector<32x256xf32> -> vector<288x256xf32>
    %78 = arith.truncf %77 : vector<288x256xf32> to vector<288x256xbf16>
    %c0_17 = arith.constant 0 : index
    %c0_18 = arith.constant 0 : index
    %79 = vector.load %arg5[%c0_17, %c0_18] : memref<32x288xbf16, #tpu.memory_space<vmem>>, vector<32x288xbf16>
    %cst_19 = arith.constant dense<0.000000e+00> : vector<32x256xf32>
    %80 = tpu.matmul %79, %78, %cst_19 {dimension_numbers = #tpu.dot_dimension_numbers<[1], [0], [0], [1], [0, 0, 1, 1], [], []>} : vector<32x288xbf16>, vector<288x256xbf16>, vector<32x256xf32> -> vector<32x256xf32>
    %c0_20 = arith.constant 0 : index
    %c0_21 = arith.constant 0 : index
    %81 = vector.load %arg6[%c0_20, %c0_21] : memref<32x1xf32, #tpu.memory_space<vmem>>, vector<32x1xf32>
    %82 = vector.broadcast %81 : vector<32x1xf32> to vector<32x256xf32>
    %83 = arith.addf %80, %82 : vector<32x256xf32>
    %cst_22 = arith.constant 0.000000e+00 : f32
    %84 = vector.broadcast %cst_22 : f32 to vector<32x256xf32>
    %85 = arith.maximumf %83, %84 : vector<32x256xf32>
    %c17_i32_23 = arith.constant 17 : i32
    %86 = tpu.dynamic_rotate %85 by %c17_i32_23 dim 1 : vector<32x256xf32>, i32 -> vector<32x256xf32>
    %87 = vector.extract_strided_slice %0 {offsets = [0, 0], sizes = [1, 256], strides = [1, 1]} : vector<9x256xf32> to vector<1x256xf32>
    %88 = vector.broadcast %87 : vector<1x256xf32> to vector<32x256xf32>
    %89 = arith.mulf %86, %88 : vector<32x256xf32>
    %c16_i32_24 = arith.constant 16 : i32
    %90 = tpu.dynamic_rotate %85 by %c16_i32_24 dim 1 : vector<32x256xf32>, i32 -> vector<32x256xf32>
    %91 = vector.extract_strided_slice %0 {offsets = [1, 0], sizes = [1, 256], strides = [1, 1]} : vector<9x256xf32> to vector<1x256xf32>
    %92 = vector.broadcast %91 : vector<1x256xf32> to vector<32x256xf32>
    %93 = arith.mulf %90, %92 : vector<32x256xf32>
    %c15_i32_25 = arith.constant 15 : i32
    %94 = tpu.dynamic_rotate %85 by %c15_i32_25 dim 1 : vector<32x256xf32>, i32 -> vector<32x256xf32>
    %95 = vector.extract_strided_slice %0 {offsets = [2, 0], sizes = [1, 256], strides = [1, 1]} : vector<9x256xf32> to vector<1x256xf32>
    %96 = vector.broadcast %95 : vector<1x256xf32> to vector<32x256xf32>
    %97 = arith.mulf %94, %96 : vector<32x256xf32>
    %c1_i32_26 = arith.constant 1 : i32
    %98 = tpu.dynamic_rotate %85 by %c1_i32_26 dim 1 : vector<32x256xf32>, i32 -> vector<32x256xf32>
    %99 = vector.extract_strided_slice %0 {offsets = [3, 0], sizes = [1, 256], strides = [1, 1]} : vector<9x256xf32> to vector<1x256xf32>
    %100 = vector.broadcast %99 : vector<1x256xf32> to vector<32x256xf32>
    %101 = arith.mulf %98, %100 : vector<32x256xf32>
    %c255_i32_27 = arith.constant 255 : i32
    %102 = tpu.dynamic_rotate %85 by %c255_i32_27 dim 1 : vector<32x256xf32>, i32 -> vector<32x256xf32>
    %103 = vector.extract_strided_slice %0 {offsets = [5, 0], sizes = [1, 256], strides = [1, 1]} : vector<9x256xf32> to vector<1x256xf32>
    %104 = vector.broadcast %103 : vector<1x256xf32> to vector<32x256xf32>
    %105 = arith.mulf %102, %104 : vector<32x256xf32>
    %c241_i32_28 = arith.constant 241 : i32
    %106 = tpu.dynamic_rotate %85 by %c241_i32_28 dim 1 : vector<32x256xf32>, i32 -> vector<32x256xf32>
    %107 = vector.extract_strided_slice %0 {offsets = [6, 0], sizes = [1, 256], strides = [1, 1]} : vector<9x256xf32> to vector<1x256xf32>
    %108 = vector.broadcast %107 : vector<1x256xf32> to vector<32x256xf32>
    %109 = arith.mulf %106, %108 : vector<32x256xf32>
    %c240_i32_29 = arith.constant 240 : i32
    %110 = tpu.dynamic_rotate %85 by %c240_i32_29 dim 1 : vector<32x256xf32>, i32 -> vector<32x256xf32>
    %111 = vector.extract_strided_slice %0 {offsets = [7, 0], sizes = [1, 256], strides = [1, 1]} : vector<9x256xf32> to vector<1x256xf32>
    %112 = vector.broadcast %111 : vector<1x256xf32> to vector<32x256xf32>
    %113 = arith.mulf %110, %112 : vector<32x256xf32>
    %c239_i32_30 = arith.constant 239 : i32
    %114 = tpu.dynamic_rotate %85 by %c239_i32_30 dim 1 : vector<32x256xf32>, i32 -> vector<32x256xf32>
    %115 = vector.extract_strided_slice %0 {offsets = [8, 0], sizes = [1, 256], strides = [1, 1]} : vector<9x256xf32> to vector<1x256xf32>
    %116 = vector.broadcast %115 : vector<1x256xf32> to vector<32x256xf32>
    %117 = arith.mulf %114, %116 : vector<32x256xf32>
    %118 = tpu.concatenate %89, %93, %97, %101, %85, %105, %109, %113, %117 in 0 : vector<32x256xf32>, vector<32x256xf32>, vector<32x256xf32>, vector<32x256xf32>, vector<32x256xf32>, vector<32x256xf32>, vector<32x256xf32>, vector<32x256xf32>, vector<32x256xf32> -> vector<288x256xf32>
    %119 = arith.truncf %118 : vector<288x256xf32> to vector<288x256xbf16>
    %c0_31 = arith.constant 0 : index
    %c0_32 = arith.constant 0 : index
    %120 = vector.load %arg7[%c0_31, %c0_32] : memref<32x288xbf16, #tpu.memory_space<vmem>>, vector<32x288xbf16>
    %cst_33 = arith.constant dense<0.000000e+00> : vector<32x256xf32>
    %121 = tpu.matmul %120, %119, %cst_33 {dimension_numbers = #tpu.dot_dimension_numbers<[1], [0], [0], [1], [0, 0, 1, 1], [], []>} : vector<32x288xbf16>, vector<288x256xbf16>, vector<32x256xf32> -> vector<32x256xf32>
    %c0_34 = arith.constant 0 : index
    %c0_35 = arith.constant 0 : index
    %122 = vector.load %arg8[%c0_34, %c0_35] : memref<32x1xf32, #tpu.memory_space<vmem>>, vector<32x1xf32>
    %123 = vector.broadcast %122 : vector<32x1xf32> to vector<32x256xf32>
    %124 = arith.addf %121, %123 : vector<32x256xf32>
    %cst_36 = arith.constant 0.000000e+00 : f32
    %125 = vector.broadcast %cst_36 : f32 to vector<32x256xf32>
    %126 = arith.maximumf %124, %125 : vector<32x256xf32>
    %c17_i32_37 = arith.constant 17 : i32
    %127 = tpu.dynamic_rotate %126 by %c17_i32_37 dim 1 : vector<32x256xf32>, i32 -> vector<32x256xf32>
    %128 = vector.extract_strided_slice %0 {offsets = [0, 0], sizes = [1, 256], strides = [1, 1]} : vector<9x256xf32> to vector<1x256xf32>
    %129 = vector.broadcast %128 : vector<1x256xf32> to vector<32x256xf32>
    %130 = arith.mulf %127, %129 : vector<32x256xf32>
    %c16_i32_38 = arith.constant 16 : i32
    %131 = tpu.dynamic_rotate %126 by %c16_i32_38 dim 1 : vector<32x256xf32>, i32 -> vector<32x256xf32>
    %132 = vector.extract_strided_slice %0 {offsets = [1, 0], sizes = [1, 256], strides = [1, 1]} : vector<9x256xf32> to vector<1x256xf32>
    %133 = vector.broadcast %132 : vector<1x256xf32> to vector<32x256xf32>
    %134 = arith.mulf %131, %133 : vector<32x256xf32>
    %c15_i32_39 = arith.constant 15 : i32
    %135 = tpu.dynamic_rotate %126 by %c15_i32_39 dim 1 : vector<32x256xf32>, i32 -> vector<32x256xf32>
    %136 = vector.extract_strided_slice %0 {offsets = [2, 0], sizes = [1, 256], strides = [1, 1]} : vector<9x256xf32> to vector<1x256xf32>
    %137 = vector.broadcast %136 : vector<1x256xf32> to vector<32x256xf32>
    %138 = arith.mulf %135, %137 : vector<32x256xf32>
    %c1_i32_40 = arith.constant 1 : i32
    %139 = tpu.dynamic_rotate %126 by %c1_i32_40 dim 1 : vector<32x256xf32>, i32 -> vector<32x256xf32>
    %140 = vector.extract_strided_slice %0 {offsets = [3, 0], sizes = [1, 256], strides = [1, 1]} : vector<9x256xf32> to vector<1x256xf32>
    %141 = vector.broadcast %140 : vector<1x256xf32> to vector<32x256xf32>
    %142 = arith.mulf %139, %141 : vector<32x256xf32>
    %c255_i32_41 = arith.constant 255 : i32
    %143 = tpu.dynamic_rotate %126 by %c255_i32_41 dim 1 : vector<32x256xf32>, i32 -> vector<32x256xf32>
    %144 = vector.extract_strided_slice %0 {offsets = [5, 0], sizes = [1, 256], strides = [1, 1]} : vector<9x256xf32> to vector<1x256xf32>
    %145 = vector.broadcast %144 : vector<1x256xf32> to vector<32x256xf32>
    %146 = arith.mulf %143, %145 : vector<32x256xf32>
    %c241_i32_42 = arith.constant 241 : i32
    %147 = tpu.dynamic_rotate %126 by %c241_i32_42 dim 1 : vector<32x256xf32>, i32 -> vector<32x256xf32>
    %148 = vector.extract_strided_slice %0 {offsets = [6, 0], sizes = [1, 256], strides = [1, 1]} : vector<9x256xf32> to vector<1x256xf32>
    %149 = vector.broadcast %148 : vector<1x256xf32> to vector<32x256xf32>
    %150 = arith.mulf %147, %149 : vector<32x256xf32>
    %c240_i32_43 = arith.constant 240 : i32
    %151 = tpu.dynamic_rotate %126 by %c240_i32_43 dim 1 : vector<32x256xf32>, i32 -> vector<32x256xf32>
    %152 = vector.extract_strided_slice %0 {offsets = [7, 0], sizes = [1, 256], strides = [1, 1]} : vector<9x256xf32> to vector<1x256xf32>
    %153 = vector.broadcast %152 : vector<1x256xf32> to vector<32x256xf32>
    %154 = arith.mulf %151, %153 : vector<32x256xf32>
    %c239_i32_44 = arith.constant 239 : i32
    %155 = tpu.dynamic_rotate %126 by %c239_i32_44 dim 1 : vector<32x256xf32>, i32 -> vector<32x256xf32>
    %156 = vector.extract_strided_slice %0 {offsets = [8, 0], sizes = [1, 256], strides = [1, 1]} : vector<9x256xf32> to vector<1x256xf32>
    %157 = vector.broadcast %156 : vector<1x256xf32> to vector<32x256xf32>
    %158 = arith.mulf %155, %157 : vector<32x256xf32>
    %159 = tpu.concatenate %130, %134, %138, %142, %126, %146, %150, %154, %158 in 0 : vector<32x256xf32>, vector<32x256xf32>, vector<32x256xf32>, vector<32x256xf32>, vector<32x256xf32>, vector<32x256xf32>, vector<32x256xf32>, vector<32x256xf32>, vector<32x256xf32> -> vector<288x256xf32>
    %160 = arith.truncf %159 : vector<288x256xf32> to vector<288x256xbf16>
    %c0_45 = arith.constant 0 : index
    %c0_46 = arith.constant 0 : index
    %161 = vector.load %arg9[%c0_45, %c0_46] : memref<32x288xbf16, #tpu.memory_space<vmem>>, vector<32x288xbf16>
    %cst_47 = arith.constant dense<0.000000e+00> : vector<32x256xf32>
    %162 = tpu.matmul %161, %160, %cst_47 {dimension_numbers = #tpu.dot_dimension_numbers<[1], [0], [0], [1], [0, 0, 1, 1], [], []>} : vector<32x288xbf16>, vector<288x256xbf16>, vector<32x256xf32> -> vector<32x256xf32>
    %c0_48 = arith.constant 0 : index
    %c0_49 = arith.constant 0 : index
    %163 = vector.load %arg10[%c0_48, %c0_49] : memref<32x1xf32, #tpu.memory_space<vmem>>, vector<32x1xf32>
    %164 = vector.broadcast %163 : vector<32x1xf32> to vector<32x256xf32>
    %165 = arith.addf %162, %164 : vector<32x256xf32>
    %cst_50 = arith.constant 0.000000e+00 : f32
    %166 = vector.broadcast %cst_50 : f32 to vector<32x256xf32>
    %167 = arith.maximumf %165, %166 : vector<32x256xf32>
    %c17_i32_51 = arith.constant 17 : i32
    %168 = tpu.dynamic_rotate %167 by %c17_i32_51 dim 1 : vector<32x256xf32>, i32 -> vector<32x256xf32>
    %169 = vector.extract_strided_slice %0 {offsets = [0, 0], sizes = [1, 256], strides = [1, 1]} : vector<9x256xf32> to vector<1x256xf32>
    %170 = vector.broadcast %169 : vector<1x256xf32> to vector<32x256xf32>
    %171 = arith.mulf %168, %170 : vector<32x256xf32>
    %c16_i32_52 = arith.constant 16 : i32
    %172 = tpu.dynamic_rotate %167 by %c16_i32_52 dim 1 : vector<32x256xf32>, i32 -> vector<32x256xf32>
    %173 = vector.extract_strided_slice %0 {offsets = [1, 0], sizes = [1, 256], strides = [1, 1]} : vector<9x256xf32> to vector<1x256xf32>
    %174 = vector.broadcast %173 : vector<1x256xf32> to vector<32x256xf32>
    %175 = arith.mulf %172, %174 : vector<32x256xf32>
    %c15_i32_53 = arith.constant 15 : i32
    %176 = tpu.dynamic_rotate %167 by %c15_i32_53 dim 1 : vector<32x256xf32>, i32 -> vector<32x256xf32>
    %177 = vector.extract_strided_slice %0 {offsets = [2, 0], sizes = [1, 256], strides = [1, 1]} : vector<9x256xf32> to vector<1x256xf32>
    %178 = vector.broadcast %177 : vector<1x256xf32> to vector<32x256xf32>
    %179 = arith.mulf %176, %178 : vector<32x256xf32>
    %c1_i32_54 = arith.constant 1 : i32
    %180 = tpu.dynamic_rotate %167 by %c1_i32_54 dim 1 : vector<32x256xf32>, i32 -> vector<32x256xf32>
    %181 = vector.extract_strided_slice %0 {offsets = [3, 0], sizes = [1, 256], strides = [1, 1]} : vector<9x256xf32> to vector<1x256xf32>
    %182 = vector.broadcast %181 : vector<1x256xf32> to vector<32x256xf32>
    %183 = arith.mulf %180, %182 : vector<32x256xf32>
    %c255_i32_55 = arith.constant 255 : i32
    %184 = tpu.dynamic_rotate %167 by %c255_i32_55 dim 1 : vector<32x256xf32>, i32 -> vector<32x256xf32>
    %185 = vector.extract_strided_slice %0 {offsets = [5, 0], sizes = [1, 256], strides = [1, 1]} : vector<9x256xf32> to vector<1x256xf32>
    %186 = vector.broadcast %185 : vector<1x256xf32> to vector<32x256xf32>
    %187 = arith.mulf %184, %186 : vector<32x256xf32>
    %c241_i32_56 = arith.constant 241 : i32
    %188 = tpu.dynamic_rotate %167 by %c241_i32_56 dim 1 : vector<32x256xf32>, i32 -> vector<32x256xf32>
    %189 = vector.extract_strided_slice %0 {offsets = [6, 0], sizes = [1, 256], strides = [1, 1]} : vector<9x256xf32> to vector<1x256xf32>
    %190 = vector.broadcast %189 : vector<1x256xf32> to vector<32x256xf32>
    %191 = arith.mulf %188, %190 : vector<32x256xf32>
    %c240_i32_57 = arith.constant 240 : i32
    %192 = tpu.dynamic_rotate %167 by %c240_i32_57 dim 1 : vector<32x256xf32>, i32 -> vector<32x256xf32>
    %193 = vector.extract_strided_slice %0 {offsets = [7, 0], sizes = [1, 256], strides = [1, 1]} : vector<9x256xf32> to vector<1x256xf32>
    %194 = vector.broadcast %193 : vector<1x256xf32> to vector<32x256xf32>
    %195 = arith.mulf %192, %194 : vector<32x256xf32>
    %c239_i32_58 = arith.constant 239 : i32
    %196 = tpu.dynamic_rotate %167 by %c239_i32_58 dim 1 : vector<32x256xf32>, i32 -> vector<32x256xf32>
    %197 = vector.extract_strided_slice %0 {offsets = [8, 0], sizes = [1, 256], strides = [1, 1]} : vector<9x256xf32> to vector<1x256xf32>
    %198 = vector.broadcast %197 : vector<1x256xf32> to vector<32x256xf32>
    %199 = arith.mulf %196, %198 : vector<32x256xf32>
    %200 = tpu.concatenate %171, %175, %179, %183, %167, %187, %191, %195, %199 in 0 : vector<32x256xf32>, vector<32x256xf32>, vector<32x256xf32>, vector<32x256xf32>, vector<32x256xf32>, vector<32x256xf32>, vector<32x256xf32>, vector<32x256xf32>, vector<32x256xf32> -> vector<288x256xf32>
    %201 = arith.truncf %200 : vector<288x256xf32> to vector<288x256xbf16>
    %c0_59 = arith.constant 0 : index
    %c0_60 = arith.constant 0 : index
    %202 = vector.load %arg11[%c0_59, %c0_60] : memref<32x288xbf16, #tpu.memory_space<vmem>>, vector<32x288xbf16>
    %cst_61 = arith.constant dense<0.000000e+00> : vector<32x256xf32>
    %203 = tpu.matmul %202, %160, %cst_61 {dimension_numbers = #tpu.dot_dimension_numbers<[1], [0], [0], [1], [0, 0, 1, 1], [], []>} : vector<32x288xbf16>, vector<288x256xbf16>, vector<32x256xf32> -> vector<32x256xf32>
    %c0_62 = arith.constant 0 : index
    %c0_63 = arith.constant 0 : index
    %204 = vector.load %arg12[%c0_62, %c0_63] : memref<32x288xbf16, #tpu.memory_space<vmem>>, vector<32x288xbf16>
    %cst_64 = arith.constant dense<0.000000e+00> : vector<32x256xf32>
    %205 = tpu.matmul %204, %201, %cst_64 {dimension_numbers = #tpu.dot_dimension_numbers<[1], [0], [0], [1], [0, 0, 1, 1], [], []>} : vector<32x288xbf16>, vector<288x256xbf16>, vector<32x256xf32> -> vector<32x256xf32>
    %206 = arith.addf %203, %205 : vector<32x256xf32>
    %c0_65 = arith.constant 0 : index
    %c0_66 = arith.constant 0 : index
    %207 = vector.load %arg13[%c0_65, %c0_66] : memref<32x1xf32, #tpu.memory_space<vmem>>, vector<32x1xf32>
    %208 = vector.broadcast %207 : vector<32x1xf32> to vector<32x256xf32>
    %209 = arith.addf %206, %208 : vector<32x256xf32>
    %cst_67 = arith.constant 0.000000e+00 : f32
    %210 = vector.broadcast %cst_67 : f32 to vector<32x256xf32>
    %211 = arith.maximumf %209, %210 : vector<32x256xf32>
    %c17_i32_68 = arith.constant 17 : i32
    %212 = tpu.dynamic_rotate %211 by %c17_i32_68 dim 1 : vector<32x256xf32>, i32 -> vector<32x256xf32>
    %213 = vector.extract_strided_slice %0 {offsets = [0, 0], sizes = [1, 256], strides = [1, 1]} : vector<9x256xf32> to vector<1x256xf32>
    %214 = vector.broadcast %213 : vector<1x256xf32> to vector<32x256xf32>
    %215 = arith.mulf %212, %214 : vector<32x256xf32>
    %c16_i32_69 = arith.constant 16 : i32
    %216 = tpu.dynamic_rotate %211 by %c16_i32_69 dim 1 : vector<32x256xf32>, i32 -> vector<32x256xf32>
    %217 = vector.extract_strided_slice %0 {offsets = [1, 0], sizes = [1, 256], strides = [1, 1]} : vector<9x256xf32> to vector<1x256xf32>
    %218 = vector.broadcast %217 : vector<1x256xf32> to vector<32x256xf32>
    %219 = arith.mulf %216, %218 : vector<32x256xf32>
    %c15_i32_70 = arith.constant 15 : i32
    %220 = tpu.dynamic_rotate %211 by %c15_i32_70 dim 1 : vector<32x256xf32>, i32 -> vector<32x256xf32>
    %221 = vector.extract_strided_slice %0 {offsets = [2, 0], sizes = [1, 256], strides = [1, 1]} : vector<9x256xf32> to vector<1x256xf32>
    %222 = vector.broadcast %221 : vector<1x256xf32> to vector<32x256xf32>
    %223 = arith.mulf %220, %222 : vector<32x256xf32>
    %c1_i32_71 = arith.constant 1 : i32
    %224 = tpu.dynamic_rotate %211 by %c1_i32_71 dim 1 : vector<32x256xf32>, i32 -> vector<32x256xf32>
    %225 = vector.extract_strided_slice %0 {offsets = [3, 0], sizes = [1, 256], strides = [1, 1]} : vector<9x256xf32> to vector<1x256xf32>
    %226 = vector.broadcast %225 : vector<1x256xf32> to vector<32x256xf32>
    %227 = arith.mulf %224, %226 : vector<32x256xf32>
    %c255_i32_72 = arith.constant 255 : i32
    %228 = tpu.dynamic_rotate %211 by %c255_i32_72 dim 1 : vector<32x256xf32>, i32 -> vector<32x256xf32>
    %229 = vector.extract_strided_slice %0 {offsets = [5, 0], sizes = [1, 256], strides = [1, 1]} : vector<9x256xf32> to vector<1x256xf32>
    %230 = vector.broadcast %229 : vector<1x256xf32> to vector<32x256xf32>
    %231 = arith.mulf %228, %230 : vector<32x256xf32>
    %c241_i32_73 = arith.constant 241 : i32
    %232 = tpu.dynamic_rotate %211 by %c241_i32_73 dim 1 : vector<32x256xf32>, i32 -> vector<32x256xf32>
    %233 = vector.extract_strided_slice %0 {offsets = [6, 0], sizes = [1, 256], strides = [1, 1]} : vector<9x256xf32> to vector<1x256xf32>
    %234 = vector.broadcast %233 : vector<1x256xf32> to vector<32x256xf32>
    %235 = arith.mulf %232, %234 : vector<32x256xf32>
    %c240_i32_74 = arith.constant 240 : i32
    %236 = tpu.dynamic_rotate %211 by %c240_i32_74 dim 1 : vector<32x256xf32>, i32 -> vector<32x256xf32>
    %237 = vector.extract_strided_slice %0 {offsets = [7, 0], sizes = [1, 256], strides = [1, 1]} : vector<9x256xf32> to vector<1x256xf32>
    %238 = vector.broadcast %237 : vector<1x256xf32> to vector<32x256xf32>
    %239 = arith.mulf %236, %238 : vector<32x256xf32>
    %c239_i32_75 = arith.constant 239 : i32
    %240 = tpu.dynamic_rotate %211 by %c239_i32_75 dim 1 : vector<32x256xf32>, i32 -> vector<32x256xf32>
    %241 = vector.extract_strided_slice %0 {offsets = [8, 0], sizes = [1, 256], strides = [1, 1]} : vector<9x256xf32> to vector<1x256xf32>
    %242 = vector.broadcast %241 : vector<1x256xf32> to vector<32x256xf32>
    %243 = arith.mulf %240, %242 : vector<32x256xf32>
    %244 = tpu.concatenate %215, %219, %223, %227, %211, %231, %235, %239, %243 in 0 : vector<32x256xf32>, vector<32x256xf32>, vector<32x256xf32>, vector<32x256xf32>, vector<32x256xf32>, vector<32x256xf32>, vector<32x256xf32>, vector<32x256xf32>, vector<32x256xf32> -> vector<288x256xf32>
    %245 = arith.truncf %244 : vector<288x256xf32> to vector<288x256xbf16>
    %c0_76 = arith.constant 0 : index
    %c0_77 = arith.constant 0 : index
    %246 = vector.load %arg14[%c0_76, %c0_77] : memref<32x288xbf16, #tpu.memory_space<vmem>>, vector<32x288xbf16>
    %cst_78 = arith.constant dense<0.000000e+00> : vector<32x256xf32>
    %247 = tpu.matmul %246, %119, %cst_78 {dimension_numbers = #tpu.dot_dimension_numbers<[1], [0], [0], [1], [0, 0, 1, 1], [], []>} : vector<32x288xbf16>, vector<288x256xbf16>, vector<32x256xf32> -> vector<32x256xf32>
    %c0_79 = arith.constant 0 : index
    %c0_80 = arith.constant 0 : index
    %248 = vector.load %arg15[%c0_79, %c0_80] : memref<32x288xbf16, #tpu.memory_space<vmem>>, vector<32x288xbf16>
    %cst_81 = arith.constant dense<0.000000e+00> : vector<32x256xf32>
    %249 = tpu.matmul %248, %245, %cst_81 {dimension_numbers = #tpu.dot_dimension_numbers<[1], [0], [0], [1], [0, 0, 1, 1], [], []>} : vector<32x288xbf16>, vector<288x256xbf16>, vector<32x256xf32> -> vector<32x256xf32>
    %250 = arith.addf %247, %249 : vector<32x256xf32>
    %c0_82 = arith.constant 0 : index
    %c0_83 = arith.constant 0 : index
    %251 = vector.load %arg16[%c0_82, %c0_83] : memref<32x1xf32, #tpu.memory_space<vmem>>, vector<32x1xf32>
    %252 = vector.broadcast %251 : vector<32x1xf32> to vector<32x256xf32>
    %253 = arith.addf %250, %252 : vector<32x256xf32>
    %cst_84 = arith.constant 0.000000e+00 : f32
    %254 = vector.broadcast %cst_84 : f32 to vector<32x256xf32>
    %255 = arith.maximumf %253, %254 : vector<32x256xf32>
    %c17_i32_85 = arith.constant 17 : i32
    %256 = tpu.dynamic_rotate %255 by %c17_i32_85 dim 1 : vector<32x256xf32>, i32 -> vector<32x256xf32>
    %257 = vector.extract_strided_slice %0 {offsets = [0, 0], sizes = [1, 256], strides = [1, 1]} : vector<9x256xf32> to vector<1x256xf32>
    %258 = vector.broadcast %257 : vector<1x256xf32> to vector<32x256xf32>
    %259 = arith.mulf %256, %258 : vector<32x256xf32>
    %c16_i32_86 = arith.constant 16 : i32
    %260 = tpu.dynamic_rotate %255 by %c16_i32_86 dim 1 : vector<32x256xf32>, i32 -> vector<32x256xf32>
    %261 = vector.extract_strided_slice %0 {offsets = [1, 0], sizes = [1, 256], strides = [1, 1]} : vector<9x256xf32> to vector<1x256xf32>
    %262 = vector.broadcast %261 : vector<1x256xf32> to vector<32x256xf32>
    %263 = arith.mulf %260, %262 : vector<32x256xf32>
    %c15_i32_87 = arith.constant 15 : i32
    %264 = tpu.dynamic_rotate %255 by %c15_i32_87 dim 1 : vector<32x256xf32>, i32 -> vector<32x256xf32>
    %265 = vector.extract_strided_slice %0 {offsets = [2, 0], sizes = [1, 256], strides = [1, 1]} : vector<9x256xf32> to vector<1x256xf32>
    %266 = vector.broadcast %265 : vector<1x256xf32> to vector<32x256xf32>
    %267 = arith.mulf %264, %266 : vector<32x256xf32>
    %c1_i32_88 = arith.constant 1 : i32
    %268 = tpu.dynamic_rotate %255 by %c1_i32_88 dim 1 : vector<32x256xf32>, i32 -> vector<32x256xf32>
    %269 = vector.extract_strided_slice %0 {offsets = [3, 0], sizes = [1, 256], strides = [1, 1]} : vector<9x256xf32> to vector<1x256xf32>
    %270 = vector.broadcast %269 : vector<1x256xf32> to vector<32x256xf32>
    %271 = arith.mulf %268, %270 : vector<32x256xf32>
    %c255_i32_89 = arith.constant 255 : i32
    %272 = tpu.dynamic_rotate %255 by %c255_i32_89 dim 1 : vector<32x256xf32>, i32 -> vector<32x256xf32>
    %273 = vector.extract_strided_slice %0 {offsets = [5, 0], sizes = [1, 256], strides = [1, 1]} : vector<9x256xf32> to vector<1x256xf32>
    %274 = vector.broadcast %273 : vector<1x256xf32> to vector<32x256xf32>
    %275 = arith.mulf %272, %274 : vector<32x256xf32>
    %c241_i32_90 = arith.constant 241 : i32
    %276 = tpu.dynamic_rotate %255 by %c241_i32_90 dim 1 : vector<32x256xf32>, i32 -> vector<32x256xf32>
    %277 = vector.extract_strided_slice %0 {offsets = [6, 0], sizes = [1, 256], strides = [1, 1]} : vector<9x256xf32> to vector<1x256xf32>
    %278 = vector.broadcast %277 : vector<1x256xf32> to vector<32x256xf32>
    %279 = arith.mulf %276, %278 : vector<32x256xf32>
    %c240_i32_91 = arith.constant 240 : i32
    %280 = tpu.dynamic_rotate %255 by %c240_i32_91 dim 1 : vector<32x256xf32>, i32 -> vector<32x256xf32>
    %281 = vector.extract_strided_slice %0 {offsets = [7, 0], sizes = [1, 256], strides = [1, 1]} : vector<9x256xf32> to vector<1x256xf32>
    %282 = vector.broadcast %281 : vector<1x256xf32> to vector<32x256xf32>
    %283 = arith.mulf %280, %282 : vector<32x256xf32>
    %c239_i32_92 = arith.constant 239 : i32
    %284 = tpu.dynamic_rotate %255 by %c239_i32_92 dim 1 : vector<32x256xf32>, i32 -> vector<32x256xf32>
    %285 = vector.extract_strided_slice %0 {offsets = [8, 0], sizes = [1, 256], strides = [1, 1]} : vector<9x256xf32> to vector<1x256xf32>
    %286 = vector.broadcast %285 : vector<1x256xf32> to vector<32x256xf32>
    %287 = arith.mulf %284, %286 : vector<32x256xf32>
    %288 = tpu.concatenate %259, %263, %267, %271, %255, %275, %279, %283, %287 in 0 : vector<32x256xf32>, vector<32x256xf32>, vector<32x256xf32>, vector<32x256xf32>, vector<32x256xf32>, vector<32x256xf32>, vector<32x256xf32>, vector<32x256xf32>, vector<32x256xf32> -> vector<288x256xf32>
    %289 = arith.truncf %288 : vector<288x256xf32> to vector<288x256xbf16>
    %c0_93 = arith.constant 0 : index
    %c0_94 = arith.constant 0 : index
    %290 = vector.load %arg17[%c0_93, %c0_94] : memref<24x288xbf16, #tpu.memory_space<vmem>>, vector<24x288xbf16>
    %cst_95 = arith.constant dense<0.000000e+00> : vector<24x256xf32>
    %291 = tpu.matmul %290, %78, %cst_95 {dimension_numbers = #tpu.dot_dimension_numbers<[1], [0], [0], [1], [0, 0, 1, 1], [], []>} : vector<24x288xbf16>, vector<288x256xbf16>, vector<24x256xf32> -> vector<24x256xf32>
    %c0_96 = arith.constant 0 : index
    %c0_97 = arith.constant 0 : index
    %292 = vector.load %arg18[%c0_96, %c0_97] : memref<24x288xbf16, #tpu.memory_space<vmem>>, vector<24x288xbf16>
    %cst_98 = arith.constant dense<0.000000e+00> : vector<24x256xf32>
    %293 = tpu.matmul %292, %289, %cst_98 {dimension_numbers = #tpu.dot_dimension_numbers<[1], [0], [0], [1], [0, 0, 1, 1], [], []>} : vector<24x288xbf16>, vector<288x256xbf16>, vector<24x256xf32> -> vector<24x256xf32>
    %294 = arith.addf %291, %293 : vector<24x256xf32>
    %c0_99 = arith.constant 0 : index
    %c0_100 = arith.constant 0 : index
    %295 = vector.load %arg19[%c0_99, %c0_100] : memref<24x1xf32, #tpu.memory_space<vmem>>, vector<24x1xf32>
    %296 = vector.broadcast %295 : vector<24x1xf32> to vector<24x256xf32>
    %297 = arith.addf %294, %296 : vector<24x256xf32>
    %298 = math.tanh %297 : vector<24x256xf32>
    %299 = vector.extract_strided_slice %298 {offsets = [0, 0], sizes = [3, 256], strides = [1, 1]} : vector<24x256xf32> to vector<3x256xf32>
    %300 = arith.mulf %3, %3 : vector<3x256xf32>
    %301 = arith.subf %300, %3 : vector<3x256xf32>
    %302 = arith.mulf %299, %301 : vector<3x256xf32>
    %303 = arith.addf %3, %302 : vector<3x256xf32>
    %304 = vector.extract_strided_slice %298 {offsets = [3, 0], sizes = [3, 256], strides = [1, 1]} : vector<24x256xf32> to vector<3x256xf32>
    %305 = arith.mulf %303, %303 : vector<3x256xf32>
    %306 = arith.subf %305, %303 : vector<3x256xf32>
    %307 = arith.mulf %304, %306 : vector<3x256xf32>
    %308 = arith.addf %303, %307 : vector<3x256xf32>
    %309 = vector.extract_strided_slice %298 {offsets = [6, 0], sizes = [3, 256], strides = [1, 1]} : vector<24x256xf32> to vector<3x256xf32>
    %310 = arith.mulf %308, %308 : vector<3x256xf32>
    %311 = arith.subf %310, %308 : vector<3x256xf32>
    %312 = arith.mulf %309, %311 : vector<3x256xf32>
    %313 = arith.addf %308, %312 : vector<3x256xf32>
    %314 = vector.extract_strided_slice %298 {offsets = [9, 0], sizes = [3, 256], strides = [1, 1]} : vector<24x256xf32> to vector<3x256xf32>
    %315 = arith.mulf %313, %313 : vector<3x256xf32>
    %316 = arith.subf %315, %313 : vector<3x256xf32>
    %317 = arith.mulf %314, %316 : vector<3x256xf32>
    %318 = arith.addf %313, %317 : vector<3x256xf32>
    %319 = vector.extract_strided_slice %298 {offsets = [12, 0], sizes = [3, 256], strides = [1, 1]} : vector<24x256xf32> to vector<3x256xf32>
    %320 = arith.mulf %318, %318 : vector<3x256xf32>
    %321 = arith.subf %320, %318 : vector<3x256xf32>
    %322 = arith.mulf %319, %321 : vector<3x256xf32>
    %323 = arith.addf %318, %322 : vector<3x256xf32>
    %324 = vector.extract_strided_slice %298 {offsets = [15, 0], sizes = [3, 256], strides = [1, 1]} : vector<24x256xf32> to vector<3x256xf32>
    %325 = arith.mulf %323, %323 : vector<3x256xf32>
    %326 = arith.subf %325, %323 : vector<3x256xf32>
    %327 = arith.mulf %324, %326 : vector<3x256xf32>
    %328 = arith.addf %323, %327 : vector<3x256xf32>
    %329 = vector.extract_strided_slice %298 {offsets = [18, 0], sizes = [3, 256], strides = [1, 1]} : vector<24x256xf32> to vector<3x256xf32>
    %330 = arith.mulf %328, %328 : vector<3x256xf32>
    %331 = arith.subf %330, %328 : vector<3x256xf32>
    %332 = arith.mulf %329, %331 : vector<3x256xf32>
    %333 = arith.addf %328, %332 : vector<3x256xf32>
    %334 = vector.extract_strided_slice %298 {offsets = [21, 0], sizes = [3, 256], strides = [1, 1]} : vector<24x256xf32> to vector<3x256xf32>
    %335 = arith.mulf %333, %333 : vector<3x256xf32>
    %336 = arith.subf %335, %333 : vector<3x256xf32>
    %337 = arith.mulf %334, %336 : vector<3x256xf32>
    %338 = arith.addf %333, %337 : vector<3x256xf32>
    %c0_101 = arith.constant 0 : index
    %c0_102 = arith.constant 0 : index
    %c0_103 = arith.constant 0 : index
    %339 = vector.load %arg20[%c0_101, %c0_102, %c0_103] : memref<1x3x256xf32, #tpu.memory_space<vmem>>, vector<1x3x256xf32>
    %340 = vector.shape_cast %339 : vector<1x3x256xf32> to vector<3x256xf32>
    %341 = vector.shape_cast %318 : vector<3x256xf32> to vector<1x3x256xf32>
    tpu.vector_store %arg20[%c0_101, %c0_102, %c0_103], %341 {strides = array<i32>} : memref<1x3x256xf32, #tpu.memory_space<vmem>>, vector<1x3x256xf32>,
    %c0_104 = arith.constant 0 : index
    %c0_105 = arith.constant 0 : index
    %c0_106 = arith.constant 0 : index
    %342 = vector.load %arg21[%c0_104, %c0_105, %c0_106] : memref<1x3x256xf32, #tpu.memory_space<vmem>>, vector<1x3x256xf32>
    %343 = vector.shape_cast %342 : vector<1x3x256xf32> to vector<3x256xf32>
    %344 = vector.shape_cast %338 : vector<3x256xf32> to vector<1x3x256xf32>
    tpu.vector_store %arg21[%c0_104, %c0_105, %c0_106], %344 {strides = array<i32>} : memref<1x3x256xf32, #tpu.memory_space<vmem>>, vector<1x3x256xf32>,
    %c0_107 = arith.constant 0 : index
    %c0_108 = arith.constant 0 : index
    %c0_109 = arith.constant 0 : index
    %345 = vector.load %arg22[%c0_107, %c0_108, %c0_109] : memref<1x24x256xf32, #tpu.memory_space<vmem>>, vector<1x24x256xf32>
    %346 = vector.shape_cast %345 : vector<1x24x256xf32> to vector<24x256xf32>
    %347 = vector.shape_cast %298 : vector<24x256xf32> to vector<1x24x256xf32>
    tpu.vector_store %arg22[%c0_107, %c0_108, %c0_109], %347 {strides = array<i32>} : memref<1x24x256xf32, #tpu.memory_space<vmem>>, vector<1x24x256xf32>,
    return
  }
  func.func @transform_0(%arg0: i32) -> (i32, i32, i32) {
    %c0_i32 = arith.constant 0 : i32
    %c0_i32_0 = arith.constant 0 : i32
    %c0_i32_1 = arith.constant 0 : i32
    return %arg0, %c0_i32, %c0_i32_0 : i32, i32, i32
  }
  func.func @transform_1(%arg0: i32) -> (i32, i32) {
    %c0_i32 = arith.constant 0 : i32
    %c0_i32_0 = arith.constant 0 : i32
    %c0_i32_1 = arith.constant 0 : i32
    return %c0_i32, %c0_i32_0 : i32, i32
  }
  func.func @transform_2(%arg0: i32) -> (i32, i32) {
    %c0_i32 = arith.constant 0 : i32
    %c0_i32_0 = arith.constant 0 : i32
    %c0_i32_1 = arith.constant 0 : i32
    return %c0_i32, %c0_i32_0 : i32, i32
  }
  func.func @transform_3(%arg0: i32) -> (i32, i32) {
    %c0_i32 = arith.constant 0 : i32
    %c0_i32_0 = arith.constant 0 : i32
    %c0_i32_1 = arith.constant 0 : i32
    return %c0_i32, %c0_i32_0 : i32, i32
  }
  func.func @transform_4(%arg0: i32) -> (i32, i32) {
    %c0_i32 = arith.constant 0 : i32
    %c0_i32_0 = arith.constant 0 : i32
    %c0_i32_1 = arith.constant 0 : i32
    return %c0_i32, %c0_i32_0 : i32, i32
  }
  func.func @transform_5(%arg0: i32) -> (i32, i32) {
    %c0_i32 = arith.constant 0 : i32
    %c0_i32_0 = arith.constant 0 : i32
    %c0_i32_1 = arith.constant 0 : i32
    return %c0_i32, %c0_i32_0 : i32, i32
  }
  func.func @transform_6(%arg0: i32) -> (i32, i32) {
    %c0_i32 = arith.constant 0 : i32
    %c0_i32_0 = arith.constant 0 : i32
    %c0_i32_1 = arith.constant 0 : i32
    return %c0_i32, %c0_i32_0 : i32, i32
  }
  func.func @transform_7(%arg0: i32) -> (i32, i32) {
    %c0_i32 = arith.constant 0 : i32
    %c0_i32_0 = arith.constant 0 : i32
    %c0_i32_1 = arith.constant 0 : i32
    return %c0_i32, %c0_i32_0 : i32, i32
  }
  func.func @transform_8(%arg0: i32) -> (i32, i32) {
    %c0_i32 = arith.constant 0 : i32
    %c0_i32_0 = arith.constant 0 : i32
    %c0_i32_1 = arith.constant 0 : i32
    return %c0_i32, %c0_i32_0 : i32, i32
  }
  func.func @transform_9(%arg0: i32) -> (i32, i32) {
    %c0_i32 = arith.constant 0 : i32
    %c0_i32_0 = arith.constant 0 : i32
    %c0_i32_1 = arith.constant 0 : i32
    return %c0_i32, %c0_i32_0 : i32, i32
  }
  func.func @transform_10(%arg0: i32) -> (i32, i32) {
    %c0_i32 = arith.constant 0 : i32
    %c0_i32_0 = arith.constant 0 : i32
    %c0_i32_1 = arith.constant 0 : i32
    return %c0_i32, %c0_i32_0 : i32, i32
  }
  func.func @transform_11(%arg0: i32) -> (i32, i32) {
    %c0_i32 = arith.constant 0 : i32
    %c0_i32_0 = arith.constant 0 : i32
    %c0_i32_1 = arith.constant 0 : i32
    return %c0_i32, %c0_i32_0 : i32, i32
  }
  func.func @transform_12(%arg0: i32) -> (i32, i32) {
    %c0_i32 = arith.constant 0 : i32
    %c0_i32_0 = arith.constant 0 : i32
    %c0_i32_1 = arith.constant 0 : i32
    return %c0_i32, %c0_i32_0 : i32, i32
  }
  func.func @transform_13(%arg0: i32) -> (i32, i32) {
    %c0_i32 = arith.constant 0 : i32
    %c0_i32_0 = arith.constant 0 : i32
    %c0_i32_1 = arith.constant 0 : i32
    return %c0_i32, %c0_i32_0 : i32, i32
  }
  func.func @transform_14(%arg0: i32) -> (i32, i32) {
    %c0_i32 = arith.constant 0 : i32
    %c0_i32_0 = arith.constant 0 : i32
    %c0_i32_1 = arith.constant 0 : i32
    return %c0_i32, %c0_i32_0 : i32, i32
  }
  func.func @transform_15(%arg0: i32) -> (i32, i32) {
    %c0_i32 = arith.constant 0 : i32
    %c0_i32_0 = arith.constant 0 : i32
    %c0_i32_1 = arith.constant 0 : i32
    return %c0_i32, %c0_i32_0 : i32, i32
  }
  func.func @transform_16(%arg0: i32) -> (i32, i32) {
    %c0_i32 = arith.constant 0 : i32
    %c0_i32_0 = arith.constant 0 : i32
    %c0_i32_1 = arith.constant 0 : i32
    return %c0_i32, %c0_i32_0 : i32, i32
  }
  func.func @transform_17(%arg0: i32) -> (i32, i32) {
    %c0_i32 = arith.constant 0 : i32
    %c0_i32_0 = arith.constant 0 : i32
    %c0_i32_1 = arith.constant 0 : i32
    return %c0_i32, %c0_i32_0 : i32, i32
  }
  func.func @transform_18(%arg0: i32) -> (i32, i32) {
    %c0_i32 = arith.constant 0 : i32
    %c0_i32_0 = arith.constant 0 : i32
    %c0_i32_1 = arith.constant 0 : i32
    return %c0_i32, %c0_i32_0 : i32, i32
  }
  func.func @transform_19(%arg0: i32) -> (i32, i32, i32) {
    %c0_i32 = arith.constant 0 : i32
    %c0_i32_0 = arith.constant 0 : i32
    %c0_i32_1 = arith.constant 0 : i32
    return %arg0, %c0_i32, %c0_i32_0 : i32, i32, i32
  }
  func.func @transform_20(%arg0: i32) -> (i32, i32, i32) {
    %c0_i32 = arith.constant 0 : i32
    %c0_i32_0 = arith.constant 0 : i32
    %c0_i32_1 = arith.constant 0 : i32
    return %arg0, %c0_i32, %c0_i32_0 : i32, i32, i32
  }
  func.func @transform_21(%arg0: i32) -> (i32, i32, i32) {
    %c0_i32 = arith.constant 0 : i32
    %c0_i32_0 = arith.constant 0 : i32
    %c0_i32_1 = arith.constant 0 : i32
    return %arg0, %c0_i32, %c0_i32_0 : i32, i32, i32
  }
}

</mosaic_0001>

<bundles_post_ra>
// kernel: enhance_net_forward.1
= control target key start
LH: loop header
LB: loop body
LE: loop exit
PB: predicated region body
PF: predicated region fallthrough
CT: control target
= control target key end

     0   :  { %s8485_s0 = inlined_call_operand.vmem [shape: f32[2,8,256], index: 0, kind: input, shape index: {}]   ;;  %s8486_s1 = inlined_call_operand.vmem [shape: f32[9,256], index: 1, kind: input, shape index: {}]   ;;  %s8487_s2 = inlined_call_operand.vmem [shape: bf16[32,72], index: 2, kind: input, shape index: {}]   ;;  %s8488_s3 = inlined_call_operand.vmem [shape: f32[32,1], index: 3, kind: input, shape index: {}]   ;;  %s8489_s4 = inlined_call_operand.vmem [shape: bf16[32,288], index: 4, kind: input, shape index: {}]   ;;  %s8490_s5 = inlined_call_operand.vmem [shape: f32[32,1], index: 5, kind: input, shape index: {}]   ;;  %s8491_s6 = inlined_call_operand.vmem [shape: bf16[32,288], index: 6, kind: input, shape index: {}]   ;;  %s8492_s7 = inlined_call_operand.vmem [shape: f32[32,1], index: 7, kind: input, shape index: {}]   ;;  %s8493_s8 = inlined_call_operand.vmem [shape: bf16[32,288], index: 8, kind: input, shape index: {}]   ;;  %s8494_s9 = inlined_call_operand.vmem [shape: f32[32,1], index: 9, kind: input, shape index: {}]   ;;  %s8495_s10 = inlined_call_operand.vmem [shape: bf16[32,288], index: 10, kind: input, shape index: {}]   ;;  %s8496_s11 = inlined_call_operand.vmem [shape: bf16[32,288], index: 11, kind: input, shape index: {}]   ;;  %s8497_s12 = inlined_call_operand.vmem [shape: f32[32,1], index: 12, kind: input, shape index: {}]   ;;  %s8498_s13 = inlined_call_operand.vmem [shape: bf16[32,288], index: 13, kind: input, shape index: {}]   ;;  %s8499_s14 = inlined_call_operand.vmem [shape: bf16[32,288], index: 14, kind: input, shape index: {}]   ;;  %s8500_s15 = inlined_call_operand.vmem [shape: f32[32,1], index: 15, kind: input, shape index: {}]   ;;  %s8501_s16 = inlined_call_operand.vmem [shape: bf16[24,288], index: 16, kind: input, shape index: {}]   ;;  %s8502_s17 = inlined_call_operand.vmem [shape: bf16[24,288], index: 17, kind: input, shape index: {}]   ;;  %s8503_s18 = inlined_call_operand.vmem [shape: f32[24,1], index: 18, kind: input, shape index: {}]   ;;  %s8504_s19 = inlined_call_operand.vmem [shape: f32[2,3,256], index: 19, kind: output, shape index: {0}]   ;;  %s8505_s20 = inlined_call_operand.vmem [shape: f32[2,3,256], index: 20, kind: output, shape index: {1}]   ;;  %s8506_s21 = inlined_call_operand.vmem [shape: f32[2,24,256], index: 21, kind: output, shape index: {2}]  }
   0x1   :  { %8645 = sst [smem:[#allocation107_spill]] %s8485_s0 }
   0x2   :  { %8646 = sst [smem:[#allocation108_spill]] %s8486_s1 }
   0x3   :  { %8647 = sst [smem:[#allocation109_spill]] %s8487_s2  ;;  %s4983_s2 = smov 0  }
   0x4   :  { %8648 = sst [smem:[#allocation110_spill]] %s8488_s3 }
   0x5   :  { %8649 = sst [smem:[#allocation111_spill]] %s8489_s4 }
   0x6   :  { %8650 = sst [smem:[#allocation112_spill]] %s8490_s5 }
   0x7   :  { %8651 = sst [smem:[#allocation113_spill]] %s8504_s19 }
   0x8   :  { %8652 = sst [smem:[#allocation114_spill]] %s8505_s20 }
   0x9 LB: > { %8653 = sst [smem:[#allocation2_spill]] %s4862_s2  ;;  %s4540_s25 = sadd.s32 4294967295, %s4862_s2   ;;  %s4862_s2 = sphi %s4983_s2, %s32_s2  }
   0xa   : > { %p4544_p0 = scmp.ge.s32.totalorder %s4862_s2, 1  ;;  %p592_p1 = scmp.lt.s32.totalorder %s4862_s2, 3 }
   0xc   : > { %p593_p2 = pnand %p4544_p0, %p592_p1 }
   0xe   : > { %596 = sbr.rel (%p593_p2) target bundleno = 3536 (0xdd0), region = 96 }
  0x15   : > { %p662_p3 = scmp.lt.s32.totalorder %s4540_s25, 1  ;;  %s8654_s28 = sld [smem:[#allocation107_spill]]  ;;  %v8529_v2 = vmov 0   ;;  %v693_v7 = vlaneseq  ;;  %vm882_vm8 = vcmask 1043456   ;;  %vm875_vm9 = vcmask 588800  }
  0x16   : > { %s8522_s0 = smov 16   ;;  %s8524_s4 = smov 17   ;;  %921 = vmatprep.mubr.bf16.mxu0 %v8529_v2  ;;  %4763 = vset.pattern.permute.xlu1 %v8529_v2  ;;  %vm1304_vm10 = vcmask 261120   ;;  %vm4283_vm11 = vcmask 1041408   ;;  %vm4352_vm12 = vcmask 1040384  }
  0x17   : > { %s8888_s25 = smov (!%p662_p3, %s4540_s25), 1  ;;  %s8520_s30 = smov 15   ;;  %4762 = vset.pattern.permute.xlu0 %v8529_v2  ;;  %v5052_v8 = vshrl.u32 %v693_v7, 7  ;;  %v5054_v9 = vand.u32 127, %v693_v7 }
  0x18   : > { %s4633_s26 = sshll.u32 %s8888_s25, 4  ;;  %s8516_s5 = smov 1  }
  0x19   : > { %s8514_s22 = smov 127   ;;  %s8512_s23 = smov 113   ;;  %v700_v10 = vsub.s32 0, %v5052_v8  ;;  %v717_v11 = vsub.s32 1, %v5052_v8  ;;  %vm712_vm0 = vcmp.lt.s32.totalorder %v5054_v9, 16  ;;  %vm695_vm1 = vcmp.lt.s32.totalorder %v5054_v9, 17 }
  0x1a   : > { %s8518_s1 = smov 112   ;;  %s4872_s24 = smov 111   ;;  %v734_v22 = vsub.s32 2, %v5052_v8  ;;  %v751_v23 = vsub.s32 3, %v5052_v8  ;;  %vm729_vm2 = vcmp.lt.s32.totalorder %v5054_v9, 15  ;;  %vm746_vm3 = vcmp.lt.s32.totalorder %v5054_v9, 1 }
  0x1b   : > { %s4997_s29 = scalar_lea.vmem %s8654_s28, %s4633_s26  ;;  %s8655_s3 = sld [smem:[#allocation110_spill]]  ;;  %v768_v36 = vsub.s32 5, %v5052_v8  ;;  %vm763_vm4 = vcmp.lt.s32.totalorder %v5054_v9, 127  ;;  %v785_v61 = vsub.s32 6, %v5052_v8  ;;  %v802_v62 = vsub.s32 7, %v5052_v8 }
  0x1c   : > { %v5000_v0 = vld [vmem:[%s4997_s29] sm:$0xff]  ;;  %v5007_v1 = vld [vmem:[%s4997_s29 + $0x8] sm:$0xff]  ;;  %s8656_s27 = sld [smem:[#allocation108_spill]]  ;;  %vm780_vm5 = vcmp.lt.s32.totalorder %v5054_v9, 113  ;;  %vm797_vm6 = vcmp.lt.s32.totalorder %v5054_v9, 112  ;;  %vm814_vm7 = vcmp.lt.s32.totalorder %v5054_v9, 111 }
  0x1d   : > { %708 = vrot.lane.b32.xlu1 %v5000_v0, %s8522_s0  ;;  %689 = vrot.lane.b32.xlu0 %v5000_v0, %s8524_s4  ;;  %s8661_s28 = smov 15   ;;  %s8663_s26 = smov 127  }
  0x1e   : > { %s8885_s2 = sld [smem:[#allocation114_spill]] }
  0x21   : > { %710 = vrot.lane.b32.xlu1 %v5007_v1, %s8522_s0  ;;  %691 = vrot.lane.b32.xlu0 %v5007_v1, %s8524_s4  ;;  %v842_v3 = vld [vmem:[%s8655_s3 + $0x8] sm:$0xff]  ;;  %v841_v4 = vld [vmem:[%s8655_s3] sm:$0xff] }
  0x22   : > { %v843_v5 = vld [vmem:[%s8655_s3 + $0x10] sm:$0xff]  ;;  %v844_v6 = vld [vmem:[%s8655_s3 + $0x18] sm:$0xff]  ;;  %v5061_v12 = vld [vmem:[%s8656_s27] sm:$0xff]  ;;  %s8667_s3 = sld [smem:[#allocation112_spill]] }
  0x23   : > { %v5066_v13 = vld [vmem:[%s8656_s27 + $0x8] sm:$0xff]  ;;  %v5077_v18 = vrot.slane %v5061_v12, %v700_v10  ;;  %v5080_v19 = vrot.slane %v5061_v12, %v717_v11  ;;  %v5100_v37 = vrot.slane %v5061_v12, %v734_v22  ;;  %v5106_v39 = vrot.slane %v5061_v12, %v751_v23 }
  0x24   : > { %v5071_v16 = vrot.slane %v5066_v13, %v700_v10  ;;  %v5074_v17 = vrot.slane %v5066_v13, %v717_v11  ;;  %v5103_v38 = vrot.slane %v5066_v13, %v734_v22  ;;  %v5109_v40 = vrot.slane %v5066_v13, %v751_v23  ;;  %v5170_v23 = vld [vmem:[%s8656_s27 + $0x18] ss:$0 sm:$0xff] }
  0x25   : > { %727 = vrot.lane.b32.xlu1 %v5007_v1, %s8520_s30  ;;  %725 = vrot.lane.b32.xlu0 %v5000_v0, %s8520_s30  ;;  %v5121_v47 = vrot.slane %v5061_v12, %v768_v36  ;;  %v5124_v48 = vrot.slane %v5066_v13, %v768_v36  ;;  %v5146_v7 = vrot.slane %v5066_v13, %v785_v61  ;;  %s8665_s30 = smov 112  }
  0x26   : > { %v5149_v8 = vrot.slane %v5061_v12, %v802_v62  ;;  %v5152_v10 = vrot.slane %v5066_v13, %v802_v62  ;;  %8659 = vst [vmem:[#allocation5_spill] sm:$0xff] %v5170_v23 }
  0x28   : > { %8657 = vst [vmem:[#allocation3_spill] sm:$0xff] %v5149_v8  ;;  %8658 = vst [vmem:[#allocation4_spill] sm:$0xff] %v5152_v10 }
  0x29   : > { %744 = vrot.lane.b32.xlu1 %v5007_v1, %s8516_s5  ;;  %742 = vrot.lane.b32.xlu0 %v5000_v0, %s8516_s5  ;;  %s8664_s5 = smov 113  }
  0x2d   : > { %761 = vrot.lane.b32.xlu1 %v5007_v1, %s8514_s22  ;;  %759 = vrot.lane.b32.xlu0 %v5000_v0, %s8514_s22  ;;  %s8660_s22 = sld [smem:[#allocation109_spill]] }
  0x31   : > { %778 = vrot.lane.b32.xlu1 %v5007_v1, %s8512_s23  ;;  %776 = vrot.lane.b32.xlu0 %v5000_v0, %s8512_s23  ;;  %s8662_s23 = smov 1  }
  0x33   : > { %v4764_v36 = vld [vmem:[%s8660_s22] sm:$0xff]  }
  0x35   : > { %795 = vrot.lane.b32.xlu1 %v5007_v1, %s8518_s1  ;;  %793 = vrot.lane.b32.xlu0 %v5000_v0, %s8518_s1  ;;  %s8709_s1 = smov 16  }
  0x39   : > { %812 = vrot.lane.b32.xlu1 %v5007_v1, %s4872_s24  ;;  %810 = vrot.lane.b32.xlu0 %v5000_v0, %s4872_s24 }
  0x3d   : > { %852 = vperm.xlu1 %4763, %v842_v3   ;;  %847 = vperm.xlu0 %4762, %v841_v4  }
  0x41   : > { %857 = vperm.xlu1 %4763, %v843_v5   ;;  %862 = vperm.xlu0 %4762, %v844_v6   ;;  %v5143_v6 = vrot.slane %v5061_v12, %v785_v61 }
  0x8f   : > { %v709_v14 = vpop.permute.xlu1 %708  ;;  %v690_v15 = vpop.permute.xlu0 %689 }
  0x93   : > { %v711_v20 = vpop.permute.xlu1 %710  ;;  %v692_v21 = vpop.permute.xlu0 %691 }
  0x94   : > { %v714_v24 = vsel %vm712_vm0, %v711_v20, %v709_v14  ;;  %v697_v25 = vsel %vm695_vm1, %v692_v21, %v690_v15  ;;  %v696_v26 = vsel %vm695_vm1, %v690_v15, %v692_v21  ;;  %v713_v27 = vsel %vm712_vm0, %v709_v14, %v711_v20 }
  0x95   : > { %v707_v28 = vmul.f32 %v5071_v16, %v696_v26  ;;  %v724_v29 = vmul.f32 %v5074_v17, %v713_v27  ;;  %v706_v30 = vmul.f32 %v5077_v18, %v697_v25  ;;  %v723_v31 = vmul.f32 %v5080_v19, %v714_v24  ;;  %v5175_v24 = vld [vmem:[%s8656_s27 + $0x10] ss:$0 sm:$0xff] }
  0x97   : > { %v728_v32 = vpop.permute.xlu1 %727  ;;  %v726_v33 = vpop.permute.xlu0 %725  ;;  %v828_v34 = vpack.c.bf16 %v724_v29, %v707_v28  ;;  %v827_v35 = vpack.c.bf16 %v723_v31, %v706_v30 }
  0x98   : > { %v730_v41 = vsel %vm729_vm2, %v726_v33, %v728_v32  ;;  %v731_v42 = vsel %vm729_vm2, %v728_v32, %v726_v33 }
  0x99   : > { %889 = vmatprep.subr.bf16.mxu0 %v828_v34  ;;  %v740_v49 = vmul.f32 %v5100_v37, %v731_v42  ;;  %v741_v50 = vmul.f32 %v5103_v38, %v730_v41  ;;  %v4765_v41 = vld [vmem:[%s8660_s22 + $0x8] sm:$0xff]  }
  0x9a   : > { %890 = vmatpush1.bf16.msra.mxu0 %v827_v35 }
  0x9b   : > { %v745_v43 = vpop.permute.xlu1 %744  ;;  %v743_v44 = vpop.permute.xlu0 %742 }
  0x9c   : > { %v747_v45 = vsel %vm746_vm3, %v743_v44, %v745_v43  ;;  %v748_v46 = vsel %vm746_vm3, %v745_v43, %v743_v44 }
  0x9d   : > { %v757_v51 = vmul.f32 %v5106_v39, %v748_v46  ;;  %v758_v52 = vmul.f32 %v5109_v40, %v747_v45 }
  0x9f   : > { %v762_v53 = vpop.permute.xlu1 %761  ;;  %v760_v54 = vpop.permute.xlu0 %759  ;;  %v830_v55 = vpack.c.bf16 %v758_v52, %v741_v50  ;;  %v829_v56 = vpack.c.bf16 %v757_v51, %v740_v49 }
  0xa0   : > { %v764_v57 = vsel %vm763_vm4, %v760_v54, %v762_v53  ;;  %v765_v58 = vsel %vm763_vm4, %v762_v53, %v760_v54 }
  0xa1   : > { %v774_v59 = vmul.f32 %v5121_v47, %v764_v57  ;;  %v775_v60 = vmul.f32 %v5124_v48, %v765_v58  ;;  %891 = vmatprep.subr.bf16.mxu0 %v830_v55 }
  0xa2   : > { %892 = vmatpush1.bf16.msra.mxu0 %v829_v56 }
  0xa3   : > { %v779_v63 = vpop.permute.xlu1 %778  ;;  %v777_v3 = vpop.permute.xlu0 %776  ;;  %v832_v4 = vpack.c.bf16 %v775_v60, %v5007_v1  ;;  %v831_v5 = vpack.c.bf16 %v774_v59, %v5000_v0 }
  0xa4   : > { %v781_v1 = vsel %vm780_vm5, %v777_v3, %v779_v63  ;;  %v782_v0 = vsel %vm780_vm5, %v779_v63, %v777_v3 }
  0xa5   : > { %893 = vmatprep.subr.bf16.mxu0 %v832_v4  ;;  %v791_v13 = vmul.f32 %v5143_v6, %v781_v1  ;;  %v792_v20 = vmul.f32 %v5146_v7, %v782_v0 }
  0xa6   : > { %894 = vmatpush1.bf16.msra.mxu0 %v831_v5 }
  0xa7   : > { %v796_v11 = vpop.permute.xlu1 %795  ;;  %v794_v14 = vpop.permute.xlu0 %793 }
  0xa8   : > { %v798_v15 = vsel %vm797_vm6, %v794_v14, %v796_v11  ;;  %v799_v12 = vsel %vm797_vm6, %v796_v11, %v794_v14 }
  0xa9   : > { %v808_v21 = vmul.f32 %v5149_v8, %v798_v15  ;;  %v809_v22 = vmul.f32 %v5152_v10, %v799_v12 }
  0xab   : > { %v813_v25 = vpop.permute.xlu1 %812  ;;  %v811_v26 = vpop.permute.xlu0 %810  ;;  %v834_v27 = vpack.c.bf16 %v809_v22, %v792_v20  ;;  %v833_v28 = vpack.c.bf16 %v808_v21, %v791_v13 }
  0xac   : > { %v815_v29 = vsel %vm814_vm7, %v811_v26, %v813_v25  ;;  %v816_v30 = vsel %vm814_vm7, %v813_v25, %v811_v26 }
  0xad   : > { %v826_v31 = vmul.f32 %v5170_v23, %v816_v30  ;;  %895 = vmatprep.subr.bf16.mxu0 %v834_v27  ;;  %v825_v32 = vmul.f32 %v5175_v24, %v815_v29  ;;  %v1250_v27 = vld [vmem:[%s8667_s3] sm:$0xff]  ;;  %v1251_v29 = vld [vmem:[%s8667_s3 + $0x8] sm:$0xff] }
  0xae   : > { %896 = vmatpush1.bf16.msra.mxu0 %v833_v28 }
  0xaf   : > { %v836_v33 = vpack.c.bf16 %v826_v31, %v826_v31  ;;  %v835_v34 = vpack.c.bf16 %v825_v32, %v825_v32  ;;  %v1252_v31 = vld [vmem:[%s8667_s3 + $0x10] sm:$0xff] }
  0xb1   : > { %4556 = vmatprep.subr.msk.bf16.mxu0 %vm882_vm8, %v836_v33  ;;  %v884_v35 = vsel %vm882_vm8, %v835_v34, 0  ;;  %v1253_v33 = vld [vmem:[%s8667_s3 + $0x18] sm:$0xff] }
  0xb2   : > { %898 = vmatpush1.bf16.msra.mxu0 %v884_v35 }
  0xb5   : > { %4557 = vmatmul.mubr.msk.bf16.vlgmr.msra.gmra.mrb[0].mxu0 %vm875_vm9, %v4764_v36 }
  0xb6   : > { %931 = vmatprep.mubr.bf16.mxu0 %v8529_v2 }
  0xbc   : > { %v848_v42 = vpop.permute.xlu0 %847  ;;  %v853_v46 = vpop.permute.xlu1 %852 }
  0xbd   : > { %4558 = vmatmul.mubr.msk.bf16.gmra.mrb[4].mxu0 %vm875_vm9, %v4765_v41 }
  0xbe   : > { %1396 = vmatprep.mubr.bf16.mxu0 %v8529_v2 }
  0xc0   : > { %v858_v62 = vpop.permute.xlu1 %857  ;;  %v863_v3 = vpop.permute.xlu0 %862 }
 0x188   : > { %v923_v43 = vpop.f32.mrb[0].mxu0 }
 0x189   : > { %v924_v44 = vadd.f32 %v923_v43, %v848_v42  ;;  %v925_v45 = vpop.f32.mrb[1].mxu0 }
 0x18a   : > { %v927_v49 = vpop.f32.mrb[2].mxu0  ;;  %v926_v58 = vadd.f32 %v925_v45, %v848_v42 }
 0x18b   : > { %v5191_v50 = vmax.f32 %v924_v44, 0.0  ;;  %v928_v51 = vadd.f32 %v927_v49, %v853_v46  ;;  %v929_v52 = vpop.f32.mrb[3].mxu0 }
 0x18c   : > { %v930_v59 = vadd.f32 %v929_v52, %v853_v46  ;;  %v5217_v60 = vmax.f32 %v926_v58, 0.0 }
 0x18d   : > { %v5193_v53 = vmax.f32 %v928_v51, 0.0  ;;  %950 = vrot.lane.b32.xlu1 %v5191_v50, %s8524_s4 }
 0x18e   : > { %v5221_v61 = vmax.f32 %v930_v59, 0.0 }
 0x18f   : > { %952 = vrot.lane.b32.xlu0 %v5193_v53, %s8524_s4 }
 0x190   : > { %v933_v54 = vpop.f32.mrb[4].mxu0 }
 0x191   : > { %v935_v55 = vpop.f32.mrb[5].mxu0  ;;  %982 = vrot.lane.b32.xlu1 %v5191_v50, %s8522_s0  ;;  %v934_v63 = vadd.f32 %v933_v54, %v858_v62 }
 0x192   : > { %v937_v56 = vpop.f32.mrb[6].mxu0  ;;  %v936_v0 = vadd.f32 %v935_v55, %v858_v62 }
 0x193   : > { %v939_v57 = vpop.f32.mrb[7].mxu0  ;;  %984 = vrot.lane.b32.xlu0 %v5193_v53, %s8522_s0  ;;  %v938_v4 = vadd.f32 %v937_v56, %v863_v3  ;;  %v5241_v5 = vmax.f32 %v934_v63, 0.0 }
 0x194   : > { %v940_v11 = vadd.f32 %v939_v57, %v863_v3  ;;  %v5265_v14 = vmax.f32 %v936_v0, 0.0 }
 0x195   : > { %1014 = vrot.lane.b32.xlu1 %v5191_v50, %s8661_s28  ;;  %v5245_v1 = vmax.f32 %v938_v4, 0.0 }
 0x196   : > { %v5269_v15 = vmax.f32 %v940_v11, 0.0 }
 0x197   : > { %1016 = vrot.lane.b32.xlu0 %v5193_v53, %s8661_s28 }
 0x199   : > { %1046 = vrot.lane.b32.xlu1 %v5191_v50, %s8662_s23 }
 0x19b   : > { %1048 = vrot.lane.b32.xlu0 %v5193_v53, %s8662_s23 }
 0x19d   : > { %1078 = vrot.lane.b32.xlu1 %v5191_v50, %s8663_s26 }
 0x19f   : > { %1080 = vrot.lane.b32.xlu0 %v5193_v53, %s8663_s26 }
 0x1a1   : > { %1110 = vrot.lane.b32.xlu1 %v5191_v50, %s8664_s5 }
 0x1a3   : > { %1112 = vrot.lane.b32.xlu0 %v5193_v53, %s8664_s5 }
 0x1a5   : > { %958 = vrot.lane.b32.xlu1 %v5217_v60, %s8524_s4 }
 0x1a7   : > { %960 = vrot.lane.b32.xlu0 %v5221_v61, %s8524_s4 }
 0x1a9   : > { %990 = vrot.lane.b32.xlu1 %v5217_v60, %s8522_s0 }
 0x1ab   : > { %992 = vrot.lane.b32.xlu0 %v5221_v61, %s8522_s0 }
 0x1ad   : > { %1022 = vrot.lane.b32.xlu1 %v5217_v60, %s8661_s28 }
 0x1af   : > { %1024 = vrot.lane.b32.xlu0 %v5221_v61, %s8661_s28 }
 0x1b1   : > { %1054 = vrot.lane.b32.xlu1 %v5217_v60, %s8662_s23 }
 0x1b3   : > { %1056 = vrot.lane.b32.xlu0 %v5221_v61, %s8662_s23 }
 0x1b5   : > { %1086 = vrot.lane.b32.xlu1 %v5217_v60, %s8663_s26 }
 0x1b7   : > { %1088 = vrot.lane.b32.xlu0 %v5221_v61, %s8663_s26 }
 0x1b9   : > { %954 = vrot.lane.b32.xlu1 %v5241_v5, %s8524_s4 }
 0x1bb   : > { %956 = vrot.lane.b32.xlu0 %v5245_v1, %s8524_s4 }
 0x1bd   : > { %986 = vrot.lane.b32.xlu1 %v5241_v5, %s8522_s0 }
 0x1bf   : > { %988 = vrot.lane.b32.xlu0 %v5245_v1, %s8522_s0 }
 0x1c1   : > { %1018 = vrot.lane.b32.xlu1 %v5241_v5, %s8661_s28 }
 0x1c3   : > { %1020 = vrot.lane.b32.xlu0 %v5245_v1, %s8661_s28 }
 0x1c5   : > { %1050 = vrot.lane.b32.xlu1 %v5241_v5, %s8662_s23 }
 0x1c7   : > { %1052 = vrot.lane.b32.xlu0 %v5245_v1, %s8662_s23 }
 0x1c9   : > { %1082 = vrot.lane.b32.xlu1 %v5241_v5, %s8663_s26 }
 0x1cb   : > { %1084 = vrot.lane.b32.xlu0 %v5245_v1, %s8663_s26 }
 0x1cd   : > { %962 = vrot.lane.b32.xlu1 %v5265_v14, %s8524_s4 }
 0x1cf   : > { %964 = vrot.lane.b32.xlu0 %v5269_v15, %s8524_s4  ;;  %s8666_s4 = sld [smem:[#allocation111_spill]] }
 0x1d1   : > { %1118 = vrot.lane.b32.xlu1 %v5217_v60, %s8664_s5 }
 0x1d3   : > { %1120 = vrot.lane.b32.xlu0 %v5221_v61, %s8664_s5 }
 0x1d5   : > { %994 = vrot.lane.b32.xlu1 %v5265_v14, %s8522_s0  ;;  %v4768_v13 = vld [vmem:[%s8666_s4 + $0x4] ss:$12 sps:$4 sm:$0xff]  }
 0x1d6   : > { %1343 = vmatprep.mubr.bf16.mxu1 %v4768_v13 }
 0x1d7   : > { %996 = vrot.lane.b32.xlu0 %v5269_v15, %s8522_s0  ;;  %s8708_s0 = smov 17  }
 0x1d9   : > { %1026 = vrot.lane.b32.xlu1 %v5265_v14, %s8661_s28 }
 0x1db   : > { %1116 = vrot.lane.b32.xlu0 %v5245_v1, %s8664_s5 }
 0x1dd   : > { %1058 = vrot.lane.b32.xlu1 %v5265_v14, %s8662_s23 }
 0x1df   : > { %1028 = vrot.lane.b32.xlu0 %v5269_v15, %s8661_s28 }
 0x1e1   : > { %1090 = vrot.lane.b32.xlu1 %v5265_v14, %s8663_s26 }
 0x1e3   : > { %1144 = vrot.lane.b32.xlu0 %v5193_v53, %s8665_s30 }
 0x1e5   : > { %1114 = vrot.lane.b32.xlu1 %v5241_v5, %s8664_s5 }
 0x1e7   : > { %1060 = vrot.lane.b32.xlu0 %v5269_v15, %s8662_s23 }
 0x1e9   : > { %1122 = vrot.lane.b32.xlu1 %v5265_v14, %s8664_s5 }
 0x1eb   : > { %1152 = vrot.lane.b32.xlu0 %v5221_v61, %s8665_s30 }
 0x1ed   : > { %1142 = vrot.lane.b32.xlu1 %v5191_v50, %s8665_s30 }
 0x1ef   : > { %1176 = vrot.lane.b32.xlu0 %v5193_v53, %s4872_s24 }
 0x1f1   : > { %1150 = vrot.lane.b32.xlu1 %v5217_v60, %s8665_s30 }
 0x1f3   : > { %1184 = vrot.lane.b32.xlu0 %v5221_v61, %s4872_s24 }
 0x1f5   : > { %1174 = vrot.lane.b32.xlu1 %v5191_v50, %s4872_s24 }
 0x1f7   : > { %1092 = vrot.lane.b32.xlu0 %v5269_v15, %s8663_s26 }
 0x1f9   : > { %1182 = vrot.lane.b32.xlu1 %v5217_v60, %s4872_s24 }
 0x1fb   : > { %1148 = vrot.lane.b32.xlu0 %v5245_v1, %s8665_s30 }
 0x1fd   : > { %1146 = vrot.lane.b32.xlu1 %v5241_v5, %s8665_s30 }
 0x1ff   : > { %v951_v12 = vpop.permute.xlu1 %950  ;;  %1124 = vrot.lane.b32.xlu0 %v5269_v15, %s8664_s5 }
 0x201   : > { %1154 = vrot.lane.b32.xlu1 %v5265_v14, %s8665_s30  ;;  %v953_v20 = vpop.permute.xlu0 %952 }
 0x203   : > { %v5328_v21 = vpop.permute.xlu1 %982  ;;  %1180 = vrot.lane.b32.xlu0 %v5245_v1, %s4872_s24 }
 0x205   : > { %1178 = vrot.lane.b32.xlu1 %v5241_v5, %s4872_s24  ;;  %v985_v22 = vpop.permute.xlu0 %984 }
 0x207   : > { %v5334_v25 = vpop.permute.xlu1 %1014  ;;  %1156 = vrot.lane.b32.xlu0 %v5269_v15, %s8665_s30 }
 0x209   : > { %1186 = vrot.lane.b32.xlu1 %v5265_v14, %s4872_s24  ;;  %v5340_v26 = vpop.permute.xlu0 %1016 }
 0x20b   : > { %v5345_v28 = vpop.permute.xlu1 %1046  ;;  %1188 = vrot.lane.b32.xlu0 %v5269_v15, %s4872_s24 }
 0x20d   : > { %1256 = vperm.xlu1 %4763, %v1250_v27   ;;  %v5352_v30 = vpop.permute.xlu0 %1048 }
 0x20f   : > { %v5357_v32 = vpop.permute.xlu1 %1078  ;;  %1261 = vperm.xlu0 %4762, %v1251_v29  }
 0x211   : > { %1266 = vperm.xlu1 %4763, %v1252_v31   ;;  %v5362_v34 = vpop.permute.xlu0 %1080 }
 0x213   : > { %v5364_v35 = vpop.permute.xlu1 %1110  ;;  %1271 = vperm.xlu0 %4762, %v1253_v33  }
 0x215   : > { %v5366_v36 = vpop.permute.xlu0 %1112 }
 0x217   : > { %v959_v41 = vpop.permute.xlu1 %958 }
 0x218   : > { %v966_v42 = vsel %vm695_vm1, %v951_v12, %v959_v41  ;;  %v970_v43 = vsel %vm695_vm1, %v959_v41, %v951_v12 }
 0x219   : > { %v961_v44 = vpop.permute.xlu0 %960  ;;  %v975_v51 = vmul.f32 %v966_v42, %v5071_v16  ;;  %v974_v54 = vmul.f32 %v970_v43, %v5077_v18 }
 0x21a   : > { %v967_v45 = vsel %vm695_vm1, %v953_v20, %v961_v44  ;;  %v971_v46 = vsel %vm695_vm1, %v961_v44, %v953_v20 }
 0x21b   : > { %v991_v49 = vpop.permute.xlu1 %990  ;;  %v977_v52 = vmul.f32 %v967_v45, %v5071_v16  ;;  %v976_v55 = vmul.f32 %v971_v46, %v5077_v18 }
 0x21d   : > { %v993_v56 = vpop.permute.xlu0 %992  ;;  %v5380_v57 = vpack.c.bf16 %v977_v52, %v975_v51  ;;  %v5382_v58 = vpack.c.bf16 %v976_v55, %v974_v54  ;;  %v998_v51 = vsel %vm712_vm0, %v5328_v21, %v991_v49 }
 0x21e   : > { %v999_v43 = vsel %vm712_vm0, %v985_v22, %v993_v56  ;;  %v1003_v54 = vsel %vm712_vm0, %v993_v56, %v985_v22  ;;  %v1002_v22 = vsel %vm712_vm0, %v991_v49, %v5328_v21  ;;  %v1007_v56 = vmul.f32 %v998_v51, %v5074_v17 }
 0x21f   : > { %8668 = vst [vmem:[#allocation6_spill] sm:$0xff] %v5380_v57  ;;  %8669 = vst [vmem:[#allocation7_spill] sm:$0xff] %v5382_v58  ;;  %v1023_v59 = vpop.permute.xlu1 %1022  ;;  %1311 = vmatprep.subr.bf16.mxu1 %v5380_v57  ;;  %v1009_v55 = vmul.f32 %v999_v43, %v5074_v17  ;;  %v1008_v43 = vmul.f32 %v1003_v54, %v5080_v19 }
 0x220   : > { %1312 = vmatpush1.bf16.msra.mxu1 %v5382_v58 }
 0x221   : > { %v1025_v62 = vpop.permute.xlu0 %1024  ;;  %v5442_v21 = vpack.c.bf16 %v1009_v55, %v1007_v56 }
 0x222   : > { %v1035_v54 = vsel %vm729_vm2, %v1025_v62, %v5340_v26 }
 0x223   : > { %v5386_v63 = vpop.permute.xlu1 %1054  ;;  %8672 = vst [vmem:[#allocation10_spill] sm:$0xff] %v5442_v21 }
 0x225   : > { %v5388_v3 = vpop.permute.xlu0 %1056 }
 0x226   : > { %v8849_v9 = vld [vmem:[#allocation7_spill] sm:$0xff] }
 0x227   : > { %v5390_v4 = vpop.permute.xlu1 %1086 }
 0x229   : > { %v5392_v0 = vpop.permute.xlu0 %1088 }
 0x22b   : > { %v955_v11 = vpop.permute.xlu1 %954 }
 0x22d   : > { %v957_v12 = vpop.permute.xlu0 %956 }
 0x22f   : > { %v987_v13 = vpop.permute.xlu1 %986 }
 0x231   : > { %v989_v20 = vpop.permute.xlu0 %988 }
 0x233   : > { %v1019_v27 = vpop.permute.xlu1 %1018 }
 0x235   : > { %v5394_v29 = vpop.permute.xlu0 %1020 }
 0x237   : > { %v5396_v31 = vpop.permute.xlu1 %1050 }
 0x239   : > { %v5398_v33 = vpop.permute.xlu0 %1052 }
 0x23b   : > { %v5400_v41 = vpop.permute.xlu1 %1082 }
 0x23d   : > { %v5402_v42 = vpop.permute.xlu0 %1084 }
 0x23f   : > { %v963_v44 = vpop.permute.xlu1 %962 }
 0x240   : > { %v968_v45 = vsel %vm695_vm1, %v955_v11, %v963_v44  ;;  %v972_v46 = vsel %vm695_vm1, %v963_v44, %v955_v11 }
 0x241   : > { %v965_v52 = vpop.permute.xlu0 %964  ;;  %v978_v57 = vmul.f32 %v972_v46, %v5077_v18  ;;  %v979_v11 = vmul.f32 %v968_v45, %v5071_v16 }
 0x242   : > { %v969_v2 = vsel %vm695_vm1, %v957_v12, %v965_v52  ;;  %v973_v58 = vsel %vm695_vm1, %v965_v52, %v957_v12 }
 0x243   : > { %v980_v44 = vmul.f32 %v973_v58, %v5077_v18  ;;  %v981_v8 = vmul.f32 %v969_v2, %v5071_v16  ;;  %v5424_v10 = vpop.permute.xlu1 %1118  ;;  %v1006_v58 = vmul.f32 %v1002_v22, %v5080_v19  ;;  %v1031_v2 = vsel %vm729_vm2, %v5340_v26, %v1025_v62 }
 0x244   : > { %v1041_v55 = vmul.f32 %v1031_v2, %v5103_v38  ;;  %v1034_v26 = vsel %vm729_vm2, %v1023_v59, %v5334_v25  ;;  %v1040_v2 = vmul.f32 %v1035_v54, %v5100_v37 }
 0x245   : > { %v5431_v23 = vpop.permute.xlu0 %1120  ;;  %v5433_v12 = vpack.c.bf16 %v981_v8, %v979_v11  ;;  %v5435_v46 = vpack.c.bf16 %v980_v44, %v978_v57  ;;  %v1030_v57 = vsel %vm729_vm2, %v5334_v25, %v1023_v59  ;;  %v5453_v52 = vpack.c.bf16 %v1008_v43, %v1006_v58 }
 0x246   : > { %v1039_v62 = vmul.f32 %v1030_v57, %v5103_v38 }
 0x247   : > { %8670 = vst [vmem:[#allocation8_spill] sm:$0xff] %v5433_v12  ;;  %8671 = vst [vmem:[#allocation9_spill] sm:$0xff] %v5435_v46  ;;  %v995_v45 = vpop.permute.xlu1 %994  ;;  %1313 = vmatprep.subr.bf16.mxu1 %v5433_v12 }
 0x248   : > { %v1000_v49 = vsel %vm712_vm0, %v987_v13, %v995_v45  ;;  %v1004_v8 = vsel %vm712_vm0, %v995_v45, %v987_v13  ;;  %1314 = vmatpush1.bf16.msra.mxu1 %v5435_v46  ;;  %8673 = vst [vmem:[#allocation11_spill] sm:$0xff] %v5453_v52  ;;  %v5485_v59 = vpack.c.bf16 %v1041_v55, %v1039_v62 }
 0x249   : > { %1315 = vmatprep.subr.bf16.mxu1 %v5442_v21  ;;  %v997_v51 = vpop.permute.xlu0 %996  ;;  %v1010_v44 = vmul.f32 %v1004_v8, %v5080_v19  ;;  %v1011_v22 = vmul.f32 %v1000_v49, %v5074_v17  ;;  %v1038_v8 = vmul.f32 %v1034_v26, %v5100_v37  ;;  %v1067_v55 = vsel %vm746_vm3, %v5388_v3, %v5352_v30 }
 0x24a   : > { %v1001_v13 = vsel %vm712_vm0, %v989_v20, %v997_v51  ;;  %v1005_v11 = vsel %vm712_vm0, %v997_v51, %v989_v20  ;;  %v1063_v51 = vsel %vm746_vm3, %v5352_v30, %v5388_v3  ;;  %8676 = vst [vmem:[#allocation14_spill] sm:$0xff] %v5485_v59  ;;  %v1066_v30 = vsel %vm746_vm3, %v5386_v63, %v5345_v28 }
 0x24b   : > { %v1012_v56 = vmul.f32 %v1005_v11, %v5080_v19  ;;  %v1013_v43 = vmul.f32 %v1001_v13, %v5074_v17  ;;  %v1027_v58 = vpop.permute.xlu1 %1026  ;;  %v1062_v13 = vsel %vm746_vm3, %v5345_v28, %v5386_v63 }
 0x24c   : > { %1316 = vmatpush1.bf16.msra.mxu1 %v5453_v52  ;;  %v1032_v57 = vsel %vm729_vm2, %v1019_v27, %v1027_v58  ;;  %v1036_v54 = vsel %vm729_vm2, %v1027_v58, %v1019_v27  ;;  %v1071_v3 = vmul.f32 %v1062_v13, %v5109_v40 }
 0x24d   : > { %v5473_v20 = vpop.permute.xlu0 %1116  ;;  %v5475_v45 = vpack.c.bf16 %v1013_v43, %v1011_v22  ;;  %v5477_v49 = vpack.c.bf16 %v1012_v56, %v1010_v44  ;;  %v5497_v44 = vpack.c.bf16 %v1040_v2, %v1038_v8  ;;  %v1073_v22 = vmul.f32 %v1063_v51, %v5109_v40 }
 0x24e   : > { %v1042_v43 = vmul.f32 %v1036_v54, %v5100_v37  ;;  %v1043_v58 = vmul.f32 %v1032_v57, %v5103_v38  ;;  %v1072_v57 = vmul.f32 %v1067_v55, %v5106_v39 }
 0x24f   : > { %8674 = vst [vmem:[#allocation12_spill] sm:$0xff] %v5475_v45  ;;  %8675 = vst [vmem:[#allocation13_spill] sm:$0xff] %v5477_v49  ;;  %v1059_v25 = vpop.permute.xlu1 %1058  ;;  %1317 = vmatprep.subr.bf16.mxu1 %v5475_v45 }
 0x250   : > { %1318 = vmatpush1.bf16.msra.mxu1 %v5477_v49  ;;  %8677 = vst [vmem:[#allocation15_spill] sm:$0xff] %v5497_v44  ;;  %v1064_v28 = vsel %vm746_vm3, %v5396_v31, %v1059_v25  ;;  %v1068_v63 = vsel %vm746_vm3, %v1059_v25, %v5396_v31 }
 0x251   : > { %1319 = vmatprep.subr.bf16.mxu1 %v5485_v59  ;;  %v1029_v11 = vpop.permute.xlu0 %1028 }
 0x252   : > { %v1033_v27 = vsel %vm729_vm2, %v5394_v29, %v1029_v11  ;;  %v1037_v56 = vsel %vm729_vm2, %v1029_v11, %v5394_v29  ;;  %v5530_v11 = vpack.c.bf16 %v1073_v22, %v1071_v3 }
 0x253   : > { %v1044_v26 = vmul.f32 %v1037_v56, %v5100_v37  ;;  %v1045_v62 = vmul.f32 %v1033_v27, %v5103_v38  ;;  %v1091_v2 = vpop.permute.xlu1 %1090  ;;  %v1070_v27 = vmul.f32 %v1066_v30, %v5106_v39 }
 0x254   : > { %1320 = vmatpush1.bf16.msra.mxu1 %v5497_v44  ;;  %8680 = vst [vmem:[#allocation18_spill] sm:$0xff] %v5530_v11 }
 0x255   : > { %v5520_v8 = vpop.permute.xlu0 %1144  ;;  %v5522_v29 = vpack.c.bf16 %v1045_v62, %v1043_v58  ;;  %v5524_v51 = vpack.c.bf16 %v1044_v26, %v1042_v43  ;;  %v5547_v56 = vpack.c.bf16 %v1072_v57, %v1070_v27  ;;  %v1074_v43 = vmul.f32 %v1068_v63, %v5106_v39 }
 0x256   : > { %v1075_v58 = vmul.f32 %v1064_v28, %v5109_v40  ;;  %v5567_v57 = vpack.c.bf16 %v5221_v61, %v5217_v60  ;;  %v1099_v27 = vsel %vm763_vm4, %v5392_v0, %v5362_v34  ;;  %v1095_v28 = vsel %vm763_vm4, %v5362_v34, %v5392_v0 }
 0x257   : > { %8678 = vst [vmem:[#allocation16_spill] sm:$0xff] %v5522_v29  ;;  %8679 = vst [vmem:[#allocation17_spill] sm:$0xff] %v5524_v51  ;;  %v5527_v54 = vpop.permute.xlu1 %1114  ;;  %1321 = vmatprep.subr.bf16.mxu1 %v5522_v29  ;;  %v1098_v60 = vsel %vm763_vm4, %v5390_v4, %v5357_v32  ;;  %v5585_v61 = vpack.c.bf16 %v5193_v53, %v5191_v50  ;;  %v5596_v0 = vpack.c.bf16 %v5269_v15, %v5265_v14 }
 0x258   : > { %1322 = vmatpush1.bf16.msra.mxu1 %v5524_v51  ;;  %8681 = vst [vmem:[#allocation19_spill] sm:$0xff] %v5547_v56  ;;  %8684 = vst [vmem:[#allocation22_spill] sm:$0xff] %v5567_v57  ;;  %v1103_v50 = vmul.f32 %v1098_v60, %v5124_v48  ;;  %v5609_v14 = vpack.c.bf16 %v5245_v1, %v5241_v5  ;;  %v1127_v15 = vsel %vm780_vm5, %v5366_v36, %v5431_v23 }
 0x259   : > { %1323 = vmatprep.subr.bf16.mxu1 %v5530_v11  ;;  %v1061_v13 = vpop.permute.xlu0 %1060  ;;  %8685 = vst [vmem:[#allocation23_spill] sm:$0xff] %v5585_v61  ;;  %8686 = vst [vmem:[#allocation24_spill] sm:$0xff] %v5596_v0  ;;  %v1100_v5 = vsel %vm763_vm4, %v1091_v2, %v5400_v41 }
 0x25a   : > { %v1065_v55 = vsel %vm746_vm3, %v5398_v33, %v1061_v13  ;;  %v1069_v22 = vsel %vm746_vm3, %v1061_v13, %v5398_v33  ;;  %v1094_v13 = vsel %vm763_vm4, %v5357_v32, %v5390_v4  ;;  %v1130_v32 = vsel %vm780_vm5, %v5424_v10, %v5364_v35  ;;  %8687 = vst [vmem:[#allocation25_spill] sm:$0xff] %v5609_v14 }
 0x25b   : > { %v1076_v31 = vmul.f32 %v1069_v22, %v5106_v39  ;;  %v1077_v25 = vmul.f32 %v1065_v55, %v5109_v40  ;;  %v5553_v26 = vpop.permute.xlu1 %1122  ;;  %v1105_v55 = vmul.f32 %v1099_v27, %v5124_v48  ;;  %v1104_v22 = vmul.f32 %v1095_v28, %v5121_v47 }
 0x25c   : > { %1324 = vmatpush1.bf16.msra.mxu1 %v5547_v56  ;;  %v1131_v4 = vsel %vm780_vm5, %v5431_v23, %v5366_v36  ;;  %v1126_v23 = vsel %vm780_vm5, %v5364_v35, %v5424_v10  ;;  %v1135_v36 = vmul.f32 %v1130_v32, %v5146_v7 }
 0x25d   : > { %v5556_v62 = vpop.permute.xlu0 %1152  ;;  %v5558_v30 = vpack.c.bf16 %v1077_v25, %v1075_v58  ;;  %v5560_v3 = vpack.c.bf16 %v1076_v31, %v1074_v43  ;;  %v1102_v43 = vmul.f32 %v1094_v13, %v5121_v47  ;;  %v5619_v31 = vpack.c.bf16 %v1105_v55, %v1103_v50 }
 0x25e   : > { %v1096_v25 = vsel %vm763_vm4, %v5400_v41, %v1091_v2  ;;  %v1136_v2 = vmul.f32 %v1127_v15, %v5143_v6  ;;  %v1137_v60 = vmul.f32 %v1131_v4, %v5146_v7  ;;  %v1107_v55 = vmul.f32 %v1100_v5, %v5124_v48 }
 0x25f   : > { %8682 = vst [vmem:[#allocation20_spill] sm:$0xff] %v5558_v30  ;;  %8683 = vst [vmem:[#allocation21_spill] sm:$0xff] %v5560_v3  ;;  %v5562_v33 = vpop.permute.xlu1 %1142  ;;  %1325 = vmatprep.subr.bf16.mxu1 %v5558_v30  ;;  %v5628_v1 = vpack.c.bf16 %v1104_v22, %v1102_v43  ;;  %v1106_v35 = vmul.f32 %v1096_v25, %v5121_v47  ;;  %v8690_v43 = vld [vmem:[#allocation5_spill] sm:$0xff] }
 0x260   : > { %1326 = vmatpush1.bf16.msra.mxu1 %v5560_v3  ;;  %8688 = vst [vmem:[#allocation26_spill] sm:$0xff] %v5619_v31 }
 0x261   : > { %1327 = vmatprep.subr.bf16.mxu1 %v5567_v57  ;;  %v1177_v63 = vpop.permute.xlu0 %1176  ;;  %8689 = vst [vmem:[#allocation27_spill] sm:$0xff] %v5628_v1 }
 0x263   : > { %v5592_v34 = vpop.permute.xlu1 %1150 }
 0x264   : > { %1328 = vmatpush1.bf16.msra.mxu1 %v5585_v61 }
 0x265   : > { %1329 = vmatprep.subr.bf16.mxu1 %v5596_v0  ;;  %v1185_v53 = vpop.permute.xlu0 %1184 }
 0x266   : > { %v1191_v27 = vsel %vm814_vm7, %v1177_v63, %v1185_v53  ;;  %v1195_v28 = vsel %vm814_vm7, %v1185_v53, %v1177_v63 }
 0x267   : > { %v1175_v58 = vpop.permute.xlu1 %1174  ;;  %v1200_v53 = vmul.f32 %v5175_v24, %v1191_v27  ;;  %v1201_v32 = vmul.f32 %v8690_v43, %v1195_v28  ;;  %v1134_v27 = vmul.f32 %v1126_v23, %v5143_v6  ;;  %v1128_v28 = vsel %vm780_vm5, %v5527_v54, %v5553_v26 }
 0x268   : > { %1330 = vmatpush1.bf16.msra.mxu1 %v5609_v14  ;;  %v1162_v23 = vsel %vm797_vm6, %v5592_v34, %v5562_v33 }
 0x269   : > { %1331 = vmatprep.subr.bf16.mxu1 %v5619_v31  ;;  %v1093_v41 = vpop.permute.xlu0 %1092 }
 0x26a   : > { %v1097_v13 = vsel %vm763_vm4, %v5402_v42, %v1093_v41  ;;  %v1101_v10 = vsel %vm763_vm4, %v1093_v41, %v5402_v42 }
 0x26b   : > { %v1108_v63 = vmul.f32 %v1097_v13, %v5121_v47  ;;  %v1109_v22 = vmul.f32 %v1101_v10, %v5124_v48  ;;  %v1183_v50 = vpop.permute.xlu1 %1182 }
 0x26c   : > { %v1190_v15 = vsel %vm814_vm7, %v1175_v58, %v1183_v50  ;;  %v1194_v4 = vsel %vm814_vm7, %v1183_v50, %v1175_v58  ;;  %1332 = vmatpush1.bf16.msra.mxu1 %v5628_v1  ;;  %v1132_v58 = vsel %vm780_vm5, %v5553_v26, %v5527_v54  ;;  %v5689_v26 = vpack.c.bf16 %v1136_v2, %v1134_v27 }
 0x26d   : > { %v1198_v42 = vmul.f32 %v5175_v24, %v1190_v15  ;;  %v1199_v25 = vmul.f32 %v8690_v43, %v1194_v4  ;;  %v1149_v5 = vpop.permute.xlu0 %1148  ;;  %v5661_v41 = vpack.c.bf16 %v1109_v22, %v1107_v55  ;;  %v5663_v13 = vpack.c.bf16 %v1108_v63, %v1106_v35 }
 0x26e   : > { %v5677_v55 = vpack.c.bf16 %v1137_v60, %v1135_v36  ;;  %v1138_v63 = vmul.f32 %v1128_v28, %v5143_v6  ;;  %8696 = vst [vmem:[#allocation32_spill] sm:$0xff] %v5689_v26  ;;  %v1139_v36 = vmul.f32 %v1132_v58, %v5146_v7  ;;  %v1163_v60 = vsel %vm797_vm6, %v5556_v62, %v5520_v8 }
 0x26f   : > { %8691 = vst [vmem:[#allocation5_spill] sm:$0xff] %v5661_v41  ;;  %8692 = vst [vmem:[#allocation28_spill] sm:$0xff] %v5663_v13  ;;  %v5674_v10 = vpack.c.bf16 %v1200_v53, %v1198_v42  ;;  %v1147_v50 = vpop.permute.xlu1 %1146  ;;  %1333 = vmatprep.subr.bf16.mxu1 %v5661_v41  ;;  %v5679_v35 = vpack.c.bf16 %v1201_v32, %v1199_v25  ;;  %v1158_v2 = vsel %vm797_vm6, %v5562_v33, %v5592_v34  ;;  %v8697_v32 = vld [vmem:[#allocation4_spill] sm:$0xff]  ;;  %v8700_v34 = vld [vmem:[#allocation3_spill] sm:$0xff] }
 0x270   : > { %8694 = vst [vmem:[#allocation30_spill] sm:$0xff] %v5677_v55  ;;  %1334 = vmatpush1.bf16.msra.mxu1 %v5663_v13  ;;  %v1167_v15 = vmul.f32 %v1162_v23, %v8697_v32  ;;  %v1169_v27 = vmul.f32 %v1163_v60, %v8697_v32  ;;  %v1166_v23 = vmul.f32 %v1158_v2, %v8700_v34 }
 0x271   : > { %8693 = vst [vmem:[#allocation29_spill] sm:$0xff] %v5674_v10  ;;  %8695 = vst [vmem:[#allocation31_spill] sm:$0xff] %v5679_v35  ;;  %1335 = vmatprep.subr.bf16.mxu1 %v5677_v55  ;;  %1364 = vmatprep.subr.bf16.mxu0 %v5679_v35  ;;  %v1125_v54 = vpop.permute.xlu0 %1124 }
 0x272   : > { %v1129_v22 = vsel %vm780_vm5, %v5473_v20, %v1125_v54  ;;  %v1133_v53 = vsel %vm780_vm5, %v1125_v54, %v5473_v20  ;;  %1365 = vmatpush1.bf16.msra.mxu0 %v5674_v10  ;;  %v1159_v20 = vsel %vm797_vm6, %v5520_v8, %v5556_v62 }
 0x273   : > { %v1140_v4 = vmul.f32 %v1129_v22, %v5143_v6  ;;  %v1141_v42 = vmul.f32 %v1133_v53, %v5146_v7  ;;  %v1155_v25 = vpop.permute.xlu1 %1154  ;;  %v5722_v22 = vpack.c.bf16 %v1169_v27, %v1167_v15  ;;  %v1168_v53 = vmul.f32 %v1159_v20, %v8700_v34 }
 0x274   : > { %1336 = vmatpush1.bf16.msra.mxu1 %v5689_v26  ;;  %v1160_v10 = vsel %vm797_vm6, %v1147_v50, %v1155_v25  ;;  %v1164_v8 = vsel %vm797_vm6, %v1155_v25, %v1147_v50 }
 0x275   : > { %v1181_v28 = vpop.permute.xlu0 %1180  ;;  %v5716_v58 = vpack.c.bf16 %v1141_v42, %v1139_v36  ;;  %v5718_v33 = vpack.c.bf16 %v1140_v4, %v1138_v63  ;;  %8701 = vst [vmem:[#allocation34_spill] sm:$0xff] %v5722_v22  ;;  %v5735_v60 = vpack.c.bf16 %v1168_v53, %v1166_v23  ;;  %v1170_v2 = vmul.f32 %v1160_v10, %v8700_v34 }
 0x276   : > { %v1171_v15 = vmul.f32 %v1164_v8, %v8697_v32 }
 0x277   : > { %8698 = vst [vmem:[#allocation4_spill] sm:$0xff] %v5716_v58  ;;  %8699 = vst [vmem:[#allocation33_spill] sm:$0xff] %v5718_v33  ;;  %v1179_v54 = vpop.permute.xlu1 %1178  ;;  %1337 = vmatprep.subr.bf16.mxu1 %v5716_v58 }
 0x278   : > { %1338 = vmatpush1.bf16.msra.mxu1 %v5718_v33  ;;  %8702 = vst [vmem:[#allocation35_spill] sm:$0xff] %v5735_v60 }
 0x279   : > { %1339 = vmatprep.subr.bf16.mxu1 %v5722_v22  ;;  %v1157_v62 = vpop.permute.xlu0 %1156 }
 0x27a   : > { %v1161_v63 = vsel %vm797_vm6, %v1149_v5, %v1157_v62  ;;  %v1165_v36 = vsel %vm797_vm6, %v1157_v62, %v1149_v5 }
 0x27b   : > { %v1172_v4 = vmul.f32 %v1161_v63, %v8700_v34  ;;  %v1173_v50 = vmul.f32 %v1165_v36, %v8697_v32  ;;  %v1187_v42 = vpop.permute.xlu1 %1186  ;;  %v4766_v36 = vld [vmem:[%s8666_s4] ss:$12 sps:$4 sm:$0xff]  }
 0x27c   : > { %v1192_v25 = vsel %vm814_vm7, %v1179_v54, %v1187_v42  ;;  %v1196_v20 = vsel %vm814_vm7, %v1187_v42, %v1179_v54  ;;  %1340 = vmatpush1.bf16.msra.mxu1 %v5735_v60 }
 0x27d   : > { %v1189_v5 = vpop.permute.xlu0 %1188  ;;  %v5746_v27 = vpack.c.bf16 %v1173_v50, %v1171_v15  ;;  %v5748_v23 = vpack.c.bf16 %v1172_v4, %v1170_v2  ;;  %v1202_v8 = vmul.f32 %v5175_v24, %v1192_v25  ;;  %v1203_v62 = vmul.f32 %v8690_v43, %v1196_v20  ;;  %v4773_v50 = vld [vmem:[%s8666_s4 + $0x20] ss:$12 sps:$4 sm:$0xff]  }
 0x27e   : > { %v1193_v10 = vsel %vm814_vm7, %v1181_v28, %v1189_v5  ;;  %v1197_v53 = vsel %vm814_vm7, %v1189_v5, %v1181_v28  ;;  %v4770_v28 = vld [vmem:[%s8666_s4 + $0x1c] ss:$12 sps:$4 sm:$0xff]   ;;  %v8707_v4 = vmov 0  }
 0x27f   : > { %8703 = vst [vmem:[#allocation36_spill] sm:$0xff] %v5746_v27  ;;  %8704 = vst [vmem:[#allocation37_spill] sm:$0xff] %v5748_v23  ;;  %v1204_v63 = vmul.f32 %v5175_v24, %v1193_v10  ;;  %v1205_v54 = vmul.f32 %v8690_v43, %v1197_v53  ;;  %1341 = vmatprep.subr.bf16.mxu1 %v5746_v27  ;;  %v4769_v24 = vld [vmem:[%s8666_s4 + $0x8] ss:$12 sps:$4 sm:$0xff]   ;;  %v4772_v43 = vld [vmem:[%s8666_s4 + $0x18] ss:$12 sps:$4 sm:$0xff]  }
 0x280   : > { %1342 = vmatpush1.bf16.msra.mxu1 %v5748_v23 }
 0x281   : > { %v5766_v2 = vpack.c.bf16 %v1204_v63, %v1202_v8  ;;  %v5768_v15 = vpack.c.bf16 %v1205_v54, %v1203_v62 }
 0x283   : > { %8705 = vst [vmem:[#allocation38_spill] sm:$0xff] %v5766_v2  ;;  %8706 = vst [vmem:[#allocation39_spill] sm:$0xff] %v5768_v15  ;;  %1344 = vmatmul.mubr.bf16.vlgmr.msra.gmra.mrb[0].mxu1 %v4766_v36  ;;  %1366 = vmatprep.subr.bf16.mxu0 %v5768_v15 }
 0x284   : > { %1367 = vmatpush1.bf16.msra.mxu0 %v5766_v2  ;;  %1353 = vmatprep.mubr.bf16.mxu1 %v4770_v28 }
 0x287   : > { %4565 = vmatmul.mubr.msk.bf16.vlgmr.msra.gmra.mrb[8].mxu0 %vm1304_vm10, %v4769_v24 }
 0x288   : > { %1406 = vmatprep.mubr.bf16.mxu0 %v8707_v4 }
 0x28b   : > { %1354 = vmatmul.mubr.bf16.gmra.mrb[4].mxu1 %v4772_v43 }
 0x28c   : > { %v1257_v20 = vpop.permute.xlu1 %1256 }
 0x28e   : > { %v1262_v8 = vpop.permute.xlu0 %1261 }
 0x28f   : > { %4566 = vmatmul.mubr.msk.bf16.gmra.mrb[12].mxu0 %vm1304_vm10, %v4773_v50 }
 0x290   : > { %1870 = vmatprep.mubr.bf16.mxu0 %v8707_v4 }
 0x356   : > { %v1345_v42 = vpop.f32.mrb[0].mxu1 }
 0x357   : > { %v1347_v25 = vpop.f32.mrb[1].mxu1  ;;  %v1346_v10 = vadd.f32 %v1345_v42, %v1257_v20  ;;  %v1267_v42 = vpop.permute.xlu1 %1266 }
 0x358   : > { %v1349_v5 = vpop.f32.mrb[2].mxu1  ;;  %v1348_v62 = vadd.f32 %v1347_v25, %v1257_v20 }
 0x359   : > { %v1351_v53 = vpop.f32.mrb[3].mxu1  ;;  %v1350_v54 = vadd.f32 %v1349_v5, %v1262_v8 }
 0x35a   : > { %v1398_v63 = vpop.f32.mrb[8].mxu0  ;;  %v1352_v24 = vadd.f32 %v1351_v53, %v1262_v8 }
 0x35b   : > { %v1399_v36 = vadd.f32 %v1398_v63, %v1346_v10  ;;  %v1400_v28 = vpop.f32.mrb[9].mxu0  ;;  %v1272_v10 = vpop.permute.xlu0 %1271 }
 0x35c   : > { %v1401_v43 = vadd.f32 %v1400_v28, %v1348_v62  ;;  %v1402_v2 = vpop.f32.mrb[10].mxu0 }
 0x35d   : > { %v5785_v15 = vmax.f32 %v1399_v36, 0.0  ;;  %v1403_v50 = vadd.f32 %v1402_v2, %v1350_v54  ;;  %v1404_v35 = vpop.f32.mrb[11].mxu0 }
 0x35e   : > { %v1405_v23 = vadd.f32 %v1404_v35, %v1352_v24  ;;  %v1355_v27 = vpop.f32.mrb[4].mxu1 }
 0x35f   : > { %v5787_v60 = vmax.f32 %v1403_v50, 0.0  ;;  %v1357_v22 = vpop.f32.mrb[5].mxu1  ;;  %1425 = vrot.lane.b32.xlu1 %v5785_v15, %s8708_s0  ;;  %v1356_v20 = vadd.f32 %v1355_v27, %v1267_v42 }
 0x360   : > { %v1359_v25 = vpop.f32.mrb[6].mxu1  ;;  %v1358_v53 = vadd.f32 %v1357_v22, %v1267_v42  ;;  %v5811_v22 = vmax.f32 %v1401_v43, 0.0  ;;  %v5815_v50 = vmax.f32 %v1405_v23, 0.0 }
 0x361   : > { %v1361_v5 = vpop.f32.mrb[7].mxu1  ;;  %1427 = vrot.lane.b32.xlu0 %v5787_v60, %s8708_s0  ;;  %v1360_v2 = vadd.f32 %v1359_v25, %v1272_v10 }
 0x362   : > { %v1408_v8 = vpop.f32.mrb[12].mxu0  ;;  %v1362_v63 = vadd.f32 %v1361_v5, %v1272_v10  ;;  %v4776_v5 = vld [vmem:[%s8491_s6 + $0x4] ss:$12 sps:$4 sm:$0xff]  }
 0x363   : > { %v1409_v62 = vadd.f32 %v1408_v8, %v1356_v20  ;;  %v1410_v35 = vpop.f32.mrb[13].mxu0  ;;  %1457 = vrot.lane.b32.xlu1 %v5785_v15, %s8709_s1  ;;  %1817 = vmatprep.mubr.bf16.mxu1 %v4776_v5 }
 0x364   : > { %v1411_v54 = vadd.f32 %v1410_v35, %v1358_v53  ;;  %v1412_v36 = vpop.f32.mrb[14].mxu0  ;;  %v1725_v35 = vld [vmem:[%s8492_s7] sm:$0xff] }
 0x365   : > { %v1413_v28 = vadd.f32 %v1412_v36, %v1360_v2  ;;  %v1414_v24 = vpop.f32.mrb[15].mxu0  ;;  %1459 = vrot.lane.b32.xlu0 %v5787_v60, %s8709_s1  ;;  %v5835_v23 = vmax.f32 %v1409_v62, 0.0 }
 0x366   : > { %v1415_v27 = vadd.f32 %v1414_v24, %v1362_v63  ;;  %v5859_v42 = vmax.f32 %v1411_v54, 0.0  ;;  %v1726_v54 = vld [vmem:[%s8492_s7 + $0x8] sm:$0xff] }
 0x367   : > { %1489 = vrot.lane.b32.xlu1 %v5785_v15, %s8661_s28  ;;  %v5839_v43 = vmax.f32 %v1413_v28, 0.0  ;;  %v1727_v28 = vld [vmem:[%s8492_s7 + $0x10] sm:$0xff] }
 0x368   : > { %v5863_v25 = vmax.f32 %v1415_v27, 0.0  ;;  %v1728_v27 = vld [vmem:[%s8492_s7 + $0x18] sm:$0xff] }
 0x369   : > { %1491 = vrot.lane.b32.xlu0 %v5787_v60, %s8661_s28 }
 0x36b   : > { %1521 = vrot.lane.b32.xlu1 %v5785_v15, %s8662_s23 }
 0x36d   : > { %1523 = vrot.lane.b32.xlu0 %v5787_v60, %s8662_s23 }
 0x36f   : > { %1553 = vrot.lane.b32.xlu1 %v5785_v15, %s8663_s26 }
 0x371   : > { %1555 = vrot.lane.b32.xlu0 %v5787_v60, %s8663_s26 }
 0x373   : > { %1585 = vrot.lane.b32.xlu1 %v5785_v15, %s8664_s5 }
 0x375   : > { %1587 = vrot.lane.b32.xlu0 %v5787_v60, %s8664_s5 }
 0x377   : > { %1433 = vrot.lane.b32.xlu1 %v5811_v22, %s8708_s0 }
 0x379   : > { %1435 = vrot.lane.b32.xlu0 %v5815_v50, %s8708_s0 }
 0x37b   : > { %1465 = vrot.lane.b32.xlu1 %v5811_v22, %s8709_s1 }
 0x37d   : > { %1467 = vrot.lane.b32.xlu0 %v5815_v50, %s8709_s1 }
 0x37f   : > { %1497 = vrot.lane.b32.xlu1 %v5811_v22, %s8661_s28 }
 0x381   : > { %1499 = vrot.lane.b32.xlu0 %v5815_v50, %s8661_s28 }
 0x383   : > { %1529 = vrot.lane.b32.xlu1 %v5811_v22, %s8662_s23 }
 0x385   : > { %1531 = vrot.lane.b32.xlu0 %v5815_v50, %s8662_s23 }
 0x387   : > { %1561 = vrot.lane.b32.xlu1 %v5811_v22, %s8663_s26 }
 0x389   : > { %1563 = vrot.lane.b32.xlu0 %v5815_v50, %s8663_s26 }
 0x38b   : > { %1429 = vrot.lane.b32.xlu1 %v5835_v23, %s8708_s0 }
 0x38d   : > { %1431 = vrot.lane.b32.xlu0 %v5839_v43, %s8708_s0 }
 0x38f   : > { %1461 = vrot.lane.b32.xlu1 %v5835_v23, %s8709_s1 }
 0x391   : > { %1463 = vrot.lane.b32.xlu0 %v5839_v43, %s8709_s1 }
 0x393   : > { %1493 = vrot.lane.b32.xlu1 %v5835_v23, %s8661_s28 }
 0x395   : > { %1495 = vrot.lane.b32.xlu0 %v5839_v43, %s8661_s28 }
 0x397   : > { %1525 = vrot.lane.b32.xlu1 %v5835_v23, %s8662_s23 }
 0x399   : > { %1527 = vrot.lane.b32.xlu0 %v5839_v43, %s8662_s23 }
 0x39b   : > { %1557 = vrot.lane.b32.xlu1 %v5835_v23, %s8663_s26 }
 0x39d   : > { %1559 = vrot.lane.b32.xlu0 %v5839_v43, %s8663_s26 }
 0x39f   : > { %1437 = vrot.lane.b32.xlu1 %v5859_v42, %s8708_s0 }
 0x3a1   : > { %1439 = vrot.lane.b32.xlu0 %v5863_v25, %s8708_s0 }
 0x3a3   : > { %1593 = vrot.lane.b32.xlu1 %v5811_v22, %s8664_s5 }
 0x3a5   : > { %1595 = vrot.lane.b32.xlu0 %v5815_v50, %s8664_s5 }
 0x3a7   : > { %1469 = vrot.lane.b32.xlu1 %v5859_v42, %s8709_s1 }
 0x3a9   : > { %1471 = vrot.lane.b32.xlu0 %v5863_v25, %s8709_s1 }
 0x3ab   : > { %1501 = vrot.lane.b32.xlu1 %v5859_v42, %s8661_s28 }
 0x3ad   : > { %1591 = vrot.lane.b32.xlu0 %v5839_v43, %s8664_s5 }
 0x3af   : > { %1533 = vrot.lane.b32.xlu1 %v5859_v42, %s8662_s23 }
 0x3b1   : > { %1503 = vrot.lane.b32.xlu0 %v5863_v25, %s8661_s28 }
 0x3b3   : > { %1565 = vrot.lane.b32.xlu1 %v5859_v42, %s8663_s26 }
 0x3b5   : > { %1619 = vrot.lane.b32.xlu0 %v5787_v60, %s8665_s30 }
 0x3b7   : > { %1589 = vrot.lane.b32.xlu1 %v5835_v23, %s8664_s5 }
 0x3b9   : > { %1535 = vrot.lane.b32.xlu0 %v5863_v25, %s8662_s23 }
 0x3bb   : > { %1597 = vrot.lane.b32.xlu1 %v5859_v42, %s8664_s5 }
 0x3bd   : > { %1627 = vrot.lane.b32.xlu0 %v5815_v50, %s8665_s30 }
 0x3bf   : > { %1617 = vrot.lane.b32.xlu1 %v5785_v15, %s8665_s30 }
 0x3c1   : > { %1651 = vrot.lane.b32.xlu0 %v5787_v60, %s4872_s24 }
 0x3c3   : > { %1625 = vrot.lane.b32.xlu1 %v5811_v22, %s8665_s30 }
 0x3c5   : > { %1659 = vrot.lane.b32.xlu0 %v5815_v50, %s4872_s24 }
 0x3c7   : > { %1649 = vrot.lane.b32.xlu1 %v5785_v15, %s4872_s24 }
 0x3c9   : > { %1567 = vrot.lane.b32.xlu0 %v5863_v25, %s8663_s26 }
 0x3cb   : > { %1657 = vrot.lane.b32.xlu1 %v5811_v22, %s4872_s24 }
 0x3cd   : > { %1623 = vrot.lane.b32.xlu0 %v5839_v43, %s8665_s30 }
 0x3cf   : > { %1621 = vrot.lane.b32.xlu1 %v5835_v23, %s8665_s30 }
 0x3d1   : > { %v1426_v20 = vpop.permute.xlu1 %1425  ;;  %1599 = vrot.lane.b32.xlu0 %v5863_v25, %s8664_s5 }
 0x3d3   : > { %1629 = vrot.lane.b32.xlu1 %v5859_v42, %s8665_s30  ;;  %v1428_v10 = vpop.permute.xlu0 %1427 }
 0x3d5   : > { %v5922_v53 = vpop.permute.xlu1 %1457  ;;  %1655 = vrot.lane.b32.xlu0 %v5839_v43, %s4872_s24 }
 0x3d7   : > { %1653 = vrot.lane.b32.xlu1 %v5835_v23, %s4872_s24  ;;  %v1460_v8 = vpop.permute.xlu0 %1459 }
 0x3d9   : > { %v5928_v2 = vpop.permute.xlu1 %1489  ;;  %1631 = vrot.lane.b32.xlu0 %v5863_v25, %s8665_s30 }
 0x3db   : > { %1661 = vrot.lane.b32.xlu1 %v5859_v42, %s4872_s24  ;;  %v5934_v62 = vpop.permute.xlu0 %1491 }
 0x3dd   : > { %v5939_v63 = vpop.permute.xlu1 %1521  ;;  %1663 = vrot.lane.b32.xlu0 %v5863_v25, %s4872_s24 }
 0x3df   : > { %1731 = vperm.xlu1 %4763, %v1725_v35   ;;  %v5946_v36 = vpop.permute.xlu0 %1523 }
 0x3e1   : > { %v5951_v24 = vpop.permute.xlu1 %1553  ;;  %1736 = vperm.xlu0 %4762, %v1726_v54  }
 0x3e3   : > { %1741 = vperm.xlu1 %4763, %v1727_v28   ;;  %v5956_v5 = vpop.permute.xlu0 %1555 }
 0x3e5   : > { %v5958_v33 = vpop.permute.xlu1 %1585  ;;  %1746 = vperm.xlu0 %4762, %v1728_v27  }
 0x3e7   : > { %v5960_v35 = vpop.permute.xlu0 %1587 }
 0x3e9   : > { %v1434_v58 = vpop.permute.xlu1 %1433 }
 0x3ea   : > { %v1441_v26 = vsel %vm695_vm1, %v1426_v20, %v1434_v58  ;;  %v1445_v55 = vsel %vm695_vm1, %v1434_v58, %v1426_v20 }
 0x3eb   : > { %v1436_v54 = vpop.permute.xlu0 %1435  ;;  %v1449_v41 = vmul.f32 %v1445_v55, %v5077_v18  ;;  %v1450_v27 = vmul.f32 %v1441_v26, %v5071_v16 }
 0x3ec   : > { %v1442_v13 = vsel %vm695_vm1, %v1428_v10, %v1436_v54  ;;  %v1446_v28 = vsel %vm695_vm1, %v1436_v54, %v1428_v10 }
 0x3ed   : > { %v1451_v1 = vmul.f32 %v1446_v28, %v5077_v18  ;;  %v1452_v31 = vmul.f32 %v1442_v13, %v5071_v16  ;;  %v1466_v14 = vpop.permute.xlu1 %1465 }
 0x3ee   : > { %v1473_v49 = vsel %vm712_vm0, %v5922_v53, %v1466_v14 }
 0x3ef   : > { %v5974_v0 = vpack.c.bf16 %v1451_v1, %v1449_v41  ;;  %v1468_v61 = vpop.permute.xlu0 %1467  ;;  %v5976_v58 = vpack.c.bf16 %v1452_v31, %v1450_v27 }
 0x3f0   : > { %v1474_v51 = vsel %vm712_vm0, %v1460_v8, %v1468_v61  ;;  %v1478_v52 = vsel %vm712_vm0, %v1468_v61, %v1460_v8  ;;  %v1482_v61 = vmul.f32 %v1473_v49, %v5074_v17 }
 0x3f1   : > { %8710 = vst [vmem:[#allocation40_spill] sm:$0xff] %v5974_v0  ;;  %8711 = vst [vmem:[#allocation41_spill] sm:$0xff] %v5976_v58  ;;  %v1498_v20 = vpop.permute.xlu1 %1497  ;;  %1785 = vmatprep.subr.bf16.mxu1 %v5976_v58  ;;  %v1484_v21 = vmul.f32 %v1474_v51, %v5074_v17  ;;  %v1477_v51 = vsel %vm712_vm0, %v1466_v14, %v5922_v53  ;;  %v1483_v8 = vmul.f32 %v1478_v52, %v5080_v19 }
 0x3f2   : > { %1786 = vmatpush1.bf16.msra.mxu1 %v5974_v0  ;;  %v1505_v53 = vsel %vm729_vm2, %v5928_v2, %v1498_v20 }
 0x3f3   : > { %v1500_v10 = vpop.permute.xlu0 %1499  ;;  %v6036_v14 = vpack.c.bf16 %v1484_v21, %v1482_v61 }
 0x3f4   : > { %v1510_v21 = vsel %vm729_vm2, %v1500_v10, %v5934_v62 }
 0x3f5   : > { %v5980_v54 = vpop.permute.xlu1 %1529  ;;  %8714 = vst [vmem:[#allocation44_spill] sm:$0xff] %v6036_v14 }
 0x3f7   : > { %v5982_v55 = vpop.permute.xlu0 %1531 }
 0x3f9   : > { %v5984_v26 = vpop.permute.xlu1 %1561 }
 0x3fb   : > { %v5986_v28 = vpop.permute.xlu0 %1563 }
 0x3fd   : > { %v1430_v13 = vpop.permute.xlu1 %1429 }
 0x3ff   : > { %v1432_v1 = vpop.permute.xlu0 %1431 }
 0x401   : > { %v1462_v41 = vpop.permute.xlu1 %1461 }
 0x403   : > { %v1464_v57 = vpop.permute.xlu0 %1463 }
 0x405   : > { %v1494_v31 = vpop.permute.xlu1 %1493 }
 0x407   : > { %v5988_v27 = vpop.permute.xlu0 %1495 }
 0x409   : > { %v5990_v3 = vpop.permute.xlu1 %1525 }
 0x40b   : > { %v5992_v30 = vpop.permute.xlu0 %1527 }
 0x40d   : > { %v5994_v56 = vpop.permute.xlu1 %1557 }
 0x40f   : > { %v5996_v11 = vpop.permute.xlu0 %1559 }
 0x411   : > { %v1438_v29 = vpop.permute.xlu1 %1437 }
 0x412   : > { %v1443_v44 = vsel %vm695_vm1, %v1430_v13, %v1438_v29  ;;  %v1447_v59 = vsel %vm695_vm1, %v1438_v29, %v1430_v13 }
 0x413   : > { %v1440_v45 = vpop.permute.xlu0 %1439  ;;  %v1453_v0 = vmul.f32 %v1447_v59, %v5077_v18  ;;  %v1454_v29 = vmul.f32 %v1443_v44, %v5071_v16 }
 0x414   : > { %v1444_v46 = vsel %vm695_vm1, %v1432_v1, %v1440_v45  ;;  %v1448_v12 = vsel %vm695_vm1, %v1440_v45, %v1432_v1 }
 0x415   : > { %v1455_v13 = vmul.f32 %v1448_v12, %v5077_v18  ;;  %v1456_v58 = vmul.f32 %v1444_v46, %v5071_v16  ;;  %v6018_v4 = vpop.permute.xlu1 %1593  ;;  %v1481_v12 = vmul.f32 %v1477_v51, %v5080_v19  ;;  %v1506_v46 = vsel %vm729_vm2, %v5934_v62, %v1500_v10 }
 0x416   : > { %v1516_v1 = vmul.f32 %v1506_v46, %v5103_v38  ;;  %v1509_v62 = vsel %vm729_vm2, %v1498_v20, %v5928_v2  ;;  %v1514_v10 = vmul.f32 %v1505_v53, %v5103_v38  ;;  %v1515_v46 = vmul.f32 %v1510_v21, %v5100_v37 }
 0x417   : > { %v6025_v34 = vpack.c.bf16 %v1455_v13, %v1453_v0  ;;  %v6027_v45 = vpop.permute.xlu0 %1595  ;;  %v6029_v59 = vpack.c.bf16 %v1456_v58, %v1454_v29  ;;  %v6043_v0 = vpack.c.bf16 %v1483_v8, %v1481_v12 }
 0x418   : > { %v6079_v20 = vpack.c.bf16 %v1516_v1, %v1514_v10  ;;  %v1542_v1 = vsel %vm746_vm3, %v5982_v55, %v5946_v36 }
 0x419   : > { %8712 = vst [vmem:[#allocation42_spill] sm:$0xff] %v6025_v34  ;;  %8713 = vst [vmem:[#allocation43_spill] sm:$0xff] %v6029_v59  ;;  %v1470_v44 = vpop.permute.xlu1 %1469  ;;  %1787 = vmatprep.subr.bf16.mxu1 %v6029_v59 }
 0x41a   : > { %v1475_v52 = vsel %vm712_vm0, %v1462_v41, %v1470_v44  ;;  %v1479_v49 = vsel %vm712_vm0, %v1470_v44, %v1462_v41  ;;  %1788 = vmatpush1.bf16.msra.mxu1 %v6025_v34  ;;  %8715 = vst [vmem:[#allocation45_spill] sm:$0xff] %v6043_v0  ;;  %8718 = vst [vmem:[#allocation48_spill] sm:$0xff] %v6079_v20 }
 0x41b   : > { %1789 = vmatprep.subr.bf16.mxu1 %v6036_v14  ;;  %v1472_v58 = vpop.permute.xlu0 %1471  ;;  %v1485_v13 = vmul.f32 %v1479_v49, %v5080_v19  ;;  %v1486_v51 = vmul.f32 %v1475_v52, %v5074_v17  ;;  %v1513_v49 = vmul.f32 %v1509_v62, %v5100_v37 }
 0x41c   : > { %v1476_v41 = vsel %vm712_vm0, %v1464_v57, %v1472_v58  ;;  %v1480_v29 = vsel %vm712_vm0, %v1472_v58, %v1464_v57  ;;  %v1538_v58 = vsel %vm746_vm3, %v5946_v36, %v5982_v55  ;;  %v1541_v36 = vsel %vm746_vm3, %v5980_v54, %v5939_v63 }
 0x41d   : > { %v1487_v61 = vmul.f32 %v1480_v29, %v5080_v19  ;;  %v1488_v8 = vmul.f32 %v1476_v41, %v5074_v17  ;;  %v1502_v12 = vpop.permute.xlu1 %1501  ;;  %v6086_v41 = vpack.c.bf16 %v1515_v46, %v1513_v49  ;;  %v1537_v29 = vsel %vm746_vm3, %v5939_v63, %v5980_v54 }
 0x41e   : > { %1790 = vmatpush1.bf16.msra.mxu1 %v6043_v0  ;;  %v1507_v53 = vsel %vm729_vm2, %v1494_v31, %v1502_v12  ;;  %v1511_v21 = vsel %vm729_vm2, %v1502_v12, %v1494_v31  ;;  %v1546_v55 = vmul.f32 %v1537_v29, %v5109_v40 }
 0x41f   : > { %v6067_v57 = vpack.c.bf16 %v1487_v61, %v1485_v13  ;;  %v6069_v44 = vpop.permute.xlu0 %1591  ;;  %v6071_v52 = vpack.c.bf16 %v1488_v8, %v1486_v51  ;;  %8719 = vst [vmem:[#allocation49_spill] sm:$0xff] %v6086_v41  ;;  %v1548_v51 = vmul.f32 %v1538_v58, %v5109_v40  ;;  %v1517_v8 = vmul.f32 %v1511_v21, %v5100_v37 }
 0x420   : > { %v1518_v12 = vmul.f32 %v1507_v53, %v5103_v38  ;;  %v1547_v53 = vmul.f32 %v1542_v1, %v5106_v39 }
 0x421   : > { %8716 = vst [vmem:[#allocation46_spill] sm:$0xff] %v6067_v57  ;;  %8717 = vst [vmem:[#allocation47_spill] sm:$0xff] %v6071_v52  ;;  %v1534_v2 = vpop.permute.xlu1 %1533  ;;  %1791 = vmatprep.subr.bf16.mxu1 %v6071_v52 }
 0x422   : > { %1792 = vmatpush1.bf16.msra.mxu1 %v6067_v57  ;;  %v1539_v63 = vsel %vm746_vm3, %v5990_v3, %v1534_v2  ;;  %v1543_v54 = vsel %vm746_vm3, %v1534_v2, %v5990_v3 }
 0x423   : > { %1793 = vmatprep.subr.bf16.mxu1 %v6079_v20  ;;  %v1504_v13 = vpop.permute.xlu0 %1503 }
 0x424   : > { %v1508_v31 = vsel %vm729_vm2, %v5988_v27, %v1504_v13  ;;  %v1512_v61 = vsel %vm729_vm2, %v1504_v13, %v5988_v27  ;;  %v6124_v13 = vpack.c.bf16 %v1548_v51, %v1546_v55 }
 0x425   : > { %v1519_v62 = vmul.f32 %v1512_v61, %v5100_v37  ;;  %v1520_v10 = vmul.f32 %v1508_v31, %v5103_v38  ;;  %v1566_v46 = vpop.permute.xlu1 %1565  ;;  %v1545_v31 = vmul.f32 %v1541_v36, %v5106_v39 }
 0x426   : > { %1794 = vmatpush1.bf16.msra.mxu1 %v6086_v41  ;;  %8722 = vst [vmem:[#allocation52_spill] sm:$0xff] %v6124_v13 }
 0x427   : > { %v6114_v49 = vpack.c.bf16 %v1519_v62, %v1517_v8  ;;  %v6116_v27 = vpop.permute.xlu0 %1619  ;;  %v6118_v58 = vpack.c.bf16 %v1520_v10, %v1518_v12  ;;  %v6135_v1 = vpack.c.bf16 %v1547_v53, %v1545_v31  ;;  %v1549_v8 = vmul.f32 %v1543_v54, %v5106_v39 }
 0x428   : > { %v1550_v12 = vmul.f32 %v1539_v63, %v5109_v40  ;;  %v1574_v31 = vsel %vm763_vm4, %v5986_v28, %v5956_v5  ;;  %v1570_v63 = vsel %vm763_vm4, %v5956_v5, %v5986_v28  ;;  %v6190_v28 = vpack.c.bf16 %v5863_v25, %v5859_v42 }
 0x429   : > { %8720 = vst [vmem:[#allocation50_spill] sm:$0xff] %v6114_v49  ;;  %8721 = vst [vmem:[#allocation51_spill] sm:$0xff] %v6118_v58  ;;  %v6121_v21 = vpop.permute.xlu1 %1589  ;;  %1795 = vmatprep.subr.bf16.mxu1 %v6118_v58  ;;  %v6203_v42 = vpack.c.bf16 %v5839_v43, %v5835_v23  ;;  %v1602_v25 = vsel %vm780_vm5, %v5960_v35, %v6027_v45  ;;  %v1571_v23 = vsel %vm763_vm4, %v5994_v56, %v1566_v46 }
 0x42a   : > { %1796 = vmatpush1.bf16.msra.mxu1 %v6114_v49  ;;  %8723 = vst [vmem:[#allocation53_spill] sm:$0xff] %v6135_v1  ;;  %8728 = vst [vmem:[#allocation58_spill] sm:$0xff] %v6190_v28  ;;  %v1575_v43 = vsel %vm763_vm4, %v1566_v46, %v5994_v56  ;;  %v1611_v56 = vmul.f32 %v1602_v25, %v5143_v6 }
 0x42b   : > { %1797 = vmatprep.subr.bf16.mxu1 %v6124_v13  ;;  %v1536_v29 = vpop.permute.xlu0 %1535  ;;  %8729 = vst [vmem:[#allocation59_spill] sm:$0xff] %v6203_v42 }
 0x42c   : > { %v1540_v51 = vsel %vm746_vm3, %v5992_v30, %v1536_v29  ;;  %v1544_v61 = vsel %vm746_vm3, %v1536_v29, %v5992_v30  ;;  %v6161_v30 = vpack.c.bf16 %v5815_v50, %v5811_v22  ;;  %v1573_v22 = vsel %vm763_vm4, %v5984_v26, %v5951_v24 }
 0x42d   : > { %v1551_v3 = vmul.f32 %v1544_v61, %v5106_v39  ;;  %v1552_v2 = vmul.f32 %v1540_v51, %v5109_v40  ;;  %v6147_v62 = vpop.permute.xlu1 %1597  ;;  %v6179_v50 = vpack.c.bf16 %v5787_v60, %v5785_v15  ;;  %v1569_v29 = vsel %vm763_vm4, %v5951_v24, %v5984_v26 }
 0x42e   : > { %1798 = vmatpush1.bf16.msra.mxu1 %v6135_v1  ;;  %8726 = vst [vmem:[#allocation56_spill] sm:$0xff] %v6161_v30  ;;  %v1580_v51 = vmul.f32 %v1574_v31, %v5124_v48  ;;  %v1579_v61 = vmul.f32 %v1570_v63, %v5121_v47  ;;  %v1578_v60 = vmul.f32 %v1573_v22, %v5124_v48 }
 0x42f   : > { %v6150_v10 = vpack.c.bf16 %v1551_v3, %v1549_v8  ;;  %v6152_v36 = vpop.permute.xlu0 %1627  ;;  %v6154_v55 = vpack.c.bf16 %v1552_v2, %v1550_v12  ;;  %8727 = vst [vmem:[#allocation57_spill] sm:$0xff] %v6179_v50  ;;  %v1577_v8 = vmul.f32 %v1569_v29, %v5121_v47  ;;  %v1605_v24 = vsel %vm780_vm5, %v6018_v4, %v5958_v33 }
 0x430   : > { %v1606_v26 = vsel %vm780_vm5, %v6027_v45, %v5960_v35  ;;  %v6213_v3 = vpack.c.bf16 %v1580_v51, %v1578_v60  ;;  %v1601_v35 = vsel %vm780_vm5, %v5958_v33, %v6018_v4  ;;  %v1610_v45 = vmul.f32 %v1605_v24, %v5146_v7 }
 0x431   : > { %8724 = vst [vmem:[#allocation54_spill] sm:$0xff] %v6150_v10  ;;  %8725 = vst [vmem:[#allocation55_spill] sm:$0xff] %v6154_v55  ;;  %v6156_v53 = vpop.permute.xlu1 %1617  ;;  %1799 = vmatprep.subr.bf16.mxu1 %v6154_v55  ;;  %v6215_v2 = vpack.c.bf16 %v1579_v61, %v1577_v8  ;;  %v1612_v46 = vmul.f32 %v1606_v26, %v5146_v7  ;;  %v1581_v4 = vmul.f32 %v1571_v23, %v5121_v47 }
 0x432   : > { %1800 = vmatpush1.bf16.msra.mxu1 %v6150_v10  ;;  %8730 = vst [vmem:[#allocation60_spill] sm:$0xff] %v6213_v3  ;;  %v1582_v51 = vmul.f32 %v1575_v43, %v5124_v48 }
 0x433   : > { %1801 = vmatprep.subr.bf16.mxu1 %v6161_v30  ;;  %v1652_v54 = vpop.permute.xlu0 %1651  ;;  %8731 = vst [vmem:[#allocation61_spill] sm:$0xff] %v6215_v2 }
 0x435   : > { %v6186_v5 = vpop.permute.xlu1 %1625 }
 0x436   : > { %1802 = vmatpush1.bf16.msra.mxu1 %v6179_v50 }
 0x437   : > { %1803 = vmatprep.subr.bf16.mxu1 %v6190_v28  ;;  %v1660_v15 = vpop.permute.xlu0 %1659 }
 0x438   : > { %v1666_v31 = vsel %vm814_vm7, %v1652_v54, %v1660_v15  ;;  %v1670_v63 = vsel %vm814_vm7, %v1660_v15, %v1652_v54  ;;  %v6249_v15 = vld [vmem:[%s8656_s27 + $0x10] ss:$0 sm:$0xff] }
 0x439   : > { %v1650_v12 = vpop.permute.xlu1 %1649  ;;  %v1675_v8 = vmul.f32 %v6249_v15, %v1666_v31 }
 0x43a   : > { %1804 = vmatpush1.bf16.msra.mxu1 %v6203_v42 }
 0x43b   : > { %1805 = vmatprep.subr.bf16.mxu1 %v6213_v3  ;;  %v1568_v22 = vpop.permute.xlu0 %1567 }
 0x43c   : > { %v1572_v29 = vsel %vm763_vm4, %v5996_v11, %v1568_v22  ;;  %v1576_v33 = vsel %vm763_vm4, %v1568_v22, %v5996_v11  ;;  %v6255_v11 = vld [vmem:[%s8656_s27 + $0x18] ss:$0 sm:$0xff] }
 0x43d   : > { %v1583_v54 = vmul.f32 %v1572_v29, %v5121_v47  ;;  %v1584_v61 = vmul.f32 %v1576_v33, %v5124_v48  ;;  %v1658_v60 = vpop.permute.xlu1 %1657  ;;  %v1676_v24 = vmul.f32 %v6255_v11, %v1670_v63  ;;  %v1609_v33 = vmul.f32 %v1601_v35, %v5143_v6 }
 0x43e   : > { %v1665_v25 = vsel %vm814_vm7, %v1650_v12, %v1658_v60  ;;  %v1669_v26 = vsel %vm814_vm7, %v1658_v60, %v1650_v12  ;;  %1806 = vmatpush1.bf16.msra.mxu1 %v6215_v2  ;;  %v1603_v63 = vsel %vm780_vm5, %v6121_v21, %v6147_v62  ;;  %v1607_v12 = vsel %vm780_vm5, %v6147_v62, %v6121_v21 }
 0x43f   : > { %v6263_v23 = vpack.c.bf16 %v1583_v54, %v1581_v4  ;;  %v1673_v43 = vmul.f32 %v6249_v15, %v1665_v25  ;;  %v1674_v31 = vmul.f32 %v6255_v11, %v1669_v26  ;;  %v1624_v22 = vpop.permute.xlu0 %1623  ;;  %v6267_v29 = vpack.c.bf16 %v1584_v61, %v1582_v51 }
 0x440   : > { %v6281_v60 = vpack.c.bf16 %v1612_v46, %v1610_v45  ;;  %v1637_v35 = vsel %vm797_vm6, %v6186_v5, %v6156_v53  ;;  %v6290_v61 = vpack.c.bf16 %v1611_v56, %v1609_v33  ;;  %v1613_v21 = vmul.f32 %v1603_v63, %v5143_v6 }
 0x441   : > { %8732 = vst [vmem:[#allocation62_spill] sm:$0xff] %v6263_v23  ;;  %8733 = vst [vmem:[#allocation63_spill] sm:$0xff] %v6267_v29  ;;  %v6278_v4 = vpack.c.bf16 %v1675_v8, %v1673_v43  ;;  %v1622_v54 = vpop.permute.xlu1 %1621  ;;  %1807 = vmatprep.subr.bf16.mxu1 %v6267_v29  ;;  %v6283_v51 = vpack.c.bf16 %v1676_v24, %v1674_v31  ;;  %v1614_v45 = vmul.f32 %v1607_v12, %v5146_v7 }
 0x442   : > { %8735 = vst [vmem:[#allocation65_spill] sm:$0xff] %v6281_v60  ;;  %1808 = vmatpush1.bf16.msra.mxu1 %v6263_v23  ;;  %8737 = vst [vmem:[#allocation67_spill] sm:$0xff] %v6290_v61  ;;  %v1638_v46 = vsel %vm797_vm6, %v6152_v36, %v6116_v27  ;;  %v1633_v24 = vsel %vm797_vm6, %v6156_v53, %v6186_v5  ;;  %v1642_v25 = vmul.f32 %v1637_v35, %v8697_v32  ;;  %v8740_v5 = vld [vmem:[#allocation3_spill] sm:$0xff] }
 0x443   : > { %8734 = vst [vmem:[#allocation64_spill] sm:$0xff] %v6278_v4  ;;  %8736 = vst [vmem:[#allocation66_spill] sm:$0xff] %v6283_v51  ;;  %1809 = vmatprep.subr.bf16.mxu1 %v6281_v60  ;;  %1838 = vmatprep.subr.bf16.mxu0 %v6283_v51  ;;  %v1600_v62 = vpop.permute.xlu0 %1599  ;;  %v1644_v33 = vmul.f32 %v1638_v46, %v8697_v32  ;;  %v1641_v35 = vmul.f32 %v1633_v24, %v8740_v5 }
 0x444   : > { %v1604_v8 = vsel %vm780_vm5, %v6069_v44, %v1600_v62  ;;  %v1608_v56 = vsel %vm780_vm5, %v1600_v62, %v6069_v44  ;;  %1839 = vmatpush1.bf16.msra.mxu0 %v6278_v4  ;;  %v1634_v44 = vsel %vm797_vm6, %v6116_v27, %v6152_v36 }
 0x445   : > { %v1615_v26 = vmul.f32 %v1604_v8, %v5143_v6  ;;  %v1616_v43 = vmul.f32 %v1608_v56, %v5146_v7  ;;  %v1630_v31 = vpop.permute.xlu1 %1629  ;;  %v6326_v8 = vpack.c.bf16 %v1644_v33, %v1642_v25  ;;  %v1643_v56 = vmul.f32 %v1634_v44, %v8740_v5 }
 0x446   : > { %1810 = vmatpush1.bf16.msra.mxu1 %v6290_v61  ;;  %v1635_v4 = vsel %vm797_vm6, %v1622_v54, %v1630_v31  ;;  %v1639_v27 = vsel %vm797_vm6, %v1630_v31, %v1622_v54 }
 0x447   : > { %v6320_v63 = vpack.c.bf16 %v1615_v26, %v1613_v21  ;;  %v1656_v12 = vpop.permute.xlu0 %1655  ;;  %v6322_v53 = vpack.c.bf16 %v1616_v43, %v1614_v45  ;;  %8741 = vst [vmem:[#allocation3_spill] sm:$0xff] %v6326_v8  ;;  %v6335_v21 = vpack.c.bf16 %v1643_v56, %v1641_v35  ;;  %v1645_v24 = vmul.f32 %v1635_v4, %v8740_v5 }
 0x448   : > { %v1646_v25 = vmul.f32 %v1639_v27, %v8697_v32 }
 0x449   : > { %8738 = vst [vmem:[#allocation68_spill] sm:$0xff] %v6320_v63  ;;  %8739 = vst [vmem:[#allocation69_spill] sm:$0xff] %v6322_v53  ;;  %v1654_v62 = vpop.permute.xlu1 %1653  ;;  %1811 = vmatprep.subr.bf16.mxu1 %v6322_v53 }
 0x44a   : > { %1812 = vmatpush1.bf16.msra.mxu1 %v6320_v63  ;;  %8742 = vst [vmem:[#allocation70_spill] sm:$0xff] %v6335_v21 }
 0x44b   : > { %1813 = vmatprep.subr.bf16.mxu1 %v6326_v8  ;;  %v1632_v36 = vpop.permute.xlu0 %1631 }
 0x44c   : > { %v1636_v45 = vsel %vm797_vm6, %v1624_v22, %v1632_v36  ;;  %v1640_v46 = vsel %vm797_vm6, %v1632_v36, %v1624_v22 }
 0x44d   : > { %v1647_v26 = vmul.f32 %v1636_v45, %v8740_v5  ;;  %v1648_v54 = vmul.f32 %v1640_v46, %v8697_v32  ;;  %v1662_v43 = vpop.permute.xlu1 %1661  ;;  %v4774_v46 = vld [vmem:[%s8491_s6] ss:$12 sps:$4 sm:$0xff]  }
 0x44e   : > { %v1667_v31 = vsel %vm814_vm7, %v1654_v62, %v1662_v43  ;;  %v1671_v44 = vsel %vm814_vm7, %v1662_v43, %v1654_v62  ;;  %1814 = vmatpush1.bf16.msra.mxu1 %v6335_v21  ;;  %v8747_v43 = vmov 0  }
 0x44f   : > { %v6350_v33 = vpack.c.bf16 %v1647_v26, %v1645_v24  ;;  %v1664_v22 = vpop.permute.xlu0 %1663  ;;  %v6352_v35 = vpack.c.bf16 %v1648_v54, %v1646_v25  ;;  %v1677_v27 = vmul.f32 %v6249_v15, %v1667_v31  ;;  %v1678_v36 = vmul.f32 %v6255_v11, %v1671_v44  ;;  %v4777_v26 = vld [vmem:[%s8491_s6 + $0x8] ss:$12 sps:$4 sm:$0xff]   ;;  %v4780_v54 = vld [vmem:[%s8491_s6 + $0x18] ss:$12 sps:$4 sm:$0xff]   ;;  %v4781_v31 = vld [vmem:[%s8491_s6 + $0x20] ss:$12 sps:$4 sm:$0xff]  }
 0x450   : > { %v1668_v4 = vsel %vm814_vm7, %v1656_v12, %v1664_v22  ;;  %v1672_v56 = vsel %vm814_vm7, %v1664_v22, %v1656_v12  ;;  %v4778_v12 = vld [vmem:[%s8491_s6 + $0x1c] ss:$12 sps:$4 sm:$0xff]  }
 0x451   : > { %8743 = vst [vmem:[#allocation71_spill] sm:$0xff] %v6350_v33  ;;  %8744 = vst [vmem:[#allocation72_spill] sm:$0xff] %v6352_v35  ;;  %v1679_v45 = vmul.f32 %v6249_v15, %v1668_v4  ;;  %v1680_v62 = vmul.f32 %v6255_v11, %v1672_v56  ;;  %1815 = vmatprep.subr.bf16.mxu1 %v6352_v35 }
 0x452   : > { %1816 = vmatpush1.bf16.msra.mxu1 %v6350_v33 }
 0x453   : > { %v6370_v24 = vpack.c.bf16 %v1679_v45, %v1677_v27  ;;  %v6372_v25 = vpack.c.bf16 %v1680_v62, %v1678_v36 }
 0x455   : > { %8745 = vst [vmem:[#allocation73_spill] sm:$0xff] %v6370_v24  ;;  %8746 = vst [vmem:[#allocation74_spill] sm:$0xff] %v6372_v25  ;;  %1818 = vmatmul.mubr.bf16.vlgmr.msra.gmra.mrb[8].mxu1 %v4774_v46  ;;  %1840 = vmatprep.subr.bf16.mxu0 %v6372_v25 }
 0x456   : > { %1841 = vmatpush1.bf16.msra.mxu0 %v6370_v24  ;;  %1827 = vmatprep.mubr.bf16.mxu1 %v4778_v12 }
 0x459   : > { %4573 = vmatmul.mubr.msk.bf16.vlgmr.msra.gmra.mrb[16].mxu0 %vm1304_vm10, %v4777_v26 }
 0x45a   : > { %1880 = vmatprep.mubr.bf16.mxu0 %v8747_v43 }
 0x45d   : > { %1828 = vmatmul.mubr.bf16.gmra.mrb[12].mxu1 %v4780_v54 }
 0x45e   : > { %v1732_v4 = vpop.permute.xlu1 %1731 }
 0x460   : > { %v1737_v45 = vpop.permute.xlu0 %1736 }
 0x461   : > { %4574 = vmatmul.mubr.msk.bf16.gmra.mrb[20].mxu0 %vm1304_vm10, %v4781_v31 }
 0x528   : > { %v1819_v44 = vpop.f32.mrb[8].mxu1 }
 0x529   : > { %v1821_v22 = vpop.f32.mrb[9].mxu1  ;;  %v1820_v27 = vadd.f32 %v1819_v44, %v1732_v4  ;;  %v1742_v44 = vpop.permute.xlu1 %1741 }
 0x52a   : > { %v1823_v56 = vpop.f32.mrb[10].mxu1  ;;  %v1822_v62 = vadd.f32 %v1821_v22, %v1732_v4 }
 0x52b   : > { %v1825_v36 = vpop.f32.mrb[11].mxu1  ;;  %v1824_v12 = vadd.f32 %v1823_v56, %v1737_v45 }
 0x52c   : > { %v1872_v46 = vpop.f32.mrb[16].mxu0  ;;  %v1826_v25 = vadd.f32 %v1825_v36, %v1737_v45 }
 0x52d   : > { %v1873_v26 = vadd.f32 %v1872_v46, %v1820_v27  ;;  %v1874_v24 = vpop.f32.mrb[17].mxu0 }
 0x52e   : > { %v1875_v54 = vadd.f32 %v1874_v24, %v1822_v62  ;;  %v1876_v51 = vpop.f32.mrb[18].mxu0  ;;  %v1747_v24 = vpop.permute.xlu0 %1746 }
 0x52f   : > { %v6388_v33 = vmax.f32 %v1873_v26, 0.0  ;;  %v1877_v35 = vadd.f32 %v1876_v51, %v1824_v12  ;;  %v1878_v21 = vpop.f32.mrb[19].mxu0 }
 0x530   : > { %v1879_v31 = vadd.f32 %v1878_v21, %v1826_v25  ;;  %v1829_v8 = vpop.f32.mrb[12].mxu1 }
 0x531   : > { %v6390_v63 = vmax.f32 %v1877_v35, 0.0  ;;  %v1831_v53 = vpop.f32.mrb[13].mxu1  ;;  %1899 = vrot.lane.b32.xlu1 %v6388_v33, %s8708_s0  ;;  %v1830_v4 = vadd.f32 %v1829_v8, %v1742_v44 }
 0x532   : > { %v1833_v22 = vpop.f32.mrb[14].mxu1  ;;  %v1832_v27 = vadd.f32 %v1831_v53, %v1742_v44  ;;  %v6410_v53 = vmax.f32 %v1875_v54, 0.0  ;;  %v6414_v26 = vmax.f32 %v1879_v31, 0.0 }
 0x533   : > { %v1835_v56 = vpop.f32.mrb[15].mxu1  ;;  %1901 = vrot.lane.b32.xlu0 %v6390_v63, %s8708_s0  ;;  %v1834_v51 = vadd.f32 %v1833_v22, %v1747_v24 }
 0x534   : > { %v1882_v36 = vpop.f32.mrb[20].mxu0  ;;  %v1836_v35 = vadd.f32 %v1835_v56, %v1747_v24 }
 0x535   : > { %v1883_v45 = vadd.f32 %v1882_v36, %v1830_v4  ;;  %v1884_v21 = vpop.f32.mrb[21].mxu0  ;;  %1931 = vrot.lane.b32.xlu1 %v6388_v33, %s8709_s1  ;;  %v4784_v4 = vld [vmem:[%s8493_s8 + $0x4] ss:$12 sps:$4 sm:$0xff]  }
 0x536   : > { %v1885_v25 = vadd.f32 %v1884_v21, %v1832_v27  ;;  %v1886_v62 = vpop.f32.mrb[22].mxu0  ;;  %2291 = vmatprep.mubr.bf16.mxu1 %v4784_v4  ;;  %v2199_v21 = vld [vmem:[%s8494_s9] sm:$0xff] }
 0x537   : > { %v1887_v46 = vadd.f32 %v1886_v62, %v1834_v51  ;;  %v1888_v12 = vpop.f32.mrb[23].mxu0  ;;  %1933 = vrot.lane.b32.xlu0 %v6390_v63, %s8709_s1  ;;  %v6430_v54 = vmax.f32 %v1883_v45, 0.0 }
 0x538   : > { %v1889_v8 = vadd.f32 %v1888_v12, %v1836_v35  ;;  %v6450_v44 = vmax.f32 %v1885_v25, 0.0  ;;  %v2200_v25 = vld [vmem:[%s8494_s9 + $0x8] sm:$0xff] }
 0x539   : > { %1963 = vrot.lane.b32.xlu1 %v6388_v33, %s8661_s28  ;;  %v6434_v31 = vmax.f32 %v1887_v46, 0.0  ;;  %v2201_v46 = vld [vmem:[%s8494_s9 + $0x10] sm:$0xff] }
 0x53a   : > { %v6454_v22 = vmax.f32 %v1889_v8, 0.0  ;;  %v2202_v8 = vld [vmem:[%s8494_s9 + $0x18] sm:$0xff] }
 0x53b   : > { %1965 = vrot.lane.b32.xlu0 %v6390_v63, %s8661_s28 }
 0x53d   : > { %1995 = vrot.lane.b32.xlu1 %v6388_v33, %s8662_s23 }
 0x53f   : > { %1997 = vrot.lane.b32.xlu0 %v6390_v63, %s8662_s23 }
 0x541   : > { %2027 = vrot.lane.b32.xlu1 %v6388_v33, %s8663_s26 }
 0x543   : > { %2029 = vrot.lane.b32.xlu0 %v6390_v63, %s8663_s26 }
 0x545   : > { %1907 = vrot.lane.b32.xlu1 %v6410_v53, %s8708_s0 }
 0x547   : > { %1909 = vrot.lane.b32.xlu0 %v6414_v26, %s8708_s0 }
 0x549   : > { %1939 = vrot.lane.b32.xlu1 %v6410_v53, %s8709_s1 }
 0x54b   : > { %1941 = vrot.lane.b32.xlu0 %v6414_v26, %s8709_s1 }
 0x54d   : > { %1971 = vrot.lane.b32.xlu1 %v6410_v53, %s8661_s28 }
 0x54f   : > { %1973 = vrot.lane.b32.xlu0 %v6414_v26, %s8661_s28 }
 0x551   : > { %2003 = vrot.lane.b32.xlu1 %v6410_v53, %s8662_s23 }
 0x553   : > { %2005 = vrot.lane.b32.xlu0 %v6414_v26, %s8662_s23 }
 0x555   : > { %1903 = vrot.lane.b32.xlu1 %v6430_v54, %s8708_s0 }
 0x557   : > { %1905 = vrot.lane.b32.xlu0 %v6434_v31, %s8708_s0 }
 0x559   : > { %1935 = vrot.lane.b32.xlu1 %v6430_v54, %s8709_s1 }
 0x55b   : > { %1937 = vrot.lane.b32.xlu0 %v6434_v31, %s8709_s1 }
 0x55d   : > { %1967 = vrot.lane.b32.xlu1 %v6430_v54, %s8661_s28 }
 0x55f   : > { %1969 = vrot.lane.b32.xlu0 %v6434_v31, %s8661_s28 }
 0x561   : > { %1999 = vrot.lane.b32.xlu1 %v6430_v54, %s8662_s23 }
 0x563   : > { %2001 = vrot.lane.b32.xlu0 %v6434_v31, %s8662_s23 }
 0x565   : > { %1911 = vrot.lane.b32.xlu1 %v6450_v44, %s8708_s0 }
 0x567   : > { %1913 = vrot.lane.b32.xlu0 %v6454_v22, %s8708_s0 }
 0x569   : > { %2035 = vrot.lane.b32.xlu1 %v6410_v53, %s8663_s26 }
 0x56b   : > { %2037 = vrot.lane.b32.xlu0 %v6414_v26, %s8663_s26 }
 0x56d   : > { %1943 = vrot.lane.b32.xlu1 %v6450_v44, %s8709_s1 }
 0x56f   : > { %1945 = vrot.lane.b32.xlu0 %v6454_v22, %s8709_s1 }
 0x571   : > { %1975 = vrot.lane.b32.xlu1 %v6450_v44, %s8661_s28 }
 0x573   : > { %2033 = vrot.lane.b32.xlu0 %v6434_v31, %s8663_s26 }
 0x575   : > { %2007 = vrot.lane.b32.xlu1 %v6450_v44, %s8662_s23 }
 0x577   : > { %1977 = vrot.lane.b32.xlu0 %v6454_v22, %s8661_s28 }
 0x579   : > { %2031 = vrot.lane.b32.xlu1 %v6430_v54, %s8663_s26 }
 0x57b   : > { %2061 = vrot.lane.b32.xlu0 %v6390_v63, %s8664_s5 }
 0x57d   : > { %2039 = vrot.lane.b32.xlu1 %v6450_v44, %s8663_s26 }
 0x57f   : > { %2009 = vrot.lane.b32.xlu0 %v6454_v22, %s8662_s23 }
 0x581   : > { %2059 = vrot.lane.b32.xlu1 %v6388_v33, %s8664_s5 }
 0x583   : > { %2069 = vrot.lane.b32.xlu0 %v6414_v26, %s8664_s5 }
 0x585   : > { %2067 = vrot.lane.b32.xlu1 %v6410_v53, %s8664_s5 }
 0x587   : > { %2065 = vrot.lane.b32.xlu0 %v6434_v31, %s8664_s5 }
 0x589   : > { %2063 = vrot.lane.b32.xlu1 %v6430_v54, %s8664_s5 }
 0x58b   : > { %2093 = vrot.lane.b32.xlu0 %v6390_v63, %s8665_s30 }
 0x58d   : > { %2071 = vrot.lane.b32.xlu1 %v6450_v44, %s8664_s5 }
 0x58f   : > { %2041 = vrot.lane.b32.xlu0 %v6454_v22, %s8663_s26 }
 0x591   : > { %2091 = vrot.lane.b32.xlu1 %v6388_v33, %s8665_s30 }
 0x593   : > { %2101 = vrot.lane.b32.xlu0 %v6414_v26, %s8665_s30 }
 0x595   : > { %2099 = vrot.lane.b32.xlu1 %v6410_v53, %s8665_s30 }
 0x597   : > { %2073 = vrot.lane.b32.xlu0 %v6454_v22, %s8664_s5 }
 0x599   : > { %2095 = vrot.lane.b32.xlu1 %v6430_v54, %s8665_s30 }
 0x59b   : > { %2097 = vrot.lane.b32.xlu0 %v6434_v31, %s8665_s30 }
 0x59d   : > { %2103 = vrot.lane.b32.xlu1 %v6450_v44, %s8665_s30 }
 0x59f   : > { %2105 = vrot.lane.b32.xlu0 %v6454_v22, %s8665_s30 }
 0x5a1   : > { %2123 = vrot.lane.b32.xlu1 %v6388_v33, %s4872_s24 }
 0x5a3   : > { %v1900_v56 = vpop.permute.xlu1 %1899  ;;  %2125 = vrot.lane.b32.xlu0 %v6390_v63, %s4872_s24 }
 0x5a5   : > { %2131 = vrot.lane.b32.xlu1 %v6410_v53, %s4872_s24  ;;  %v1902_v24 = vpop.permute.xlu0 %1901 }
 0x5a7   : > { %v6525_v27 = vpop.permute.xlu1 %1931  ;;  %2133 = vrot.lane.b32.xlu0 %v6414_v26, %s4872_s24 }
 0x5a9   : > { %2127 = vrot.lane.b32.xlu1 %v6430_v54, %s4872_s24  ;;  %v1934_v36 = vpop.permute.xlu0 %1933 }
 0x5ab   : > { %v6531_v51 = vpop.permute.xlu1 %1963  ;;  %2129 = vrot.lane.b32.xlu0 %v6434_v31, %s4872_s24 }
 0x5ad   : > { %2135 = vrot.lane.b32.xlu1 %v6450_v44, %s4872_s24  ;;  %v6537_v45 = vpop.permute.xlu0 %1965 }
 0x5af   : > { %v6542_v35 = vpop.permute.xlu1 %1995  ;;  %2137 = vrot.lane.b32.xlu0 %v6454_v22, %s4872_s24 }
 0x5b1   : > { %2205 = vperm.xlu1 %4763, %v2199_v21   ;;  %v6549_v62 = vpop.permute.xlu0 %1997 }
 0x5b3   : > { %v6554_v12 = vpop.permute.xlu1 %2027  ;;  %2210 = vperm.xlu0 %4762, %v2200_v25  }
 0x5b5   : > { %2215 = vperm.xlu1 %4763, %v2201_v46   ;;  %v6559_v4 = vpop.permute.xlu0 %2029 }
 0x5b7   : > { %v1908_v61 = vpop.permute.xlu1 %1907  ;;  %2220 = vperm.xlu0 %4762, %v2202_v8  }
 0x5b8   : > { %v1915_v21 = vsel %vm695_vm1, %v1900_v56, %v1908_v61  ;;  %v1919_v60 = vsel %vm695_vm1, %v1908_v61, %v1900_v56 }
 0x5b9   : > { %v1910_v23 = vpop.permute.xlu0 %1909  ;;  %v1923_v2 = vmul.f32 %v1919_v60, %v5077_v18  ;;  %v1924_v46 = vmul.f32 %v1915_v21, %v5071_v16 }
 0x5ba   : > { %v1916_v29 = vsel %vm695_vm1, %v1902_v24, %v1910_v23  ;;  %v1920_v25 = vsel %vm695_vm1, %v1910_v23, %v1902_v24 }
 0x5bb   : > { %v1925_v3 = vmul.f32 %v1920_v25, %v5077_v18  ;;  %v1926_v8 = vmul.f32 %v1916_v29, %v5071_v16  ;;  %v1940_v42 = vpop.permute.xlu1 %1939 }
 0x5bc   : > { %v1947_v49 = vsel %vm712_vm0, %v6525_v27, %v1940_v42 }
 0x5bd   : > { %v6573_v28 = vpack.c.bf16 %v1925_v3, %v1923_v2  ;;  %v1942_v50 = vpop.permute.xlu0 %1941  ;;  %v6575_v61 = vpack.c.bf16 %v1926_v8, %v1924_v46 }
 0x5be   : > { %v1948_v8 = vsel %vm712_vm0, %v1934_v36, %v1942_v50  ;;  %v1952_v41 = vsel %vm712_vm0, %v1942_v50, %v1934_v36  ;;  %v1951_v50 = vsel %vm712_vm0, %v1940_v42, %v6525_v27  ;;  %v1956_v36 = vmul.f32 %v1947_v49, %v5074_v17 }
 0x5bf   : > { %v1972_v56 = vpop.permute.xlu1 %1971  ;;  %2259 = vmatprep.subr.bf16.mxu1 %v6575_v61  ;;  %v1958_v20 = vmul.f32 %v1948_v8, %v5074_v17  ;;  %v1957_v8 = vmul.f32 %v1952_v41, %v5080_v19 }
 0x5c0   : > { %2260 = vmatpush1.bf16.msra.mxu1 %v6573_v28  ;;  %v1979_v49 = vsel %vm729_vm2, %v6531_v51, %v1972_v56 }
 0x5c1   : > { %v1974_v23 = vpop.permute.xlu0 %1973  ;;  %v6627_v42 = vpack.c.bf16 %v1958_v20, %v1956_v36 }
 0x5c2   : > { %v1984_v20 = vsel %vm729_vm2, %v1974_v23, %v6537_v45 }
 0x5c3   : > { %v6579_v24 = vpop.permute.xlu1 %2003  ;;  %8748 = vst [vmem:[#allocation75_spill] sm:$0xff] %v6627_v42 }
 0x5c5   : > { %v6581_v60 = vpop.permute.xlu0 %2005 }
 0x5c7   : > { %v1904_v21 = vpop.permute.xlu1 %1903 }
 0x5c9   : > { %v1906_v25 = vpop.permute.xlu0 %1905 }
 0x5cb   : > { %v1936_v30 = vpop.permute.xlu1 %1935 }
 0x5cd   : > { %v1938_v29 = vpop.permute.xlu0 %1937 }
 0x5cf   : > { %v1968_v10 = vpop.permute.xlu1 %1967 }
 0x5d1   : > { %v6583_v3 = vpop.permute.xlu0 %1969 }
 0x5d3   : > { %v6585_v2 = vpop.permute.xlu1 %1999 }
 0x5d5   : > { %v6587_v46 = vpop.permute.xlu0 %2001 }
 0x5d7   : > { %v1912_v55 = vpop.permute.xlu1 %1911 }
 0x5d8   : > { %v1917_v1 = vsel %vm695_vm1, %v1904_v21, %v1912_v55  ;;  %v1921_v13 = vsel %vm695_vm1, %v1912_v55, %v1904_v21 }
 0x5d9   : > { %v1914_v58 = vpop.permute.xlu0 %1913  ;;  %v1927_v0 = vmul.f32 %v1921_v13, %v5077_v18  ;;  %v1928_v55 = vmul.f32 %v1917_v1, %v5071_v16 }
 0x5da   : > { %v1918_v57 = vsel %vm695_vm1, %v1906_v25, %v1914_v58  ;;  %v1922_v52 = vsel %vm695_vm1, %v1914_v58, %v1906_v25 }
 0x5db   : > { %v1929_v21 = vmul.f32 %v1922_v52, %v5077_v18  ;;  %v1930_v14 = vmul.f32 %v1918_v57, %v5071_v16  ;;  %v6609_v34 = vpop.permute.xlu1 %2035  ;;  %v1955_v52 = vmul.f32 %v1951_v50, %v5080_v19  ;;  %v1980_v57 = vsel %vm729_vm2, %v6537_v45, %v1974_v23 }
 0x5dc   : > { %v1990_v25 = vmul.f32 %v1980_v57, %v5103_v38  ;;  %v1983_v45 = vsel %vm729_vm2, %v1972_v56, %v6531_v51  ;;  %v1988_v23 = vmul.f32 %v1979_v49, %v5103_v38  ;;  %v1989_v57 = vmul.f32 %v1984_v20, %v5100_v37 }
 0x5dd   : > { %v6616_v59 = vpack.c.bf16 %v1929_v21, %v1927_v0  ;;  %v6618_v58 = vpop.permute.xlu0 %2037  ;;  %v6620_v13 = vpack.c.bf16 %v1930_v14, %v1928_v55  ;;  %v6634_v14 = vpack.c.bf16 %v1957_v8, %v1955_v52 }
 0x5de   : > { %v6670_v56 = vpack.c.bf16 %v1990_v25, %v1988_v23  ;;  %v2016_v25 = vsel %vm746_vm3, %v6581_v60, %v6549_v62 }
 0x5df   : > { %v1944_v1 = vpop.permute.xlu1 %1943  ;;  %2261 = vmatprep.subr.bf16.mxu1 %v6620_v13  ;;  %8749 = vst [vmem:[#allocation76_spill] sm:$0xff] %v6634_v14 }
 0x5e0   : > { %v1949_v41 = vsel %vm712_vm0, %v1936_v30, %v1944_v1  ;;  %v1953_v0 = vsel %vm712_vm0, %v1944_v1, %v1936_v30  ;;  %2262 = vmatpush1.bf16.msra.mxu1 %v6616_v59  ;;  %8752 = vst [vmem:[#allocation79_spill] sm:$0xff] %v6670_v56 }
 0x5e1   : > { %2263 = vmatprep.subr.bf16.mxu1 %v6627_v42  ;;  %v1946_v27 = vpop.permute.xlu0 %1945  ;;  %v1959_v21 = vmul.f32 %v1953_v0, %v5080_v19  ;;  %v1960_v50 = vmul.f32 %v1949_v41, %v5074_v17  ;;  %v1987_v0 = vmul.f32 %v1983_v45, %v5100_v37 }
 0x5e2   : > { %v1950_v30 = vsel %vm712_vm0, %v1938_v29, %v1946_v27  ;;  %v1954_v55 = vsel %vm712_vm0, %v1946_v27, %v1938_v29  ;;  %v2012_v27 = vsel %vm746_vm3, %v6549_v62, %v6581_v60  ;;  %v2015_v62 = vsel %vm746_vm3, %v6579_v24, %v6542_v35 }
 0x5e3   : > { %v1961_v36 = vmul.f32 %v1954_v55, %v5080_v19  ;;  %v1962_v8 = vmul.f32 %v1950_v30, %v5074_v17  ;;  %v1976_v52 = vpop.permute.xlu1 %1975  ;;  %v6677_v30 = vpack.c.bf16 %v1989_v57, %v1987_v0  ;;  %v2011_v55 = vsel %vm746_vm3, %v6542_v35, %v6579_v24 }
 0x5e4   : > { %2264 = vmatpush1.bf16.msra.mxu1 %v6634_v14  ;;  %v1981_v49 = vsel %vm729_vm2, %v1968_v10, %v1976_v52  ;;  %v1985_v20 = vsel %vm729_vm2, %v1976_v52, %v1968_v10  ;;  %v2020_v60 = vmul.f32 %v2011_v55, %v5109_v40 }
 0x5e5   : > { %v6658_v29 = vpack.c.bf16 %v1961_v36, %v1959_v21  ;;  %v6660_v1 = vpop.permute.xlu0 %2033  ;;  %v6662_v41 = vpack.c.bf16 %v1962_v8, %v1960_v50  ;;  %8753 = vst [vmem:[#allocation80_spill] sm:$0xff] %v6677_v30  ;;  %v2022_v50 = vmul.f32 %v2012_v27, %v5109_v40  ;;  %v1991_v8 = vmul.f32 %v1985_v20, %v5100_v37 }
 0x5e6   : > { %v1992_v52 = vmul.f32 %v1981_v49, %v5103_v38  ;;  %v2021_v49 = vmul.f32 %v2016_v25, %v5106_v39 }
 0x5e7   : > { %8750 = vst [vmem:[#allocation77_spill] sm:$0xff] %v6658_v29  ;;  %8751 = vst [vmem:[#allocation78_spill] sm:$0xff] %v6662_v41  ;;  %v2008_v51 = vpop.permute.xlu1 %2007  ;;  %2265 = vmatprep.subr.bf16.mxu1 %v6662_v41 }
 0x5e8   : > { %2266 = vmatpush1.bf16.msra.mxu1 %v6658_v29  ;;  %v2013_v35 = vsel %vm746_vm3, %v6585_v2, %v2008_v51  ;;  %v2017_v24 = vsel %vm746_vm3, %v2008_v51, %v6585_v2 }
 0x5e9   : > { %2267 = vmatprep.subr.bf16.mxu1 %v6670_v56  ;;  %v1978_v21 = vpop.permute.xlu0 %1977 }
 0x5ea   : > { %v1982_v10 = vsel %vm729_vm2, %v6583_v3, %v1978_v21  ;;  %v1986_v36 = vsel %vm729_vm2, %v1978_v21, %v6583_v3  ;;  %v6713_v21 = vpack.c.bf16 %v2022_v50, %v2020_v60 }
 0x5eb   : > { %v1993_v45 = vmul.f32 %v1986_v36, %v5100_v37  ;;  %v1994_v23 = vmul.f32 %v1982_v10, %v5103_v38  ;;  %v2032_v57 = vpop.permute.xlu1 %2031  ;;  %v2019_v10 = vmul.f32 %v2015_v62, %v5106_v39 }
 0x5ec   : > { %2268 = vmatpush1.bf16.msra.mxu1 %v6677_v30  ;;  %8756 = vst [vmem:[#allocation83_spill] sm:$0xff] %v6713_v21 }
 0x5ed   : > { %v6705_v0 = vpack.c.bf16 %v1993_v45, %v1991_v8  ;;  %v6707_v3 = vpop.permute.xlu0 %2061  ;;  %v6709_v27 = vpack.c.bf16 %v1994_v23, %v1992_v52  ;;  %v6724_v25 = vpack.c.bf16 %v2021_v49, %v2019_v10  ;;  %v2023_v8 = vmul.f32 %v2017_v24, %v5106_v39 }
 0x5ee   : > { %v2024_v52 = vmul.f32 %v2013_v35, %v5109_v40  ;;  %v2048_v10 = vsel %vm763_vm4, %v6618_v58, %v6559_v4  ;;  %v2047_v24 = vsel %vm763_vm4, %v6609_v34, %v6554_v12 }
 0x5ef   : > { %8754 = vst [vmem:[#allocation81_spill] sm:$0xff] %v6705_v0  ;;  %8755 = vst [vmem:[#allocation82_spill] sm:$0xff] %v6709_v27  ;;  %v2040_v20 = vpop.permute.xlu1 %2039  ;;  %2269 = vmatprep.subr.bf16.mxu1 %v6709_v27 }
 0x5f0   : > { %2270 = vmatpush1.bf16.msra.mxu1 %v6705_v0  ;;  %8757 = vst [vmem:[#allocation84_spill] sm:$0xff] %v6724_v25 }
 0x5f1   : > { %2271 = vmatprep.subr.bf16.mxu1 %v6713_v21  ;;  %v2010_v55 = vpop.permute.xlu0 %2009 }
 0x5f2   : > { %v2014_v50 = vsel %vm746_vm3, %v6587_v46, %v2010_v55  ;;  %v2018_v36 = vsel %vm746_vm3, %v2010_v55, %v6587_v46  ;;  %v6744_v46 = vpack.c.bf16 %v6414_v26, %v6410_v53  ;;  %v2044_v53 = vsel %vm763_vm4, %v6559_v4, %v6618_v58 }
 0x5f3   : > { %v2025_v2 = vmul.f32 %v2018_v36, %v5106_v39  ;;  %v2026_v51 = vmul.f32 %v2014_v50, %v5109_v40  ;;  %v2060_v45 = vpop.permute.xlu1 %2059  ;;  %v6762_v26 = vpack.c.bf16 %v6390_v63, %v6388_v33  ;;  %v2054_v55 = vmul.f32 %v2048_v10, %v5124_v48 }
 0x5f4   : > { %2272 = vmatpush1.bf16.msra.mxu1 %v6724_v25  ;;  %8760 = vst [vmem:[#allocation87_spill] sm:$0xff] %v6744_v46  ;;  %v6767_v36 = vpack.c.bf16 %v6454_v22, %v6450_v44  ;;  %v2052_v4 = vmul.f32 %v2047_v24, %v5124_v48  ;;  %v2053_v58 = vmul.f32 %v2044_v53, %v5121_v47 }
 0x5f5   : > { %v6737_v23 = vpack.c.bf16 %v2025_v2, %v2023_v8  ;;  %v2070_v62 = vpop.permute.xlu0 %2069  ;;  %v6739_v60 = vpack.c.bf16 %v2026_v51, %v2024_v52  ;;  %8761 = vst [vmem:[#allocation88_spill] sm:$0xff] %v6762_v26  ;;  %v2043_v8 = vsel %vm763_vm4, %v6554_v12, %v6609_v34  ;;  %v2045_v33 = vsel %vm763_vm4, %v2032_v57, %v2040_v20 }
 0x5f6   : > { %8762 = vst [vmem:[#allocation89_spill] sm:$0xff] %v6767_v36  ;;  %v6781_v44 = vpack.c.bf16 %v6434_v31, %v6430_v54  ;;  %v2051_v22 = vmul.f32 %v2043_v8, %v5121_v47  ;;  %v6784_v34 = vpack.c.bf16 %v2054_v55, %v2052_v4  ;;  %v2049_v12 = vsel %vm763_vm4, %v2040_v20, %v2032_v57 }
 0x5f7   : > { %8758 = vst [vmem:[#allocation85_spill] sm:$0xff] %v6737_v23  ;;  %8759 = vst [vmem:[#allocation86_spill] sm:$0xff] %v6739_v60  ;;  %v2068_v49 = vpop.permute.xlu1 %2067  ;;  %2273 = vmatprep.subr.bf16.mxu1 %v6739_v60  ;;  %v2055_v10 = vmul.f32 %v2045_v33, %v5121_v47  ;;  %v2080_v31 = vsel %vm780_vm5, %v2070_v62, %v6707_v3  ;;  %v2056_v53 = vmul.f32 %v2049_v12, %v5124_v48 }
 0x5f8   : > { %2274 = vmatpush1.bf16.msra.mxu1 %v6737_v23  ;;  %8763 = vst [vmem:[#allocation90_spill] sm:$0xff] %v6781_v44  ;;  %8764 = vst [vmem:[#allocation91_spill] sm:$0xff] %v6784_v34  ;;  %v2079_v2 = vsel %vm780_vm5, %v2068_v49, %v2060_v45  ;;  %v6791_v51 = vpack.c.bf16 %v2053_v58, %v2051_v22  ;;  %v2075_v24 = vsel %vm780_vm5, %v2060_v45, %v2068_v49 }
 0x5f9   : > { %2275 = vmatprep.subr.bf16.mxu1 %v6744_v46  ;;  %v2066_v35 = vpop.permute.xlu0 %2065  ;;  %v2084_v55 = vmul.f32 %v2079_v2, %v5146_v7  ;;  %v2076_v45 = vsel %vm780_vm5, %v6707_v3, %v2070_v62  ;;  %v2086_v49 = vmul.f32 %v2080_v31, %v5146_v7  ;;  %v2083_v33 = vmul.f32 %v2075_v24, %v5143_v6 }
 0x5fa   : > { %8765 = vst [vmem:[#allocation92_spill] sm:$0xff] %v6791_v51 }
 0x5fb   : > { %v2064_v50 = vpop.permute.xlu1 %2063  ;;  %v6826_v62 = vpack.c.bf16 %v2086_v49, %v2084_v55 }
 0x5fc   : > { %2276 = vmatpush1.bf16.msra.mxu1 %v6762_v26 }
 0x5fd   : > { %2277 = vmatprep.subr.bf16.mxu1 %v6767_v36  ;;  %v2094_v63 = vpop.permute.xlu0 %2093  ;;  %8768 = vst [vmem:[#allocation95_spill] sm:$0xff] %v6826_v62 }
 0x5ff   : > { %v2072_v52 = vpop.permute.xlu1 %2071 }
 0x600   : > { %2278 = vmatpush1.bf16.msra.mxu1 %v6781_v44  ;;  %v2077_v2 = vsel %vm780_vm5, %v2064_v50, %v2072_v52 }
 0x601   : > { %2279 = vmatprep.subr.bf16.mxu1 %v6784_v34  ;;  %v2042_v54 = vpop.permute.xlu0 %2041  ;;  %v2087_v24 = vmul.f32 %v2077_v2, %v5143_v6 }
 0x602   : > { %v2046_v57 = vsel %vm763_vm4, %v6660_v1, %v2042_v54  ;;  %v2050_v20 = vsel %vm763_vm4, %v2042_v54, %v6660_v1  ;;  %v2085_v54 = vmul.f32 %v2076_v45, %v5143_v6 }
 0x603   : > { %v2057_v8 = vmul.f32 %v2046_v57, %v5121_v47  ;;  %v2058_v4 = vmul.f32 %v2050_v20, %v5124_v48  ;;  %v2092_v58 = vpop.permute.xlu1 %2091  ;;  %v2081_v57 = vsel %vm780_vm5, %v2072_v52, %v2064_v50 }
 0x604   : > { %2280 = vmatpush1.bf16.msra.mxu1 %v6791_v51  ;;  %v6831_v31 = vpack.c.bf16 %v2085_v54, %v2083_v33 }
 0x605   : > { %v6816_v1 = vpack.c.bf16 %v2057_v8, %v2055_v10  ;;  %v2102_v22 = vpop.permute.xlu0 %2101  ;;  %v6818_v12 = vpack.c.bf16 %v2058_v4, %v2056_v53  ;;  %v2088_v53 = vmul.f32 %v2081_v57, %v5146_v7 }
 0x606   : > { %8769 = vst [vmem:[#allocation96_spill] sm:$0xff] %v6831_v31  ;;  %v2112_v50 = vsel %vm797_vm6, %v2102_v22, %v2094_v63  ;;  %v2108_v2 = vsel %vm797_vm6, %v2094_v63, %v2102_v22 }
 0x607   : > { %8766 = vst [vmem:[#allocation93_spill] sm:$0xff] %v6816_v1  ;;  %8767 = vst [vmem:[#allocation94_spill] sm:$0xff] %v6818_v12  ;;  %v2100_v3 = vpop.permute.xlu1 %2099  ;;  %2281 = vmatprep.subr.bf16.mxu1 %v6818_v12  ;;  %v2118_v54 = vmul.f32 %v2112_v50, %v8697_v32 }
 0x608   : > { %v2111_v10 = vsel %vm797_vm6, %v2100_v3, %v2092_v58  ;;  %2282 = vmatpush1.bf16.msra.mxu1 %v6816_v1  ;;  %v2107_v8 = vsel %vm797_vm6, %v2092_v58, %v2100_v3 }
 0x609   : > { %2283 = vmatprep.subr.bf16.mxu1 %v6826_v62  ;;  %v2074_v20 = vpop.permute.xlu0 %2073  ;;  %v2116_v4 = vmul.f32 %v2111_v10, %v8697_v32  ;;  %v2115_v58 = vmul.f32 %v2107_v8, %v8740_v5 }
 0x60a   : > { %v2078_v52 = vsel %vm780_vm5, %v2066_v35, %v2074_v20  ;;  %v2082_v55 = vsel %vm780_vm5, %v2074_v20, %v2066_v35 }
 0x60b   : > { %v2089_v45 = vmul.f32 %v2078_v52, %v5143_v6  ;;  %v2090_v49 = vmul.f32 %v2082_v55, %v5146_v7  ;;  %v2096_v33 = vpop.permute.xlu1 %2095  ;;  %v6857_v10 = vpack.c.bf16 %v2118_v54, %v2116_v4  ;;  %v2117_v52 = vmul.f32 %v2108_v2, %v8740_v5 }
 0x60c   : > { %2284 = vmatpush1.bf16.msra.mxu1 %v6831_v31 }
 0x60d   : > { %v6851_v57 = vpack.c.bf16 %v2089_v45, %v2087_v24  ;;  %v2098_v35 = vpop.permute.xlu0 %2097  ;;  %v6853_v20 = vpack.c.bf16 %v2090_v49, %v2088_v53  ;;  %8772 = vst [vmem:[#allocation99_spill] sm:$0xff] %v6857_v10  ;;  %v6866_v24 = vpack.c.bf16 %v2117_v52, %v2115_v58 }
 0x60f   : > { %8770 = vst [vmem:[#allocation97_spill] sm:$0xff] %v6851_v57  ;;  %8771 = vst [vmem:[#allocation98_spill] sm:$0xff] %v6853_v20  ;;  %v2104_v3 = vpop.permute.xlu1 %2103  ;;  %2285 = vmatprep.subr.bf16.mxu1 %v6853_v20 }
 0x610   : > { %v2109_v55 = vsel %vm797_vm6, %v2096_v33, %v2104_v3  ;;  %v2113_v63 = vsel %vm797_vm6, %v2104_v3, %v2096_v33  ;;  %2286 = vmatpush1.bf16.msra.mxu1 %v6851_v57  ;;  %8773 = vst [vmem:[#allocation100_spill] sm:$0xff] %v6866_v24  ;;  %v2968_v57 = vld [vmem:[%s8497_s12 + $0x18] sm:$0xff] }
 0x611   : > { %2287 = vmatprep.subr.bf16.mxu1 %v6857_v10  ;;  %v2106_v22 = vpop.permute.xlu0 %2105  ;;  %v2119_v8 = vmul.f32 %v2109_v55, %v8740_v5  ;;  %v2120_v4 = vmul.f32 %v2113_v63, %v8697_v32  ;;  %v4785_v63 = vld [vmem:[%s8493_s8 + $0x1c] ss:$12 sps:$4 sm:$0xff]  }
 0x612   : > { %v2110_v53 = vsel %vm797_vm6, %v2098_v35, %v2106_v22  ;;  %v2114_v50 = vsel %vm797_vm6, %v2106_v22, %v2098_v35  ;;  %v4782_v35 = vld [vmem:[%s8493_s8] ss:$12 sps:$4 sm:$0xff]  }
 0x613   : > { %v2121_v45 = vmul.f32 %v2110_v53, %v8740_v5  ;;  %v2122_v49 = vmul.f32 %v2114_v50, %v8697_v32  ;;  %v2124_v33 = vpop.permute.xlu1 %2123 }
 0x614   : > { %2288 = vmatpush1.bf16.msra.mxu1 %v6866_v24 }
 0x615   : > { %v6877_v2 = vpack.c.bf16 %v2121_v45, %v2119_v8  ;;  %v2126_v54 = vpop.permute.xlu0 %2125  ;;  %v6879_v58 = vpack.c.bf16 %v2122_v49, %v2120_v4 }
 0x617   : > { %8774 = vst [vmem:[#allocation101_spill] sm:$0xff] %v6877_v2  ;;  %8775 = vst [vmem:[#allocation102_spill] sm:$0xff] %v6879_v58  ;;  %v2132_v3 = vpop.permute.xlu1 %2131  ;;  %2289 = vmatprep.subr.bf16.mxu1 %v6879_v58 }
 0x618   : > { %v2139_v52 = vsel %vm814_vm7, %v2124_v33, %v2132_v3  ;;  %v2143_v55 = vsel %vm814_vm7, %v2132_v3, %v2124_v33  ;;  %2290 = vmatpush1.bf16.msra.mxu1 %v6877_v2 }
 0x619   : > { %v2134_v22 = vpop.permute.xlu0 %2133  ;;  %v2147_v8 = vmul.f32 %v6249_v15, %v2139_v52  ;;  %v2148_v4 = vmul.f32 %v6255_v11, %v2143_v55 }
 0x61a   : > { %v2140_v53 = vsel %vm814_vm7, %v2126_v54, %v2134_v22  ;;  %v2144_v50 = vsel %vm814_vm7, %v2134_v22, %v2126_v54  ;;  %v4787_v54 = vld [vmem:[%s8493_s8 + $0x18] ss:$12 sps:$4 sm:$0xff]  }
 0x61b   : > { %v2149_v45 = vmul.f32 %v6249_v15, %v2140_v53  ;;  %v2150_v49 = vmul.f32 %v6255_v11, %v2144_v50  ;;  %v2128_v33 = vpop.permute.xlu1 %2127  ;;  %2292 = vmatmul.mubr.bf16.vlgmr.msra.gmra.mrb[16].mxu1 %v4782_v35 }
 0x61c   : > { %2301 = vmatprep.mubr.bf16.mxu1 %v4785_v63 }
 0x61d   : > { %v6901_v3 = vpack.c.bf16 %v2149_v45, %v2147_v8  ;;  %v2130_v2 = vpop.permute.xlu0 %2129  ;;  %v6903_v58 = vpack.c.bf16 %v2150_v49, %v2148_v4 }
 0x61f   : > { %8776 = vst [vmem:[#allocation103_spill] sm:$0xff] %v6901_v3  ;;  %8777 = vst [vmem:[#allocation104_spill] sm:$0xff] %v6903_v58  ;;  %v2136_v24 = vpop.permute.xlu1 %2135  ;;  %2312 = vmatprep.subr.bf16.mxu1 %v6903_v58  ;;  %v2967_v58 = vld [vmem:[%s8497_s12 + $0x10] sm:$0xff] }
 0x620   : > { %v2141_v52 = vsel %vm814_vm7, %v2128_v33, %v2136_v24  ;;  %v2145_v55 = vsel %vm814_vm7, %v2136_v24, %v2128_v33  ;;  %2313 = vmatpush1.bf16.msra.mxu1 %v6901_v3 }
 0x621   : > { %v2138_v35 = vpop.permute.xlu0 %2137  ;;  %v2151_v53 = vmul.f32 %v6249_v15, %v2141_v52  ;;  %v2152_v50 = vmul.f32 %v6255_v11, %v2145_v55 }
 0x622   : > { %v2142_v63 = vsel %vm814_vm7, %v2130_v2, %v2138_v35  ;;  %v2146_v22 = vsel %vm814_vm7, %v2138_v35, %v2130_v2  ;;  %v4788_v2 = vld [vmem:[%s8493_s8 + $0x8] ss:$12 sps:$4 sm:$0xff]  }
 0x623   : > { %v2153_v8 = vmul.f32 %v6249_v15, %v2142_v63  ;;  %v2154_v4 = vmul.f32 %v6255_v11, %v2146_v22  ;;  %2302 = vmatmul.mubr.bf16.gmra.mrb[20].mxu1 %v4787_v54  ;;  %v4789_v15 = vld [vmem:[%s8493_s8 + $0x20] ss:$12 sps:$4 sm:$0xff]  }
 0x624   : > { %2344 = vmatprep.mubr.bf16.mxu1 %v8747_v43 }
 0x625   : > { %v6923_v24 = vpack.c.bf16 %v2153_v8, %v2151_v53  ;;  %v6925_v45 = vpack.c.bf16 %v2154_v4, %v2152_v50 }
 0x627   : > { %8778 = vst [vmem:[#allocation105_spill] sm:$0xff] %v6923_v24  ;;  %8779 = vst [vmem:[#allocation106_spill] sm:$0xff] %v6925_v45  ;;  %2314 = vmatprep.subr.bf16.mxu1 %v6925_v45  ;;  %v2966_v45 = vld [vmem:[%s8497_s12 + $0x8] sm:$0xff] }
 0x628   : > { %2315 = vmatpush1.bf16.msra.mxu1 %v6923_v24 }
 0x62b   : > { %4581 = vmatmul.mubr.msk.bf16.vlgmr.msra.gmra.mrb[16].mxu1 %vm1304_vm10, %v4788_v2 }
 0x62c   : > { %2354 = vmatprep.mubr.bf16.mxu1 %v8747_v43 }
 0x630   : > { %v2206_v11 = vpop.permute.xlu1 %2205 }
 0x632   : > { %v2211_v52 = vpop.permute.xlu0 %2210 }
 0x633   : > { %4582 = vmatmul.mubr.msk.bf16.gmra.mrb[20].mxu1 %vm1304_vm10, %v4789_v15 }
 0x6fe   : > { %v2346_v49 = vpop.f32.mrb[16].mxu1 }
 0x6ff   : > { %v4668_v33 = vadd.f32 %v2346_v49, %v2206_v11  ;;  %v2348_v54 = vpop.f32.mrb[17].mxu1 }
 0x700   : > { %v2350_v55 = vpop.f32.mrb[18].mxu1  ;;  %v4669_v15 = vadd.f32 %v2348_v54, %v2206_v11  ;;  %v2216_v11 = vpop.permute.xlu1 %2215 }
 0x701   : > { %v6938_v35 = vmax.f32 %v4668_v33, 0.0  ;;  %v4670_v63 = vadd.f32 %v2350_v55, %v2211_v52  ;;  %v2352_v22 = vpop.f32.mrb[19].mxu1 }
 0x702   : > { %v4671_v49 = vadd.f32 %v2352_v22, %v2211_v52  ;;  %v6960_v33 = vmax.f32 %v4669_v15, 0.0  ;;  %v2221_v52 = vpop.permute.xlu0 %2220 }
 0x703   : > { %v6940_v53 = vmax.f32 %v4670_v63, 0.0  ;;  %2373 = vrot.lane.b32.xlu1 %v6938_v35, %s8708_s0 }
 0x704   : > { %v6964_v55 = vmax.f32 %v4671_v49, 0.0 }
 0x705   : > { %2375 = vrot.lane.b32.xlu0 %v6940_v53, %s8708_s0 }
 0x706   : > { %v2356_v50 = vpop.f32.mrb[20].mxu1 }
 0x707   : > { %v2358_v8 = vpop.f32.mrb[21].mxu1  ;;  %2405 = vrot.lane.b32.xlu1 %v6938_v35, %s8709_s1  ;;  %v4672_v54 = vadd.f32 %v2356_v50, %v2216_v11 }
 0x708   : > { %v2360_v4 = vpop.f32.mrb[22].mxu1  ;;  %v4673_v50 = vadd.f32 %v2358_v8, %v2216_v11  ;;  %v4792_v8 = vld [vmem:[%s8496_s11 + $0x4] ss:$12 sps:$4 sm:$0xff]  }
 0x709   : > { %v2362_v2 = vpop.f32.mrb[23].mxu1  ;;  %2407 = vrot.lane.b32.xlu0 %v6940_v53, %s8709_s1  ;;  %v4674_v63 = vadd.f32 %v2360_v4, %v2221_v52  ;;  %v6980_v22 = vmax.f32 %v4672_v54, 0.0  ;;  %2749 = vmatprep.mubr.bf16.mxu0 %v4792_v8  ;;  %v2965_v8 = vld [vmem:[%s8497_s12] sm:$0xff] }
 0x70a   : > { %v4675_v4 = vadd.f32 %v2362_v2, %v2221_v52  ;;  %v7000_v49 = vmax.f32 %v4673_v50, 0.0 }
 0x70b   : > { %2437 = vrot.lane.b32.xlu1 %v6938_v35, %s8661_s28  ;;  %v6984_v15 = vmax.f32 %v4674_v63, 0.0 }
 0x70c   : > { %v7004_v54 = vmax.f32 %v4675_v4, 0.0 }
 0x70d   : > { %2439 = vrot.lane.b32.xlu0 %v6940_v53, %s8661_s28 }
 0x70f   : > { %2469 = vrot.lane.b32.xlu1 %v6938_v35, %s8662_s23 }
 0x711   : > { %2471 = vrot.lane.b32.xlu0 %v6940_v53, %s8662_s23 }
 0x713   : > { %2501 = vrot.lane.b32.xlu1 %v6938_v35, %s8663_s26 }
 0x715   : > { %2503 = vrot.lane.b32.xlu0 %v6940_v53, %s8663_s26 }
 0x717   : > { %2381 = vrot.lane.b32.xlu1 %v6960_v33, %s8708_s0 }
 0x719   : > { %2383 = vrot.lane.b32.xlu0 %v6964_v55, %s8708_s0 }
 0x71b   : > { %2413 = vrot.lane.b32.xlu1 %v6960_v33, %s8709_s1 }
 0x71d   : > { %2415 = vrot.lane.b32.xlu0 %v6964_v55, %s8709_s1 }
 0x71f   : > { %2445 = vrot.lane.b32.xlu1 %v6960_v33, %s8661_s28 }
 0x721   : > { %2447 = vrot.lane.b32.xlu0 %v6964_v55, %s8661_s28 }
 0x723   : > { %2477 = vrot.lane.b32.xlu1 %v6960_v33, %s8662_s23 }
 0x725   : > { %2479 = vrot.lane.b32.xlu0 %v6964_v55, %s8662_s23 }
 0x727   : > { %2377 = vrot.lane.b32.xlu1 %v6980_v22, %s8708_s0 }
 0x729   : > { %2379 = vrot.lane.b32.xlu0 %v6984_v15, %s8708_s0 }
 0x72b   : > { %2409 = vrot.lane.b32.xlu1 %v6980_v22, %s8709_s1 }
 0x72d   : > { %2411 = vrot.lane.b32.xlu0 %v6984_v15, %s8709_s1 }
 0x72f   : > { %2441 = vrot.lane.b32.xlu1 %v6980_v22, %s8661_s28 }
 0x731   : > { %2443 = vrot.lane.b32.xlu0 %v6984_v15, %s8661_s28 }
 0x733   : > { %2473 = vrot.lane.b32.xlu1 %v6980_v22, %s8662_s23 }
 0x735   : > { %2475 = vrot.lane.b32.xlu0 %v6984_v15, %s8662_s23 }
 0x737   : > { %2385 = vrot.lane.b32.xlu1 %v7000_v49, %s8708_s0 }
 0x739   : > { %2387 = vrot.lane.b32.xlu0 %v7004_v54, %s8708_s0 }
 0x73b   : > { %2509 = vrot.lane.b32.xlu1 %v6960_v33, %s8663_s26 }
 0x73d   : > { %2511 = vrot.lane.b32.xlu0 %v6964_v55, %s8663_s26 }
 0x73f   : > { %2417 = vrot.lane.b32.xlu1 %v7000_v49, %s8709_s1 }
 0x741   : > { %2419 = vrot.lane.b32.xlu0 %v7004_v54, %s8709_s1 }
 0x743   : > { %2449 = vrot.lane.b32.xlu1 %v7000_v49, %s8661_s28 }
 0x745   : > { %2507 = vrot.lane.b32.xlu0 %v6984_v15, %s8663_s26 }
 0x747   : > { %2481 = vrot.lane.b32.xlu1 %v7000_v49, %s8662_s23 }
 0x749   : > { %2451 = vrot.lane.b32.xlu0 %v7004_v54, %s8661_s28 }
 0x74b   : > { %2505 = vrot.lane.b32.xlu1 %v6980_v22, %s8663_s26 }
 0x74d   : > { %2535 = vrot.lane.b32.xlu0 %v6940_v53, %s8664_s5 }
 0x74f   : > { %2513 = vrot.lane.b32.xlu1 %v7000_v49, %s8663_s26 }
 0x751   : > { %2483 = vrot.lane.b32.xlu0 %v7004_v54, %s8662_s23 }
 0x753   : > { %2533 = vrot.lane.b32.xlu1 %v6938_v35, %s8664_s5 }
 0x755   : > { %2543 = vrot.lane.b32.xlu0 %v6964_v55, %s8664_s5 }
 0x757   : > { %2541 = vrot.lane.b32.xlu1 %v6960_v33, %s8664_s5 }
 0x759   : > { %2539 = vrot.lane.b32.xlu0 %v6984_v15, %s8664_s5 }
 0x75b   : > { %2537 = vrot.lane.b32.xlu1 %v6980_v22, %s8664_s5 }
 0x75d   : > { %2567 = vrot.lane.b32.xlu0 %v6940_v53, %s8665_s30 }
 0x75f   : > { %2545 = vrot.lane.b32.xlu1 %v7000_v49, %s8664_s5 }
 0x761   : > { %2515 = vrot.lane.b32.xlu0 %v7004_v54, %s8663_s26 }
 0x763   : > { %2565 = vrot.lane.b32.xlu1 %v6938_v35, %s8665_s30 }
 0x765   : > { %2575 = vrot.lane.b32.xlu0 %v6964_v55, %s8665_s30 }
 0x767   : > { %2573 = vrot.lane.b32.xlu1 %v6960_v33, %s8665_s30 }
 0x769   : > { %2547 = vrot.lane.b32.xlu0 %v7004_v54, %s8664_s5 }
 0x76b   : > { %2569 = vrot.lane.b32.xlu1 %v6980_v22, %s8665_s30 }
 0x76d   : > { %2571 = vrot.lane.b32.xlu0 %v6984_v15, %s8665_s30 }
 0x76f   : > { %2577 = vrot.lane.b32.xlu1 %v7000_v49, %s8665_s30 }
 0x771   : > { %2579 = vrot.lane.b32.xlu0 %v7004_v54, %s8665_s30 }
 0x773   : > { %2597 = vrot.lane.b32.xlu1 %v6938_v35, %s4872_s24 }
 0x775   : > { %v2374_v2 = vpop.permute.xlu1 %2373  ;;  %2599 = vrot.lane.b32.xlu0 %v6940_v53, %s4872_s24 }
 0x777   : > { %2605 = vrot.lane.b32.xlu1 %v6960_v33, %s4872_s24  ;;  %v2376_v11 = vpop.permute.xlu0 %2375 }
 0x779   : > { %v7075_v52 = vpop.permute.xlu1 %2405  ;;  %2607 = vrot.lane.b32.xlu0 %v6964_v55, %s4872_s24 }
 0x77b   : > { %2601 = vrot.lane.b32.xlu1 %v6980_v22, %s4872_s24  ;;  %v2408_v63 = vpop.permute.xlu0 %2407 }
 0x77d   : > { %v7081_v50 = vpop.permute.xlu1 %2437  ;;  %2603 = vrot.lane.b32.xlu0 %v6984_v15, %s4872_s24 }
 0x77f   : > { %2609 = vrot.lane.b32.xlu1 %v7000_v49, %s4872_s24  ;;  %v7087_v4 = vpop.permute.xlu0 %2439 }
 0x781   : > { %v7092_v24 = vpop.permute.xlu1 %2469  ;;  %2611 = vrot.lane.b32.xlu0 %v7004_v54, %s4872_s24 }
 0x783   : > { %2971 = vperm.xlu1 %4763, %v2965_v8   ;;  %v7099_v3 = vpop.permute.xlu0 %2471 }
 0x785   : > { %v7104_v10 = vpop.permute.xlu1 %2501  ;;  %2976 = vperm.xlu0 %4762, %v2966_v45  }
 0x787   : > { %2981 = vperm.xlu1 %4763, %v2967_v58   ;;  %v7109_v20 = vpop.permute.xlu0 %2503 }
 0x789   : > { %v2382_v31 = vpop.permute.xlu1 %2381  ;;  %2986 = vperm.xlu0 %4762, %v2968_v57  }
 0x78a   : > { %v2389_v8 = vsel %vm695_vm1, %v2374_v2, %v2382_v31  ;;  %v2393_v62 = vsel %vm695_vm1, %v2382_v31, %v2374_v2 }
 0x78b   : > { %v2384_v1 = vpop.permute.xlu0 %2383  ;;  %v2397_v51 = vmul.f32 %v2393_v62, %v5077_v18  ;;  %v2398_v58 = vmul.f32 %v2389_v8, %v5071_v16 }
 0x78c   : > { %v2390_v12 = vsel %vm695_vm1, %v2376_v11, %v2384_v1  ;;  %v2394_v45 = vsel %vm695_vm1, %v2384_v1, %v2376_v11 }
 0x78d   : > { %v2399_v34 = vmul.f32 %v2394_v45, %v5077_v18  ;;  %v2400_v57 = vmul.f32 %v2390_v12, %v5071_v16  ;;  %v2414_v44 = vpop.permute.xlu1 %2413 }
 0x78f   : > { %v2629_v36 = vpack.c.bf16 %v2399_v34, %v2397_v51  ;;  %v2416_v26 = vpop.permute.xlu0 %2415  ;;  %v2630_v46 = vpack.c.bf16 %v2400_v57, %v2398_v58  ;;  %v2421_v57 = vsel %vm712_vm0, %v7075_v52, %v2414_v44 }
 0x790   : > { %v2426_v0 = vsel %vm712_vm0, %v2416_v26, %v2408_v63 }
 0x791   : > { %v2446_v31 = vpop.permute.xlu1 %2445  ;;  %2717 = vmatprep.subr.bf16.mxu0 %v2630_v46  ;;  %v2422_v46 = vsel %vm712_vm0, %v2408_v63, %v2416_v26  ;;  %v2425_v26 = vsel %vm712_vm0, %v2414_v44, %v7075_v52  ;;  %v2430_v63 = vmul.f32 %v2421_v57, %v5074_v17 }
 0x792   : > { %2718 = vmatpush1.bf16.msra.mxu0 %v2629_v36  ;;  %v2432_v27 = vmul.f32 %v2422_v46, %v5074_v17  ;;  %v2431_v46 = vmul.f32 %v2426_v0, %v5080_v19 }
 0x793   : > { %v2448_v2 = vpop.permute.xlu0 %2447 }
 0x794   : > { %v2458_v57 = vsel %vm729_vm2, %v2448_v2, %v7087_v4 }
 0x795   : > { %v7123_v23 = vpop.permute.xlu1 %2477 }
 0x797   : > { %v7125_v60 = vpop.permute.xlu0 %2479 }
 0x799   : > { %v2378_v1 = vpop.permute.xlu1 %2377 }
 0x79b   : > { %v2380_v62 = vpop.permute.xlu0 %2379 }
 0x79d   : > { %v2410_v11 = vpop.permute.xlu1 %2409 }
 0x79f   : > { %v2412_v8 = vpop.permute.xlu0 %2411 }
 0x7a1   : > { %v2442_v25 = vpop.permute.xlu1 %2441 }
 0x7a3   : > { %v7127_v45 = vpop.permute.xlu0 %2443 }
 0x7a5   : > { %v7129_v12 = vpop.permute.xlu1 %2473 }
 0x7a7   : > { %v7131_v34 = vpop.permute.xlu0 %2475 }
 0x7a9   : > { %v2386_v36 = vpop.permute.xlu1 %2385 }
 0x7aa   : > { %v2391_v51 = vsel %vm695_vm1, %v2378_v1, %v2386_v36  ;;  %v2395_v58 = vsel %vm695_vm1, %v2386_v36, %v2378_v1 }
 0x7ab   : > { %v2388_v21 = vpop.permute.xlu0 %2387  ;;  %v2401_v29 = vmul.f32 %v2395_v58, %v5077_v18  ;;  %v2402_v1 = vmul.f32 %v2391_v51, %v5071_v16  ;;  %v2429_v51 = vmul.f32 %v2425_v26, %v5080_v19  ;;  %v2634_v58 = vpack.c.bf16 %v2432_v27, %v2430_v63 }
 0x7ac   : > { %v2392_v30 = vsel %vm695_vm1, %v2380_v62, %v2388_v21  ;;  %v2396_v56 = vsel %vm695_vm1, %v2388_v21, %v2380_v62 }
 0x7ad   : > { %v2403_v36 = vmul.f32 %v2396_v56, %v5077_v18  ;;  %v2404_v41 = vmul.f32 %v2392_v30, %v5071_v16  ;;  %v7153_v14 = vpop.permute.xlu1 %2509  ;;  %v2454_v56 = vsel %vm729_vm2, %v7087_v4, %v2448_v2  ;;  %v2457_v4 = vsel %vm729_vm2, %v2446_v31, %v7081_v50 }
 0x7ae   : > { %v2464_v27 = vmul.f32 %v2454_v56, %v5103_v38 }
 0x7af   : > { %v2631_v42 = vpack.c.bf16 %v2403_v36, %v2401_v29  ;;  %v7160_v21 = vpop.permute.xlu0 %2511  ;;  %v2632_v62 = vpack.c.bf16 %v2404_v41, %v2402_v1  ;;  %v2633_v29 = vpack.c.bf16 %v2431_v46, %v2429_v51  ;;  %v2453_v41 = vsel %vm729_vm2, %v7081_v50, %v2446_v31 }
 0x7b0   : > { %v2462_v2 = vmul.f32 %v2453_v41, %v5103_v38  ;;  %v2485_v41 = vsel %vm746_vm3, %v7092_v24, %v7123_v23 }
 0x7b1   : > { %v2418_v30 = vpop.permute.xlu1 %2417  ;;  %2719 = vmatprep.subr.bf16.mxu0 %v2632_v62  ;;  %v2463_v62 = vmul.f32 %v2458_v57, %v5100_v37  ;;  %v2490_v57 = vsel %vm746_vm3, %v7125_v60, %v7099_v3 }
 0x7b2   : > { %v2423_v44 = vsel %vm712_vm0, %v2410_v11, %v2418_v30  ;;  %v2427_v52 = vsel %vm712_vm0, %v2418_v30, %v2410_v11  ;;  %2720 = vmatpush1.bf16.msra.mxu0 %v2631_v42  ;;  %v2461_v30 = vmul.f32 %v2457_v4, %v5100_v37 }
 0x7b3   : > { %2721 = vmatprep.subr.bf16.mxu0 %v2634_v58  ;;  %v2420_v0 = vpop.permute.xlu0 %2419  ;;  %v2433_v42 = vmul.f32 %v2427_v52, %v5080_v19  ;;  %v2434_v36 = vmul.f32 %v2423_v44, %v5074_v17  ;;  %v2486_v58 = vsel %vm746_vm3, %v7099_v3, %v7125_v60  ;;  %v2638_v52 = vpack.c.bf16 %v2464_v27, %v2462_v2 }
 0x7b4   : > { %v2424_v1 = vsel %vm712_vm0, %v2412_v8, %v2420_v0  ;;  %v2428_v11 = vsel %vm712_vm0, %v2420_v0, %v2412_v8  ;;  %v2496_v27 = vmul.f32 %v2486_v58, %v5109_v40  ;;  %v2489_v60 = vsel %vm746_vm3, %v7123_v23, %v7092_v24 }
 0x7b5   : > { %v2435_v26 = vmul.f32 %v2428_v11, %v5080_v19  ;;  %v2436_v63 = vmul.f32 %v2424_v1, %v5074_v17  ;;  %v2450_v46 = vpop.permute.xlu1 %2449  ;;  %v2494_v3 = vmul.f32 %v2485_v41, %v5109_v40  ;;  %v2495_v2 = vmul.f32 %v2490_v57, %v5106_v39 }
 0x7b6   : > { %2722 = vmatpush1.bf16.msra.mxu0 %v2633_v29  ;;  %v2455_v50 = vsel %vm729_vm2, %v2442_v25, %v2450_v46  ;;  %v2459_v31 = vsel %vm729_vm2, %v2450_v46, %v2442_v25  ;;  %v2637_v29 = vpack.c.bf16 %v2463_v62, %v2461_v30 }
 0x7b7   : > { %v2635_v51 = vpack.c.bf16 %v2435_v26, %v2433_v42  ;;  %v7190_v8 = vpop.permute.xlu0 %2507  ;;  %v2636_v56 = vpack.c.bf16 %v2436_v63, %v2434_v36  ;;  %v2465_v11 = vmul.f32 %v2459_v31, %v5100_v37  ;;  %v2466_v42 = vmul.f32 %v2455_v50, %v5103_v38 }
 0x7b9   : > { %v2482_v44 = vpop.permute.xlu1 %2481  ;;  %2723 = vmatprep.subr.bf16.mxu0 %v2636_v56  ;;  %v2493_v56 = vmul.f32 %v2489_v60, %v5106_v39  ;;  %v2648_v60 = vpack.c.bf16 %v7004_v54, %v7000_v49 }
 0x7ba   : > { %2724 = vmatpush1.bf16.msra.mxu0 %v2635_v51  ;;  %v2642_v51 = vpack.c.bf16 %v2496_v27, %v2494_v3  ;;  %v2487_v30 = vsel %vm746_vm3, %v7129_v12, %v2482_v44  ;;  %v2491_v23 = vsel %vm746_vm3, %v2482_v44, %v7129_v12  ;;  %v2517_v3 = vsel %vm763_vm4, %v7104_v10, %v7153_v14 }
 0x7bb   : > { %2725 = vmatprep.subr.bf16.mxu0 %v2638_v52  ;;  %v2452_v0 = vpop.permute.xlu0 %2451  ;;  %v2641_v58 = vpack.c.bf16 %v2495_v2, %v2493_v56  ;;  %v2497_v31 = vmul.f32 %v2491_v23, %v5106_v39  ;;  %v2525_v49 = vmul.f32 %v2517_v3, %v5121_v47 }
 0x7bc   : > { %v2456_v25 = vsel %vm729_vm2, %v7127_v45, %v2452_v0  ;;  %v2460_v1 = vsel %vm729_vm2, %v2452_v0, %v7127_v45 }
 0x7bd   : > { %v2467_v36 = vmul.f32 %v2460_v1, %v5100_v37  ;;  %v2468_v26 = vmul.f32 %v2456_v25, %v5103_v38  ;;  %v2506_v63 = vpop.permute.xlu1 %2505  ;;  %v2646_v1 = vpack.c.bf16 %v6964_v55, %v6960_v33  ;;  %v2645_v33 = vpack.c.bf16 %v6940_v53, %v6938_v35 }
 0x7be   : > { %2726 = vmatpush1.bf16.msra.mxu0 %v2637_v29  ;;  %v2498_v29 = vmul.f32 %v2487_v30, %v5109_v40  ;;  %v2647_v53 = vpack.c.bf16 %v6984_v15, %v6980_v22 }
 0x7bf   : > { %v2639_v46 = vpack.c.bf16 %v2467_v36, %v2465_v11  ;;  %v7225_v4 = vpop.permute.xlu0 %2535  ;;  %v2640_v45 = vpack.c.bf16 %v2468_v26, %v2466_v42  ;;  %v2521_v42 = vsel %vm763_vm4, %v7153_v14, %v7104_v10  ;;  %v2518_v36 = vsel %vm763_vm4, %v7109_v20, %v7160_v21 }
 0x7c1   : > { %v2514_v62 = vpop.permute.xlu1 %2513  ;;  %2727 = vmatprep.subr.bf16.mxu0 %v2640_v45  ;;  %v2527_v45 = vmul.f32 %v2518_v36, %v5121_v47 }
 0x7c2   : > { %2728 = vmatpush1.bf16.msra.mxu0 %v2639_v46  ;;  %v2526_v46 = vmul.f32 %v2521_v42, %v5124_v48  ;;  %v2519_v35 = vsel %vm763_vm4, %v2506_v63, %v2514_v62  ;;  %v2523_v14 = vsel %vm763_vm4, %v2514_v62, %v2506_v63 }
 0x7c3   : > { %2729 = vmatprep.subr.bf16.mxu0 %v2642_v51  ;;  %v2484_v24 = vpop.permute.xlu0 %2483  ;;  %v2649_v2 = vpack.c.bf16 %v2527_v45, %v2525_v49  ;;  %v2529_v51 = vmul.f32 %v2519_v35, %v5121_v47  ;;  %v2530_v30 = vmul.f32 %v2523_v14, %v5124_v48 }
 0x7c4   : > { %v2488_v52 = vsel %vm746_vm3, %v7131_v34, %v2484_v24  ;;  %v2492_v50 = vsel %vm746_vm3, %v2484_v24, %v7131_v34  ;;  %v2522_v34 = vsel %vm763_vm4, %v7160_v21, %v7109_v20 }
 0x7c5   : > { %v2499_v41 = vmul.f32 %v2492_v50, %v5106_v39  ;;  %v2500_v12 = vmul.f32 %v2488_v52, %v5109_v40  ;;  %v2534_v44 = vpop.permute.xlu1 %2533  ;;  %v2528_v55 = vmul.f32 %v2522_v34, %v5124_v48 }
 0x7c6   : > { %2730 = vmatpush1.bf16.msra.mxu0 %v2641_v58 }
 0x7c7   : > { %v2643_v0 = vpack.c.bf16 %v2499_v41, %v2497_v31  ;;  %v2544_v57 = vpop.permute.xlu0 %2543  ;;  %v2644_v27 = vpack.c.bf16 %v2500_v12, %v2498_v29  ;;  %v2650_v21 = vpack.c.bf16 %v2528_v55, %v2526_v46 }
 0x7c8   : > { %v2554_v22 = vsel %vm780_vm5, %v2544_v57, %v7225_v4  ;;  %v2550_v50 = vsel %vm780_vm5, %v7225_v4, %v2544_v57 }
 0x7c9   : > { %v2542_v25 = vpop.permute.xlu1 %2541  ;;  %2731 = vmatprep.subr.bf16.mxu0 %v2644_v27  ;;  %v2560_v31 = vmul.f32 %v2554_v22, %v5146_v7 }
 0x7ca   : > { %2732 = vmatpush1.bf16.msra.mxu0 %v2643_v0  ;;  %v2553_v10 = vsel %vm780_vm5, %v2542_v25, %v2534_v44  ;;  %v2549_v15 = vsel %vm780_vm5, %v2534_v44, %v2542_v25  ;;  %v2559_v0 = vmul.f32 %v2550_v50, %v5143_v6 }
 0x7cb   : > { %2733 = vmatprep.subr.bf16.mxu0 %v2646_v1  ;;  %v2540_v11 = vpop.permute.xlu0 %2539  ;;  %v2558_v23 = vmul.f32 %v2553_v10, %v5146_v7  ;;  %v2557_v29 = vmul.f32 %v2549_v15, %v5143_v6 }
 0x7cd   : > { %v2538_v26 = vpop.permute.xlu1 %2537  ;;  %v2654_v1 = vpack.c.bf16 %v2560_v31, %v2558_v23  ;;  %v2653_v57 = vpack.c.bf16 %v2559_v0, %v2557_v29  ;;  %v4793_v0 = vld [vmem:[%s8496_s11 + $0x1c] ss:$12 sps:$4 sm:$0xff]  }
 0x7ce   : > { %2734 = vmatpush1.bf16.msra.mxu0 %v2645_v33 }
 0x7cf   : > { %2735 = vmatprep.subr.bf16.mxu0 %v2648_v60  ;;  %v2568_v20 = vpop.permute.xlu0 %2567 }
 0x7d1   : > { %v2546_v54 = vpop.permute.xlu1 %2545 }
 0x7d2   : > { %2736 = vmatpush1.bf16.msra.mxu0 %v2647_v53  ;;  %v2551_v44 = vsel %vm780_vm5, %v2538_v26, %v2546_v54  ;;  %v2555_v27 = vsel %vm780_vm5, %v2546_v54, %v2538_v26 }
 0x7d3   : > { %2737 = vmatprep.subr.bf16.mxu0 %v2650_v21  ;;  %v2516_v56 = vpop.permute.xlu0 %2515  ;;  %v2561_v34 = vmul.f32 %v2551_v44, %v5143_v6  ;;  %v2562_v36 = vmul.f32 %v2555_v27, %v5146_v7 }
 0x7d4   : > { %v2520_v63 = vsel %vm763_vm4, %v7190_v8, %v2516_v56  ;;  %v2524_v62 = vsel %vm763_vm4, %v2516_v56, %v7190_v8 }
 0x7d5   : > { %v2531_v24 = vmul.f32 %v2520_v63, %v5121_v47  ;;  %v2532_v58 = vmul.f32 %v2524_v62, %v5124_v48  ;;  %v2566_v52 = vpop.permute.xlu1 %2565 }
 0x7d6   : > { %2738 = vmatpush1.bf16.msra.mxu0 %v2649_v2 }
 0x7d7   : > { %v2651_v41 = vpack.c.bf16 %v2531_v24, %v2529_v51  ;;  %v2576_v8 = vpop.permute.xlu0 %2575  ;;  %v2652_v12 = vpack.c.bf16 %v2532_v58, %v2530_v30 }
 0x7d8   : > { %v2586_v33 = vsel %vm797_vm6, %v2576_v8, %v2568_v20  ;;  %v2582_v53 = vsel %vm797_vm6, %v2568_v20, %v2576_v8  ;;  %v4790_v8 = vld [vmem:[%s8496_s11] ss:$12 sps:$4 sm:$0xff]  }
 0x7d9   : > { %v2574_v25 = vpop.permute.xlu1 %2573  ;;  %2739 = vmatprep.subr.bf16.mxu0 %v2652_v12  ;;  %v2592_v49 = vmul.f32 %v2586_v33, %v8697_v32  ;;  %v2591_v51 = vmul.f32 %v2582_v53, %v8740_v5 }
 0x7da   : > { %v2585_v4 = vsel %vm797_vm6, %v2574_v25, %v2566_v52  ;;  %2740 = vmatpush1.bf16.msra.mxu0 %v2651_v41  ;;  %v2581_v60 = vsel %vm797_vm6, %v2566_v52, %v2574_v25 }
 0x7db   : > { %2741 = vmatprep.subr.bf16.mxu0 %v2654_v1  ;;  %v2548_v42 = vpop.permute.xlu0 %2547  ;;  %v2590_v3 = vmul.f32 %v2585_v4, %v8697_v32  ;;  %v7354_v4 = vld [vmem:[%s8656_s27 + $0x10] ss:$0 sm:$0xff] }
 0x7dc   : > { %v2552_v55 = vsel %vm780_vm5, %v2540_v11, %v2548_v42  ;;  %v2556_v26 = vsel %vm780_vm5, %v2548_v42, %v2540_v11  ;;  %v2589_v11 = vmul.f32 %v2581_v60, %v8740_v5 }
 0x7dd   : > { %v2563_v46 = vmul.f32 %v2552_v55, %v5143_v6  ;;  %v2564_v45 = vmul.f32 %v2556_v26, %v5146_v7  ;;  %v2570_v35 = vpop.permute.xlu1 %2569  ;;  %v2658_v2 = vpack.c.bf16 %v2592_v49, %v2590_v3 }
 0x7de   : > { %2742 = vmatpush1.bf16.msra.mxu0 %v2653_v57  ;;  %v2657_v15 = vpack.c.bf16 %v2591_v51, %v2589_v11 }
 0x7df   : > { %v2655_v54 = vpack.c.bf16 %v2563_v46, %v2561_v34  ;;  %v2572_v21 = vpop.permute.xlu0 %2571  ;;  %v2656_v14 = vpack.c.bf16 %v2564_v45, %v2562_v36  ;;  %v7360_v34 = vld [vmem:[%s8656_s27 + $0x18] ss:$0 sm:$0xff] }
 0x7e0   : > { %v4795_v45 = vld [vmem:[%s8496_s11 + $0x18] ss:$12 sps:$4 sm:$0xff]  }
 0x7e1   : > { %v2578_v10 = vpop.permute.xlu1 %2577  ;;  %2743 = vmatprep.subr.bf16.mxu0 %v2656_v14 }
 0x7e2   : > { %v2583_v56 = vsel %vm797_vm6, %v2570_v35, %v2578_v10  ;;  %v2587_v22 = vsel %vm797_vm6, %v2578_v10, %v2570_v35  ;;  %2744 = vmatpush1.bf16.msra.mxu0 %v2655_v54 }
 0x7e3   : > { %2745 = vmatprep.subr.bf16.mxu0 %v2658_v2  ;;  %v2580_v20 = vpop.permute.xlu0 %2579  ;;  %v2593_v30 = vmul.f32 %v2583_v56, %v8740_v5  ;;  %v2594_v23 = vmul.f32 %v2587_v22, %v8697_v32  ;;  %v4796_v22 = vld [vmem:[%s8496_s11 + $0x8] ss:$12 sps:$4 sm:$0xff]  }
 0x7e4   : > { %v2584_v63 = vsel %vm797_vm6, %v2572_v21, %v2580_v20  ;;  %v2588_v62 = vsel %vm797_vm6, %v2580_v20, %v2572_v21  ;;  %v4797_v20 = vld [vmem:[%s8496_s11 + $0x20] ss:$12 sps:$4 sm:$0xff]  }
 0x7e5   : > { %v2595_v24 = vmul.f32 %v2584_v63, %v8740_v5  ;;  %v2596_v58 = vmul.f32 %v2588_v62, %v8697_v32  ;;  %v2598_v52 = vpop.permute.xlu1 %2597  ;;  %v8780_v63 = vld [vmem:[#allocation75_spill] sm:$0xff] }
 0x7e6   : > { %2746 = vmatpush1.bf16.msra.mxu0 %v2657_v15  ;;  %v4800_v15 = vld [vmem:[%s8495_s10 + $0x4] ss:$12 sps:$4 sm:$0xff]  }
 0x7e7   : > { %v2659_v50 = vpack.c.bf16 %v2595_v24, %v2593_v30  ;;  %v2600_v31 = vpop.permute.xlu0 %2599  ;;  %v2660_v29 = vpack.c.bf16 %v2596_v58, %v2594_v23  ;;  %v8784_v62 = vld [vmem:[#allocation79_spill] sm:$0xff]  ;;  %v8785_v30 = vld [vmem:[#allocation80_spill] sm:$0xff]  ;;  %v8787_v23 = vld [vmem:[#allocation81_spill] sm:$0xff] }
 0x7e8   : > { %v8788_v24 = vld [vmem:[#allocation83_spill] sm:$0xff]  ;;  %v8789_v58 = vld [vmem:[#allocation84_spill] sm:$0xff] }
 0x7e9   : > { %v2606_v41 = vpop.permute.xlu1 %2605  ;;  %2747 = vmatprep.subr.bf16.mxu0 %v2660_v29  ;;  %v8793_v29 = vld [vmem:[#allocation88_spill] sm:$0xff] }
 0x7ea   : > { %v2613_v12 = vsel %vm814_vm7, %v2598_v52, %v2606_v41  ;;  %v2617_v44 = vsel %vm814_vm7, %v2606_v41, %v2598_v52  ;;  %2748 = vmatpush1.bf16.msra.mxu0 %v2659_v50  ;;  %v8790_v52 = vld [vmem:[#allocation86_spill] sm:$0xff]  ;;  %v8791_v50 = vld [vmem:[#allocation85_spill] sm:$0xff] }
 0x7eb   : > { %v2608_v27 = vpop.permute.xlu0 %2607  ;;  %v2621_v57 = vmul.f32 %v7354_v4, %v2613_v12  ;;  %v2622_v42 = vmul.f32 %v7360_v34, %v2617_v44  ;;  %v8794_v41 = vld [vmem:[#allocation89_spill] sm:$0xff]  ;;  %v8796_v12 = vld [vmem:[#allocation91_spill] sm:$0xff]  ;;  %v8797_v44 = vld [vmem:[#allocation92_spill] sm:$0xff] }
 0x7ec   : > { %v2614_v25 = vsel %vm814_vm7, %v2600_v31, %v2608_v27  ;;  %v2618_v1 = vsel %vm814_vm7, %v2608_v27, %v2600_v31  ;;  %v8792_v31 = vld [vmem:[#allocation87_spill] sm:$0xff]  ;;  %v8799_v27 = vld [vmem:[#allocation93_spill] sm:$0xff] }
 0x7ed   : > { %v2623_v36 = vmul.f32 %v7354_v4, %v2614_v25  ;;  %v2624_v33 = vmul.f32 %v7360_v34, %v2618_v1  ;;  %v2602_v55 = vpop.permute.xlu1 %2601  ;;  %2750 = vmatmul.mubr.bf16.vlgmr.msra.gmra.mrb[24].mxu0 %v4790_v8  ;;  %v8795_v8 = vld [vmem:[#allocation90_spill] sm:$0xff]  ;;  %v8800_v25 = vld [vmem:[#allocation95_spill] sm:$0xff]  ;;  %v8801_v1 = vld [vmem:[#allocation96_spill] sm:$0xff] }
 0x7ee   : > { %2759 = vmatprep.mubr.bf16.mxu0 %v4793_v0  ;;  %v8798_v0 = vld [vmem:[#allocation94_spill] sm:$0xff] }
 0x7ef   : > { %v2661_v26 = vpack.c.bf16 %v2623_v36, %v2621_v57  ;;  %v2604_v60 = vpop.permute.xlu0 %2603  ;;  %v2662_v3 = vpack.c.bf16 %v2624_v33, %v2622_v42  ;;  %v8802_v57 = vld [vmem:[#allocation98_spill] sm:$0xff]  ;;  %v8803_v42 = vld [vmem:[#allocation97_spill] sm:$0xff]  ;;  %v8804_v36 = vld [vmem:[#allocation99_spill] sm:$0xff] }
 0x7f0   : > { %v8805_v33 = vld [vmem:[#allocation100_spill] sm:$0xff] }
 0x7f1   : > { %v2610_v46 = vpop.permute.xlu1 %2609  ;;  %2770 = vmatprep.subr.bf16.mxu0 %v2662_v3  ;;  %v4801_v3 = vld [vmem:[%s8495_s10 + $0x1c] ss:$12 sps:$4 sm:$0xff]  }
 0x7f2   : > { %v2615_v35 = vsel %vm814_vm7, %v2602_v55, %v2610_v46  ;;  %v2619_v53 = vsel %vm814_vm7, %v2610_v46, %v2602_v55  ;;  %2771 = vmatpush1.bf16.msra.mxu0 %v2661_v26  ;;  %v8806_v55 = vld [vmem:[#allocation102_spill] sm:$0xff]  ;;  %v4798_v26 = vld [vmem:[%s8495_s10] ss:$12 sps:$4 sm:$0xff]  }
 0x7f3   : > { %v2612_v49 = vpop.permute.xlu0 %2611  ;;  %v2625_v14 = vmul.f32 %v7354_v4, %v2615_v35  ;;  %v2626_v11 = vmul.f32 %v7360_v34, %v2619_v53  ;;  %v8808_v46 = vld [vmem:[#allocation104_spill] sm:$0xff]  ;;  %v8810_v35 = vld [vmem:[#allocation106_spill] sm:$0xff] }
 0x7f4   : > { %v2616_v54 = vsel %vm814_vm7, %v2604_v60, %v2612_v49  ;;  %v2620_v21 = vsel %vm814_vm7, %v2612_v49, %v2604_v60  ;;  %v8807_v60 = vld [vmem:[#allocation101_spill] sm:$0xff]  ;;  %v4803_v53 = vld [vmem:[%s8495_s10 + $0x18] ss:$12 sps:$4 sm:$0xff]  }
 0x7f5   : > { %v2627_v10 = vmul.f32 %v7354_v4, %v2616_v54  ;;  %v2628_v2 = vmul.f32 %v7360_v34, %v2620_v21  ;;  %2760 = vmatmul.mubr.bf16.gmra.mrb[28].mxu0 %v4795_v45  ;;  %v8809_v45 = vld [vmem:[#allocation103_spill] sm:$0xff]  ;;  %v8811_v49 = vld [vmem:[#allocation105_spill] sm:$0xff] }
 0x7f6   : > { %2802 = vmatprep.mubr.bf16.mxu0 %v8747_v43  ;;  %v4804_v54 = vld [vmem:[%s8495_s10 + $0x8] ss:$12 sps:$4 sm:$0xff]   ;;  %v4805_v21 = vld [vmem:[%s8495_s10 + $0x20] ss:$12 sps:$4 sm:$0xff]  }
 0x7f7   : > { %v2663_v51 = vpack.c.bf16 %v2627_v10, %v2625_v14  ;;  %v2664_v56 = vpack.c.bf16 %v2628_v2, %v2626_v11 }
 0x7f9   : > { %2772 = vmatprep.subr.bf16.mxu0 %v2664_v56 }
 0x7fa   : > { %2773 = vmatpush1.bf16.msra.mxu0 %v2663_v51 }
 0x7fb   : > { %2859 = vmatprep.subr.bf16.mxu0 %v6575_v61  ;;  %v8781_v61 = vld [vmem:[#allocation76_spill] sm:$0xff] }
 0x7fd   : > { %4589 = vmatmul.mubr.msk.bf16.vlgmr.msra.gmra.mrb[24].mxu0 %vm1304_vm10, %v4796_v22 }
 0x7fe   : > { %2860 = vmatpush1.bf16.msra.mxu0 %v6573_v28  ;;  %2812 = vmatprep.mubr.bf16.mxu0 %v8747_v43  ;;  %v8782_v28 = vld [vmem:[#allocation78_spill] sm:$0xff] }
 0x7ff   : > { %2861 = vmatprep.subr.bf16.mxu0 %v6620_v13  ;;  %v8783_v13 = vld [vmem:[#allocation77_spill] sm:$0xff] }
 0x802   : > { %2862 = vmatpush1.bf16.msra.mxu0 %v6616_v59  ;;  %v8786_v59 = vld [vmem:[#allocation82_spill] sm:$0xff]  ;;  %v2972_v14 = vpop.permute.xlu1 %2971 }
 0x803   : > { %2863 = vmatprep.subr.bf16.mxu0 %v8780_v63 }
 0x804   : > { %v2977_v51 = vpop.permute.xlu0 %2976 }
 0x805   : > { %4590 = vmatmul.mubr.msk.bf16.gmra.mrb[28].mxu0 %vm1304_vm10, %v4797_v20 }
 0x806   : > { %2864 = vmatpush1.bf16.msra.mxu0 %v8781_v61  ;;  %2891 = vmatprep.mubr.bf16.mxu0 %v4800_v15 }
 0x807   : > { %2865 = vmatprep.subr.bf16.mxu0 %v8782_v28 }
 0x80a   : > { %2866 = vmatpush1.bf16.msra.mxu0 %v8783_v13 }
 0x80b   : > { %2867 = vmatprep.subr.bf16.mxu0 %v8784_v62 }
 0x80e   : > { %2868 = vmatpush1.bf16.msra.mxu0 %v8785_v30 }
 0x80f   : > { %2869 = vmatprep.subr.bf16.mxu0 %v8786_v59 }
 0x812   : > { %2870 = vmatpush1.bf16.msra.mxu0 %v8787_v23 }
 0x813   : > { %2871 = vmatprep.subr.bf16.mxu0 %v8788_v24 }
 0x816   : > { %2872 = vmatpush1.bf16.msra.mxu0 %v8789_v58  ;;  %v2982_v58 = vpop.permute.xlu1 %2981 }
 0x817   : > { %2873 = vmatprep.subr.bf16.mxu0 %v8790_v52 }
 0x81a   : > { %2874 = vmatpush1.bf16.msra.mxu0 %v8791_v50  ;;  %v2987_v50 = vpop.permute.xlu0 %2986 }
 0x81b   : > { %2875 = vmatprep.subr.bf16.mxu0 %v8792_v31 }
 0x81e   : > { %2876 = vmatpush1.bf16.msra.mxu0 %v8793_v29 }
 0x81f   : > { %2877 = vmatprep.subr.bf16.mxu0 %v8794_v41 }
 0x822   : > { %2878 = vmatpush1.bf16.msra.mxu0 %v8795_v8 }
 0x823   : > { %2879 = vmatprep.subr.bf16.mxu0 %v8796_v12 }
 0x826   : > { %2880 = vmatpush1.bf16.msra.mxu0 %v8797_v44 }
 0x827   : > { %2881 = vmatprep.subr.bf16.mxu0 %v8798_v0 }
 0x82a   : > { %2882 = vmatpush1.bf16.msra.mxu0 %v8799_v27  ;;  %v4808_v27 = vld [vmem:[%s8499_s14 + $0x4] ss:$12 sps:$4 sm:$0xff]  }
 0x82b   : > { %2883 = vmatprep.subr.bf16.mxu0 %v8800_v25  ;;  %3381 = vmatprep.mubr.bf16.mxu1 %v4808_v27 }
 0x82e   : > { %2884 = vmatpush1.bf16.msra.mxu0 %v8801_v1 }
 0x82f   : > { %2885 = vmatprep.subr.bf16.mxu0 %v8802_v57 }
 0x832   : > { %2886 = vmatpush1.bf16.msra.mxu0 %v8803_v42 }
 0x833   : > { %2887 = vmatprep.subr.bf16.mxu0 %v8804_v36 }
 0x836   : > { %2888 = vmatpush1.bf16.msra.mxu0 %v8805_v33 }
 0x837   : > { %2889 = vmatprep.subr.bf16.mxu0 %v8806_v55  ;;  %v3597_v55 = vld [vmem:[%s8500_s15] sm:$0xff] }
 0x83a   : > { %2890 = vmatpush1.bf16.msra.mxu0 %v8807_v60  ;;  %v3598_v60 = vld [vmem:[%s8500_s15 + $0x8] sm:$0xff] }
 0x83b   : > { %2912 = vmatprep.subr.bf16.mxu0 %v8808_v46  ;;  %v3599_v46 = vld [vmem:[%s8500_s15 + $0x10] sm:$0xff] }
 0x83d   : > { %2892 = vmatmul.mubr.bf16.vlgmr.msra.gmra.mrb[24].mxu0 %v4798_v26 }
 0x83e   : > { %2913 = vmatpush1.bf16.msra.mxu0 %v8809_v45  ;;  %2901 = vmatprep.mubr.bf16.mxu0 %v4801_v3 }
 0x83f   : > { %2914 = vmatprep.subr.bf16.mxu0 %v8810_v35  ;;  %v3600_v35 = vld [vmem:[%s8500_s15 + $0x18] sm:$0xff] }
 0x842   : > { %2915 = vmatpush1.bf16.msra.mxu0 %v8811_v49 }
 0x845   : > { %2902 = vmatmul.mubr.bf16.gmra.mrb[28].mxu0 %v4803_v53 }
 0x846   : > { %2944 = vmatprep.mubr.bf16.mxu0 %v8747_v43 }
 0x84d   : > { %4597 = vmatmul.mubr.msk.bf16.vlgmr.msra.gmra.mrb[24].mxu0 %vm1304_vm10, %v4804_v54 }
 0x84e   : > { %2954 = vmatprep.mubr.bf16.mxu0 %v8747_v43 }
 0x855   : > { %4598 = vmatmul.mubr.msk.bf16.gmra.mrb[28].mxu0 %vm1304_vm10, %v4805_v21 }
 0x920   : > { %v2946_v11 = vpop.f32.mrb[24].mxu0 }
 0x921   : > { %v2989_v10 = vadd.f32 %v2972_v14, %v2946_v11  ;;  %v2948_v2 = vpop.f32.mrb[25].mxu0 }
 0x922   : > { %v2950_v56 = vpop.f32.mrb[26].mxu0  ;;  %v2990_v30 = vadd.f32 %v2972_v14, %v2948_v2 }
 0x923   : > { %v7448_v22 = vmax.f32 %v2989_v10, 0.0  ;;  %v2991_v20 = vadd.f32 %v2977_v51, %v2950_v56  ;;  %v2952_v15 = vpop.f32.mrb[27].mxu0 }
 0x924   : > { %v2992_v59 = vadd.f32 %v2977_v51, %v2952_v15  ;;  %v7470_v23 = vmax.f32 %v2990_v30, 0.0 }
 0x925   : > { %v7450_v63 = vmax.f32 %v2991_v20, 0.0  ;;  %3005 = vrot.lane.b32.xlu1 %v7448_v22, %s8708_s0 }
 0x926   : > { %v7474_v24 = vmax.f32 %v2992_v59, 0.0 }
 0x927   : > { %3007 = vrot.lane.b32.xlu0 %v7450_v63, %s8708_s0 }
 0x928   : > { %v2956_v61 = vpop.f32.mrb[28].mxu0 }
 0x929   : > { %3037 = vrot.lane.b32.xlu1 %v7448_v22, %s8709_s1  ;;  %v2958_v28 = vpop.f32.mrb[29].mxu0  ;;  %v2993_v52 = vadd.f32 %v2982_v58, %v2956_v61 }
 0x92a   : > { %v2960_v13 = vpop.f32.mrb[30].mxu0  ;;  %v2994_v8 = vadd.f32 %v2982_v58, %v2958_v28 }
 0x92b   : > { %v2962_v62 = vpop.f32.mrb[31].mxu0  ;;  %3039 = vrot.lane.b32.xlu0 %v7450_v63, %s8709_s1  ;;  %v2995_v31 = vadd.f32 %v2987_v50, %v2960_v13  ;;  %v7490_v29 = vmax.f32 %v2993_v52, 0.0 }
 0x92c   : > { %v2996_v12 = vadd.f32 %v2987_v50, %v2962_v62  ;;  %v7510_v44 = vmax.f32 %v2994_v8, 0.0 }
 0x92d   : > { %3069 = vrot.lane.b32.xlu1 %v7448_v22, %s8661_s28  ;;  %v7494_v41 = vmax.f32 %v2995_v31, 0.0 }
 0x92e   : > { %v7514_v0 = vmax.f32 %v2996_v12, 0.0 }
 0x92f   : > { %3071 = vrot.lane.b32.xlu0 %v7450_v63, %s8661_s28 }
 0x931   : > { %3101 = vrot.lane.b32.xlu1 %v7448_v22, %s8662_s23 }
 0x933   : > { %3103 = vrot.lane.b32.xlu0 %v7450_v63, %s8662_s23 }
 0x935   : > { %3133 = vrot.lane.b32.xlu1 %v7448_v22, %s8663_s26 }
 0x937   : > { %3135 = vrot.lane.b32.xlu0 %v7450_v63, %s8663_s26 }
 0x939   : > { %3013 = vrot.lane.b32.xlu1 %v7470_v23, %s8708_s0 }
 0x93b   : > { %3015 = vrot.lane.b32.xlu0 %v7474_v24, %s8708_s0 }
 0x93d   : > { %3045 = vrot.lane.b32.xlu1 %v7470_v23, %s8709_s1 }
 0x93f   : > { %3047 = vrot.lane.b32.xlu0 %v7474_v24, %s8709_s1 }
 0x941   : > { %3077 = vrot.lane.b32.xlu1 %v7470_v23, %s8661_s28 }
 0x943   : > { %3079 = vrot.lane.b32.xlu0 %v7474_v24, %s8661_s28 }
 0x945   : > { %3109 = vrot.lane.b32.xlu1 %v7470_v23, %s8662_s23 }
 0x947   : > { %3111 = vrot.lane.b32.xlu0 %v7474_v24, %s8662_s23 }
 0x949   : > { %3009 = vrot.lane.b32.xlu1 %v7490_v29, %s8708_s0 }
 0x94b   : > { %3011 = vrot.lane.b32.xlu0 %v7494_v41, %s8708_s0 }
 0x94d   : > { %3041 = vrot.lane.b32.xlu1 %v7490_v29, %s8709_s1 }
 0x94f   : > { %3043 = vrot.lane.b32.xlu0 %v7494_v41, %s8709_s1 }
 0x951   : > { %3073 = vrot.lane.b32.xlu1 %v7490_v29, %s8661_s28 }
 0x953   : > { %3075 = vrot.lane.b32.xlu0 %v7494_v41, %s8661_s28 }
 0x955   : > { %3105 = vrot.lane.b32.xlu1 %v7490_v29, %s8662_s23 }
 0x957   : > { %3107 = vrot.lane.b32.xlu0 %v7494_v41, %s8662_s23 }
 0x959   : > { %3017 = vrot.lane.b32.xlu1 %v7510_v44, %s8708_s0 }
 0x95b   : > { %3019 = vrot.lane.b32.xlu0 %v7514_v0, %s8708_s0 }
 0x95d   : > { %3141 = vrot.lane.b32.xlu1 %v7470_v23, %s8663_s26 }
 0x95f   : > { %3143 = vrot.lane.b32.xlu0 %v7474_v24, %s8663_s26 }
 0x961   : > { %3049 = vrot.lane.b32.xlu1 %v7510_v44, %s8709_s1 }
 0x963   : > { %3051 = vrot.lane.b32.xlu0 %v7514_v0, %s8709_s1 }
 0x965   : > { %3081 = vrot.lane.b32.xlu1 %v7510_v44, %s8661_s28 }
 0x967   : > { %3139 = vrot.lane.b32.xlu0 %v7494_v41, %s8663_s26 }
 0x969   : > { %3113 = vrot.lane.b32.xlu1 %v7510_v44, %s8662_s23 }
 0x96b   : > { %3083 = vrot.lane.b32.xlu0 %v7514_v0, %s8661_s28 }
 0x96d   : > { %3137 = vrot.lane.b32.xlu1 %v7490_v29, %s8663_s26 }
 0x96f   : > { %3167 = vrot.lane.b32.xlu0 %v7450_v63, %s8664_s5 }
 0x971   : > { %3145 = vrot.lane.b32.xlu1 %v7510_v44, %s8663_s26 }
 0x973   : > { %3115 = vrot.lane.b32.xlu0 %v7514_v0, %s8662_s23 }
 0x975   : > { %3165 = vrot.lane.b32.xlu1 %v7448_v22, %s8664_s5 }
 0x977   : > { %3175 = vrot.lane.b32.xlu0 %v7474_v24, %s8664_s5 }
 0x979   : > { %3173 = vrot.lane.b32.xlu1 %v7470_v23, %s8664_s5 }
 0x97b   : > { %3171 = vrot.lane.b32.xlu0 %v7494_v41, %s8664_s5 }
 0x97d   : > { %3169 = vrot.lane.b32.xlu1 %v7490_v29, %s8664_s5 }
 0x97f   : > { %3199 = vrot.lane.b32.xlu0 %v7450_v63, %s8665_s30 }
 0x981   : > { %3177 = vrot.lane.b32.xlu1 %v7510_v44, %s8664_s5 }
 0x983   : > { %3147 = vrot.lane.b32.xlu0 %v7514_v0, %s8663_s26 }
 0x985   : > { %3197 = vrot.lane.b32.xlu1 %v7448_v22, %s8665_s30 }
 0x987   : > { %3207 = vrot.lane.b32.xlu0 %v7474_v24, %s8665_s30 }
 0x989   : > { %3205 = vrot.lane.b32.xlu1 %v7470_v23, %s8665_s30 }
 0x98b   : > { %3179 = vrot.lane.b32.xlu0 %v7514_v0, %s8664_s5 }
 0x98d   : > { %3201 = vrot.lane.b32.xlu1 %v7490_v29, %s8665_s30 }
 0x98f   : > { %3203 = vrot.lane.b32.xlu0 %v7494_v41, %s8665_s30 }
 0x991   : > { %3209 = vrot.lane.b32.xlu1 %v7510_v44, %s8665_s30 }
 0x993   : > { %3211 = vrot.lane.b32.xlu0 %v7514_v0, %s8665_s30 }
 0x995   : > { %3229 = vrot.lane.b32.xlu1 %v7448_v22, %s4872_s24 }
 0x997   : > { %v3006_v25 = vpop.permute.xlu1 %3005  ;;  %3231 = vrot.lane.b32.xlu0 %v7450_v63, %s4872_s24 }
 0x999   : > { %3237 = vrot.lane.b32.xlu1 %v7470_v23, %s4872_s24  ;;  %v3008_v1 = vpop.permute.xlu0 %3007 }
 0x99b   : > { %v7585_v57 = vpop.permute.xlu1 %3037  ;;  %3239 = vrot.lane.b32.xlu0 %v7474_v24, %s4872_s24 }
 0x99d   : > { %3233 = vrot.lane.b32.xlu1 %v7490_v29, %s4872_s24  ;;  %v3040_v42 = vpop.permute.xlu0 %3039 }
 0x99f   : > { %v7591_v36 = vpop.permute.xlu1 %3069  ;;  %3235 = vrot.lane.b32.xlu0 %v7494_v41, %s4872_s24 }
 0x9a1   : > { %3241 = vrot.lane.b32.xlu1 %v7510_v44, %s4872_s24  ;;  %v7597_v33 = vpop.permute.xlu0 %3071 }
 0x9a3   : > { %v7602_v26 = vpop.permute.xlu1 %3101  ;;  %3243 = vrot.lane.b32.xlu0 %v7514_v0, %s4872_s24 }
 0x9a5   : > { %3603 = vperm.xlu1 %4763, %v3597_v55   ;;  %v7609_v3 = vpop.permute.xlu0 %3103 }
 0x9a7   : > { %v7614_v45 = vpop.permute.xlu1 %3133  ;;  %3608 = vperm.xlu0 %4762, %v3598_v60  }
 0x9a9   : > { %3613 = vperm.xlu1 %4763, %v3599_v46   ;;  %v7619_v53 = vpop.permute.xlu0 %3135 }
 0x9ab   : > { %v3014_v49 = vpop.permute.xlu1 %3013  ;;  %3618 = vperm.xlu0 %4762, %v3600_v35  }
 0x9ac   : > { %v3021_v54 = vsel %vm695_vm1, %v3006_v25, %v3014_v49  ;;  %v3025_v21 = vsel %vm695_vm1, %v3014_v49, %v3006_v25 }
 0x9ad   : > { %v3016_v14 = vpop.permute.xlu0 %3015  ;;  %v3029_v2 = vmul.f32 %v3025_v21, %v5077_v18  ;;  %v3030_v51 = vmul.f32 %v3021_v54, %v5071_v16 }
 0x9ae   : > { %v3022_v11 = vsel %vm695_vm1, %v3008_v1, %v3016_v14  ;;  %v3026_v10 = vsel %vm695_vm1, %v3016_v14, %v3008_v1 }
 0x9af   : > { %v3031_v56 = vmul.f32 %v3026_v10, %v5077_v18  ;;  %v3032_v20 = vmul.f32 %v3022_v11, %v5071_v16  ;;  %v3046_v15 = vpop.permute.xlu1 %3045 }
 0x9b0   : > { %v3053_v49 = vsel %vm712_vm0, %v7585_v57, %v3046_v15 }
 0x9b1   : > { %v3261_v61 = vpack.c.bf16 %v3031_v56, %v3029_v2  ;;  %v3048_v28 = vpop.permute.xlu0 %3047  ;;  %v3262_v13 = vpack.c.bf16 %v3032_v20, %v3030_v51 }
 0x9b2   : > { %v3054_v55 = vsel %vm712_vm0, %v3040_v42, %v3048_v28  ;;  %v3058_v21 = vsel %vm712_vm0, %v3048_v28, %v3040_v42  ;;  %v3057_v42 = vsel %vm712_vm0, %v3046_v15, %v7585_v57  ;;  %v3062_v28 = vmul.f32 %v3053_v49, %v5074_v17 }
 0x9b3   : > { %v3078_v62 = vpop.permute.xlu1 %3077  ;;  %3349 = vmatprep.subr.bf16.mxu1 %v3262_v13  ;;  %v3064_v14 = vmul.f32 %v3054_v55, %v5074_v17  ;;  %v3063_v13 = vmul.f32 %v3058_v21, %v5080_v19 }
 0x9b4   : > { %3350 = vmatpush1.bf16.msra.mxu1 %v3261_v61  ;;  %v3085_v21 = vsel %vm729_vm2, %v7591_v36, %v3078_v62 }
 0x9b5   : > { %v3080_v30 = vpop.permute.xlu0 %3079 }
 0x9b7   : > { %v7633_v59 = vpop.permute.xlu1 %3109 }
 0x9b9   : > { %v7635_v58 = vpop.permute.xlu0 %3111 }
 0x9bb   : > { %v3010_v52 = vpop.permute.xlu1 %3009 }
 0x9bd   : > { %v3012_v50 = vpop.permute.xlu0 %3011 }
 0x9bf   : > { %v3042_v31 = vpop.permute.xlu1 %3041 }
 0x9c1   : > { %v3044_v8 = vpop.permute.xlu0 %3043 }
 0x9c3   : > { %v3074_v12 = vpop.permute.xlu1 %3073 }
 0x9c5   : > { %v7637_v27 = vpop.permute.xlu0 %3075 }
 0x9c7   : > { %v7639_v25 = vpop.permute.xlu1 %3105 }
 0x9c9   : > { %v7641_v1 = vpop.permute.xlu0 %3107 }
 0x9cb   : > { %v3018_v60 = vpop.permute.xlu1 %3017 }
 0x9cc   : > { %v3023_v46 = vsel %vm695_vm1, %v3010_v52, %v3018_v60  ;;  %v3027_v35 = vsel %vm695_vm1, %v3018_v60, %v3010_v52  ;;  %v3061_v60 = vmul.f32 %v3057_v42, %v5080_v19 }
 0x9cd   : > { %v3020_v54 = vpop.permute.xlu0 %3019  ;;  %v3033_v2 = vmul.f32 %v3027_v35, %v5077_v18  ;;  %v3034_v51 = vmul.f32 %v3023_v46, %v5071_v16  ;;  %v3086_v46 = vsel %vm729_vm2, %v7597_v33, %v3080_v30 }
 0x9ce   : > { %v3024_v11 = vsel %vm695_vm1, %v3012_v50, %v3020_v54  ;;  %v3028_v10 = vsel %vm695_vm1, %v3020_v54, %v3012_v50  ;;  %v3266_v54 = vpack.c.bf16 %v3064_v14, %v3062_v28  ;;  %v3265_v49 = vpack.c.bf16 %v3063_v13, %v3061_v60 }
 0x9cf   : > { %v3035_v56 = vmul.f32 %v3028_v10, %v5077_v18  ;;  %v3036_v20 = vmul.f32 %v3024_v11, %v5071_v16  ;;  %v7663_v61 = vpop.permute.xlu1 %3141  ;;  %v3090_v10 = vsel %vm729_vm2, %v3080_v30, %v7597_v33  ;;  %v3096_v14 = vmul.f32 %v3086_v46, %v5103_v38 }
 0x9d0   : > { %v3089_v33 = vsel %vm729_vm2, %v3078_v62, %v7591_v36  ;;  %v3094_v30 = vmul.f32 %v3085_v21, %v5103_v38  ;;  %v3095_v13 = vmul.f32 %v3090_v10, %v5100_v37  ;;  %v3118_v46 = vsel %vm746_vm3, %v7609_v3, %v7635_v58 }
 0x9d1   : > { %v3263_v52 = vpack.c.bf16 %v3035_v56, %v3033_v2  ;;  %v7670_v50 = vpop.permute.xlu0 %3143  ;;  %v3264_v55 = vpack.c.bf16 %v3036_v20, %v3034_v51  ;;  %v3093_v60 = vmul.f32 %v3089_v33, %v5100_v37  ;;  %v3122_v21 = vsel %vm746_vm3, %v7635_v58, %v7609_v3 }
 0x9d2   : > { %v3121_v3 = vsel %vm746_vm3, %v7633_v59, %v7602_v26 }
 0x9d3   : > { %v3050_v35 = vpop.permute.xlu1 %3049  ;;  %3351 = vmatprep.subr.bf16.mxu1 %v3264_v55 }
 0x9d4   : > { %v3055_v57 = vsel %vm712_vm0, %v3042_v31, %v3050_v35  ;;  %v3059_v15 = vsel %vm712_vm0, %v3050_v35, %v3042_v31  ;;  %3352 = vmatpush1.bf16.msra.mxu1 %v3263_v52 }
 0x9d5   : > { %3353 = vmatprep.subr.bf16.mxu1 %v3266_v54  ;;  %v3052_v11 = vpop.permute.xlu0 %3051  ;;  %v3065_v51 = vmul.f32 %v3059_v15, %v5080_v19  ;;  %v3066_v56 = vmul.f32 %v3055_v57, %v5074_v17  ;;  %v3270_v54 = vpack.c.bf16 %v3096_v14, %v3094_v30  ;;  %v3269_v57 = vpack.c.bf16 %v3095_v13, %v3093_v60 }
 0x9d6   : > { %v3056_v2 = vsel %vm712_vm0, %v3044_v8, %v3052_v11  ;;  %v3060_v31 = vsel %vm712_vm0, %v3052_v11, %v3044_v8  ;;  %v3117_v15 = vsel %vm746_vm3, %v7602_v26, %v7633_v59  ;;  %v3128_v11 = vmul.f32 %v3118_v46, %v5109_v40 }
 0x9d7   : > { %v3067_v20 = vmul.f32 %v3060_v31, %v5080_v19  ;;  %v3068_v42 = vmul.f32 %v3056_v2, %v5074_v17  ;;  %v3082_v28 = vpop.permute.xlu1 %3081  ;;  %v3126_v58 = vmul.f32 %v3117_v15, %v5109_v40  ;;  %v3125_v13 = vmul.f32 %v3121_v3, %v5106_v39 }
 0x9d8   : > { %3354 = vmatpush1.bf16.msra.mxu1 %v3265_v49  ;;  %v3087_v36 = vsel %vm729_vm2, %v3074_v12, %v3082_v28  ;;  %v3091_v62 = vsel %vm729_vm2, %v3082_v28, %v3074_v12  ;;  %v3127_v28 = vmul.f32 %v3122_v21, %v5106_v39 }
 0x9d9   : > { %v3267_v52 = vpack.c.bf16 %v3067_v20, %v3065_v51  ;;  %v7700_v8 = vpop.permute.xlu0 %3139  ;;  %v3268_v55 = vpack.c.bf16 %v3068_v42, %v3066_v56  ;;  %v3097_v14 = vmul.f32 %v3091_v62, %v5100_v37  ;;  %v3098_v2 = vmul.f32 %v3087_v36, %v5103_v38 }
 0x9da   : > { %v3274_v30 = vpack.c.bf16 %v3128_v11, %v3126_v58  ;;  %v3278_v11 = vpack.c.bf16 %v7474_v24, %v7470_v23  ;;  %v3277_v23 = vpack.c.bf16 %v7450_v63, %v7448_v22  ;;  %v3279_v63 = vpack.c.bf16 %v7494_v41, %v7490_v29 }
 0x9db   : > { %v3114_v35 = vpop.permute.xlu1 %3113  ;;  %3355 = vmatprep.subr.bf16.mxu1 %v3268_v55  ;;  %v3273_v55 = vpack.c.bf16 %v3127_v28, %v3125_v13 }
 0x9dc   : > { %3356 = vmatpush1.bf16.msra.mxu1 %v3267_v52  ;;  %v3119_v52 = vsel %vm746_vm3, %v7639_v25, %v3114_v35  ;;  %v3123_v26 = vsel %vm746_vm3, %v3114_v35, %v7639_v25 }
 0x9dd   : > { %3357 = vmatprep.subr.bf16.mxu1 %v3270_v54  ;;  %v3084_v49 = vpop.permute.xlu0 %3083  ;;  %v3129_v54 = vmul.f32 %v3123_v26, %v5106_v39  ;;  %v3130_v36 = vmul.f32 %v3119_v52, %v5109_v40 }
 0x9de   : > { %v3088_v12 = vsel %vm729_vm2, %v7637_v27, %v3084_v49  ;;  %v3092_v10 = vsel %vm729_vm2, %v3084_v49, %v7637_v27 }
 0x9df   : > { %v3099_v31 = vmul.f32 %v3092_v10, %v5100_v37  ;;  %v3100_v51 = vmul.f32 %v3088_v12, %v5103_v38  ;;  %v3138_v56 = vpop.permute.xlu1 %3137  ;;  %v3153_v10 = vsel %vm763_vm4, %v7663_v61, %v7614_v45 }
 0x9e0   : > { %3358 = vmatpush1.bf16.msra.mxu1 %v3269_v57  ;;  %v3158_v3 = vmul.f32 %v3153_v10, %v5124_v48 }
 0x9e1   : > { %v3271_v20 = vpack.c.bf16 %v3099_v31, %v3097_v14  ;;  %v7735_v42 = vpop.permute.xlu0 %3167  ;;  %v3272_v27 = vpack.c.bf16 %v3100_v51, %v3098_v2  ;;  %v3150_v14 = vsel %vm763_vm4, %v7619_v53, %v7670_v50  ;;  %v3280_v31 = vpack.c.bf16 %v7514_v0, %v7510_v44 }
 0x9e2   : > { %v3149_v51 = vsel %vm763_vm4, %v7614_v45, %v7663_v61  ;;  %v3159_v58 = vmul.f32 %v3150_v14, %v5121_v47 }
 0x9e3   : > { %v3146_v33 = vpop.permute.xlu1 %3145  ;;  %3359 = vmatprep.subr.bf16.mxu1 %v3272_v27  ;;  %v3157_v44 = vmul.f32 %v3149_v51, %v5121_v47 }
 0x9e4   : > { %3360 = vmatpush1.bf16.msra.mxu1 %v3271_v20  ;;  %v3151_v22 = vsel %vm763_vm4, %v3138_v56, %v3146_v33  ;;  %v3155_v45 = vsel %vm763_vm4, %v3146_v33, %v3138_v56 }
 0x9e5   : > { %3361 = vmatprep.subr.bf16.mxu1 %v3274_v30  ;;  %v3116_v59 = vpop.permute.xlu0 %3115  ;;  %v3281_v20 = vpack.c.bf16 %v3159_v58, %v3157_v44  ;;  %v3161_v27 = vmul.f32 %v3151_v22, %v5121_v47  ;;  %v3162_v30 = vmul.f32 %v3155_v45, %v5124_v48 }
 0x9e6   : > { %v3120_v60 = vsel %vm746_vm3, %v7641_v1, %v3116_v59  ;;  %v3124_v46 = vsel %vm746_vm3, %v3116_v59, %v7641_v1  ;;  %v3154_v1 = vsel %vm763_vm4, %v7670_v50, %v7619_v53 }
 0x9e7   : > { %v3131_v62 = vmul.f32 %v3124_v46, %v5106_v39  ;;  %v3132_v25 = vmul.f32 %v3120_v60, %v5109_v40  ;;  %v3166_v35 = vpop.permute.xlu1 %3165  ;;  %v3160_v24 = vmul.f32 %v3154_v1, %v5124_v48 }
 0x9e8   : > { %3362 = vmatpush1.bf16.msra.mxu1 %v3273_v55 }
 0x9e9   : > { %v3275_v57 = vpack.c.bf16 %v3131_v62, %v3129_v54  ;;  %v3176_v15 = vpop.permute.xlu0 %3175  ;;  %v3276_v49 = vpack.c.bf16 %v3132_v25, %v3130_v36  ;;  %v3282_v50 = vpack.c.bf16 %v3160_v24, %v3158_v3 }
 0x9ea   : > { %v3186_v29 = vsel %vm780_vm5, %v3176_v15, %v7735_v42  ;;  %v3182_v55 = vsel %vm780_vm5, %v7735_v42, %v3176_v15 }
 0x9eb   : > { %v3174_v21 = vpop.permute.xlu1 %3173  ;;  %3363 = vmatprep.subr.bf16.mxu1 %v3276_v49  ;;  %v3192_v60 = vmul.f32 %v3186_v29, %v5146_v7  ;;  %v3191_v25 = vmul.f32 %v3182_v55, %v5143_v6 }
 0x9ec   : > { %3364 = vmatpush1.bf16.msra.mxu1 %v3275_v57  ;;  %v3185_v61 = vsel %vm780_vm5, %v3174_v21, %v3166_v35  ;;  %v3181_v41 = vsel %vm780_vm5, %v3166_v35, %v3174_v21 }
 0x9ed   : > { %3365 = vmatprep.subr.bf16.mxu1 %v3278_v11  ;;  %v3172_v12 = vpop.permute.xlu0 %3171  ;;  %v3190_v13 = vmul.f32 %v3185_v61, %v5146_v7  ;;  %v3189_v46 = vmul.f32 %v3181_v41, %v5143_v6 }
 0x9ef   : > { %v3170_v2 = vpop.permute.xlu1 %3169  ;;  %v3286_v49 = vpack.c.bf16 %v3192_v60, %v3190_v13  ;;  %v3285_v15 = vpack.c.bf16 %v3191_v25, %v3189_v46  ;;  %v4806_v46 = vld [vmem:[%s8499_s14] ss:$12 sps:$4 sm:$0xff]  }
 0x9f0   : > { %3366 = vmatpush1.bf16.msra.mxu1 %v3277_v23 }
 0x9f1   : > { %3367 = vmatprep.subr.bf16.mxu1 %v3280_v31  ;;  %v3200_v53 = vpop.permute.xlu0 %3199 }
 0x9f3   : > { %v3178_v0 = vpop.permute.xlu1 %3177 }
 0x9f4   : > { %3368 = vmatpush1.bf16.msra.mxu1 %v3279_v63  ;;  %v3183_v62 = vsel %vm780_vm5, %v3170_v2, %v3178_v0  ;;  %v3187_v35 = vsel %vm780_vm5, %v3178_v0, %v3170_v2 }
 0x9f5   : > { %3369 = vmatprep.subr.bf16.mxu1 %v3282_v50  ;;  %v3148_v28 = vpop.permute.xlu0 %3147  ;;  %v3193_v21 = vmul.f32 %v3183_v62, %v5143_v6  ;;  %v3194_v1 = vmul.f32 %v3187_v35, %v5146_v7 }
 0x9f6   : > { %v3152_v56 = vsel %vm763_vm4, %v7700_v8, %v3148_v28  ;;  %v3156_v33 = vsel %vm763_vm4, %v3148_v28, %v7700_v8 }
 0x9f7   : > { %v3163_v52 = vmul.f32 %v3152_v56, %v5121_v47  ;;  %v3164_v26 = vmul.f32 %v3156_v33, %v5124_v48  ;;  %v3198_v59 = vpop.permute.xlu1 %3197 }
 0x9f8   : > { %3370 = vmatpush1.bf16.msra.mxu1 %v3281_v20 }
 0x9f9   : > { %v3283_v54 = vpack.c.bf16 %v3163_v52, %v3161_v27  ;;  %v3208_v8 = vpop.permute.xlu0 %3207  ;;  %v3284_v36 = vpack.c.bf16 %v3164_v26, %v3162_v30 }
 0x9fa   : > { %v3218_v10 = vsel %vm797_vm6, %v3208_v8, %v3200_v53  ;;  %v3214_v58 = vsel %vm797_vm6, %v3200_v53, %v3208_v8 }
 0x9fb   : > { %v3206_v57 = vpop.permute.xlu1 %3205  ;;  %3371 = vmatprep.subr.bf16.mxu1 %v3284_v36  ;;  %v3224_v22 = vmul.f32 %v3218_v10, %v8697_v32  ;;  %v3223_v61 = vmul.f32 %v3214_v58, %v8740_v5  ;;  %v4809_v36 = vld [vmem:[%s8499_s14 + $0x1c] ss:$12 sps:$4 sm:$0xff]  }
 0x9fc   : > { %v3217_v42 = vsel %vm797_vm6, %v3206_v57, %v3198_v59  ;;  %3372 = vmatpush1.bf16.msra.mxu1 %v3283_v54  ;;  %v3213_v24 = vsel %vm797_vm6, %v3198_v59, %v3206_v57 }
 0x9fd   : > { %3373 = vmatprep.subr.bf16.mxu1 %v3286_v49  ;;  %v3180_v11 = vpop.permute.xlu0 %3179  ;;  %v3222_v2 = vmul.f32 %v3217_v42, %v8697_v32 }
 0x9fe   : > { %v3184_v14 = vsel %vm780_vm5, %v3172_v12, %v3180_v11  ;;  %v3188_v23 = vsel %vm780_vm5, %v3180_v11, %v3172_v12  ;;  %v3221_v12 = vmul.f32 %v3213_v24, %v8740_v5 }
 0x9ff   : > { %v3195_v31 = vmul.f32 %v3184_v14, %v5143_v6  ;;  %v3196_v51 = vmul.f32 %v3188_v23, %v5146_v7  ;;  %v3202_v3 = vpop.permute.xlu1 %3201  ;;  %v3290_v45 = vpack.c.bf16 %v3224_v22, %v3222_v2  ;;  %v4811_v23 = vld [vmem:[%s8499_s14 + $0x18] ss:$12 sps:$4 sm:$0xff]  }
 0xa00   : > { %3374 = vmatpush1.bf16.msra.mxu1 %v3285_v15  ;;  %v3289_v28 = vpack.c.bf16 %v3223_v61, %v3221_v12  ;;  %v8813_v61 = vld [vmem:[#allocation40_spill] sm:$0xff] }
 0xa01   : > { %v3287_v63 = vpack.c.bf16 %v3195_v31, %v3193_v21  ;;  %v3204_v44 = vpop.permute.xlu0 %3203  ;;  %v3288_v0 = vpack.c.bf16 %v3196_v51, %v3194_v1 }
 0xa03   : > { %v3210_v50 = vpop.permute.xlu1 %3209  ;;  %3375 = vmatprep.subr.bf16.mxu1 %v3288_v0 }
 0xa04   : > { %v3215_v20 = vsel %vm797_vm6, %v3202_v3, %v3210_v50  ;;  %v3219_v27 = vsel %vm797_vm6, %v3210_v50, %v3202_v3  ;;  %3376 = vmatpush1.bf16.msra.mxu1 %v3287_v63  ;;  %v4812_v50 = vld [vmem:[%s8499_s14 + $0x8] ss:$12 sps:$4 sm:$0xff]  }
 0xa05   : > { %3377 = vmatprep.subr.bf16.mxu1 %v3290_v45  ;;  %v3212_v53 = vpop.permute.xlu0 %3211  ;;  %v3225_v56 = vmul.f32 %v3215_v20, %v8740_v5  ;;  %v3226_v33 = vmul.f32 %v3219_v27, %v8697_v32  ;;  %v8812_v45 = vld [vmem:[#allocation41_spill] sm:$0xff]  ;;  %v8815_v20 = vld [vmem:[#allocation42_spill] sm:$0xff] }
 0xa06   : > { %v3216_v29 = vsel %vm797_vm6, %v3204_v44, %v3212_v53  ;;  %v3220_v41 = vsel %vm797_vm6, %v3212_v53, %v3204_v44  ;;  %v4816_v27 = vld [vmem:[%s8498_s13 + $0x4] ss:$12 sps:$4 sm:$0xff]   ;;  %v8816_v53 = vld [vmem:[#allocation44_spill] sm:$0xff] }
 0xa07   : > { %v3227_v30 = vmul.f32 %v3216_v29, %v8740_v5  ;;  %v3228_v13 = vmul.f32 %v3220_v41, %v8697_v32  ;;  %v3230_v52 = vpop.permute.xlu1 %3229  ;;  %v8818_v29 = vld [vmem:[#allocation47_spill] sm:$0xff]  ;;  %v8819_v41 = vld [vmem:[#allocation46_spill] sm:$0xff] }
 0xa08   : > { %3378 = vmatpush1.bf16.msra.mxu1 %v3289_v28  ;;  %v8817_v28 = vld [vmem:[#allocation45_spill] sm:$0xff] }
 0xa09   : > { %v3291_v26 = vpack.c.bf16 %v3227_v30, %v3225_v56  ;;  %v3232_v59 = vpop.permute.xlu0 %3231  ;;  %v3292_v55 = vpack.c.bf16 %v3228_v13, %v3226_v33  ;;  %v8820_v56 = vld [vmem:[#allocation48_spill] sm:$0xff]  ;;  %v8821_v33 = vld [vmem:[#allocation49_spill] sm:$0xff]  ;;  %v8822_v30 = vld [vmem:[#allocation51_spill] sm:$0xff] }
 0xa0a   : > { %v8823_v13 = vld [vmem:[#allocation50_spill] sm:$0xff] }
 0xa0b   : > { %v3238_v60 = vpop.permute.xlu1 %3237  ;;  %3379 = vmatprep.subr.bf16.mxu1 %v3292_v55  ;;  %v8827_v55 = vld [vmem:[#allocation54_spill] sm:$0xff] }
 0xa0c   : > { %v3245_v54 = vsel %vm814_vm7, %v3230_v52, %v3238_v60  ;;  %v3249_v8 = vsel %vm814_vm7, %v3238_v60, %v3230_v52  ;;  %3380 = vmatpush1.bf16.msra.mxu1 %v3291_v26  ;;  %v8824_v52 = vld [vmem:[#allocation52_spill] sm:$0xff]  ;;  %v8825_v26 = vld [vmem:[#allocation53_spill] sm:$0xff] }
 0xa0d   : > { %v3240_v62 = vpop.permute.xlu0 %3239  ;;  %v3253_v57 = vmul.f32 %v7354_v4, %v3245_v54  ;;  %v3254_v49 = vmul.f32 %v7360_v34, %v3249_v8  ;;  %v8828_v60 = vld [vmem:[#allocation56_spill] sm:$0xff]  ;;  %v8830_v54 = vld [vmem:[#allocation58_spill] sm:$0xff]  ;;  %v8831_v8 = vld [vmem:[#allocation59_spill] sm:$0xff] }
 0xa0e   : > { %v3246_v25 = vsel %vm814_vm7, %v3232_v59, %v3240_v62  ;;  %v3250_v35 = vsel %vm814_vm7, %v3240_v62, %v3232_v59  ;;  %v8826_v59 = vld [vmem:[#allocation55_spill] sm:$0xff]  ;;  %v8833_v62 = vld [vmem:[#allocation61_spill] sm:$0xff] }
 0xa0f   : > { %v3255_v42 = vmul.f32 %v7354_v4, %v3246_v25  ;;  %v3256_v15 = vmul.f32 %v7360_v34, %v3250_v35  ;;  %v3234_v21 = vpop.permute.xlu1 %3233  ;;  %3382 = vmatmul.mubr.bf16.vlgmr.msra.gmra.mrb[24].mxu1 %v4806_v46  ;;  %v8829_v46 = vld [vmem:[#allocation57_spill] sm:$0xff]  ;;  %v8834_v25 = vld [vmem:[#allocation63_spill] sm:$0xff]  ;;  %v8835_v35 = vld [vmem:[#allocation62_spill] sm:$0xff] }
 0xa10   : > { %3391 = vmatprep.mubr.bf16.mxu1 %v4809_v36  ;;  %v8832_v36 = vld [vmem:[#allocation60_spill] sm:$0xff] }
 0xa11   : > { %v3293_v11 = vpack.c.bf16 %v3255_v42, %v3253_v57  ;;  %v3236_v1 = vpop.permute.xlu0 %3235  ;;  %v3294_v10 = vpack.c.bf16 %v3256_v15, %v3254_v49  ;;  %v8836_v57 = vld [vmem:[#allocation65_spill] sm:$0xff]  ;;  %v8837_v49 = vld [vmem:[#allocation67_spill] sm:$0xff]  ;;  %v8839_v15 = vld [vmem:[#allocation68_spill] sm:$0xff] }
 0xa12   : > { %v8838_v42 = vld [vmem:[#allocation69_spill] sm:$0xff] }
 0xa13   : > { %v3242_v14 = vpop.permute.xlu1 %3241  ;;  %3402 = vmatprep.subr.bf16.mxu1 %v3294_v10  ;;  %v4814_v10 = vld [vmem:[%s8498_s13] ss:$12 sps:$4 sm:$0xff]  }
 0xa14   : > { %v3247_v24 = vsel %vm814_vm7, %v3234_v21, %v3242_v14  ;;  %v3251_v2 = vsel %vm814_vm7, %v3242_v14, %v3234_v21  ;;  %3403 = vmatpush1.bf16.msra.mxu1 %v3293_v11  ;;  %v8840_v21 = vld [vmem:[#allocation3_spill] sm:$0xff]  ;;  %v8841_v11 = vld [vmem:[#allocation70_spill] sm:$0xff] }
 0xa15   : > { %v3244_v31 = vpop.permute.xlu0 %3243  ;;  %v3257_v58 = vmul.f32 %v7354_v4, %v3247_v24  ;;  %v3258_v22 = vmul.f32 %v7360_v34, %v3251_v2  ;;  %v8843_v14 = vld [vmem:[#allocation71_spill] sm:$0xff]  ;;  %v8844_v24 = vld [vmem:[#allocation66_spill] sm:$0xff]  ;;  %v8845_v2 = vld [vmem:[#allocation64_spill] sm:$0xff] }
 0xa16   : > { %v3248_v51 = vsel %vm814_vm7, %v3236_v1, %v3244_v31  ;;  %v3252_v3 = vsel %vm814_vm7, %v3244_v31, %v3236_v1  ;;  %v8842_v1 = vld [vmem:[#allocation72_spill] sm:$0xff]  ;;  %v8846_v31 = vld [vmem:[#allocation74_spill] sm:$0xff] }
 0xa17   : > { %v3259_v63 = vmul.f32 %v7354_v4, %v3248_v51  ;;  %v3260_v44 = vmul.f32 %v7360_v34, %v3252_v3  ;;  %3392 = vmatmul.mubr.bf16.gmra.mrb[28].mxu1 %v4811_v23  ;;  %v8814_v4 = vld [vmem:[#allocation43_spill] sm:$0xff]  ;;  %v4817_v23 = vld [vmem:[%s8498_s13 + $0x1c] ss:$12 sps:$4 sm:$0xff]   ;;  %v8847_v3 = vld [vmem:[#allocation73_spill] sm:$0xff] }
 0xa18   : > { %3434 = vmatprep.mubr.bf16.mxu1 %v8747_v43  ;;  %v4813_v34 = vld [vmem:[%s8499_s14 + $0x20] ss:$12 sps:$4 sm:$0xff]   ;;  %v4819_v51 = vld [vmem:[%s8498_s13 + $0x18] ss:$12 sps:$4 sm:$0xff]  }
 0xa19   : > { %v3295_v0 = vpack.c.bf16 %v3259_v63, %v3257_v58  ;;  %v3296_v12 = vpack.c.bf16 %v3260_v44, %v3258_v22  ;;  %v4820_v58 = vld [vmem:[%s8498_s13 + $0x8] ss:$12 sps:$4 sm:$0xff]   ;;  %v4821_v22 = vld [vmem:[%s8498_s13 + $0x20] ss:$12 sps:$4 sm:$0xff]  }
 0xa1b   : > { %3404 = vmatprep.subr.bf16.mxu1 %v3296_v12 }
 0xa1c   : > { %3405 = vmatpush1.bf16.msra.mxu1 %v3295_v0 }
 0xa1d   : > { %3491 = vmatprep.subr.bf16.mxu1 %v8812_v45 }
 0xa1f   : > { %4605 = vmatmul.mubr.msk.bf16.vlgmr.msra.gmra.mrb[24].mxu1 %vm1304_vm10, %v4812_v50 }
 0xa20   : > { %3492 = vmatpush1.bf16.msra.mxu1 %v8813_v61  ;;  %3444 = vmatprep.mubr.bf16.mxu1 %v8747_v43 }
 0xa21   : > { %3493 = vmatprep.subr.bf16.mxu1 %v8814_v4 }
 0xa24   : > { %3494 = vmatpush1.bf16.msra.mxu1 %v8815_v20  ;;  %v3604_v63 = vpop.permute.xlu1 %3603 }
 0xa25   : > { %3495 = vmatprep.subr.bf16.mxu1 %v8816_v53 }
 0xa26   : > { %v3609_v50 = vpop.permute.xlu0 %3608 }
 0xa27   : > { %4606 = vmatmul.mubr.msk.bf16.gmra.mrb[28].mxu1 %vm1304_vm10, %v4813_v34 }
 0xa28   : > { %3496 = vmatpush1.bf16.msra.mxu1 %v8817_v28  ;;  %3523 = vmatprep.mubr.bf16.mxu1 %v4816_v27 }
 0xa29   : > { %3497 = vmatprep.subr.bf16.mxu1 %v8818_v29 }
 0xa2c   : > { %3498 = vmatpush1.bf16.msra.mxu1 %v8819_v41 }
 0xa2d   : > { %3499 = vmatprep.subr.bf16.mxu1 %v8820_v56 }
 0xa30   : > { %3500 = vmatpush1.bf16.msra.mxu1 %v8821_v33 }
 0xa31   : > { %3501 = vmatprep.subr.bf16.mxu1 %v8822_v30 }
 0xa34   : > { %3502 = vmatpush1.bf16.msra.mxu1 %v8823_v13  ;;  %v3614_v13 = vpop.permute.xlu1 %3613 }
 0xa35   : > { %3503 = vmatprep.subr.bf16.mxu1 %v8824_v52 }
 0xa38   : > { %3504 = vmatpush1.bf16.msra.mxu1 %v8825_v26  ;;  %v3619_v26 = vpop.permute.xlu0 %3618 }
 0xa39   : > { %3505 = vmatprep.subr.bf16.mxu1 %v8826_v59 }
 0xa3c   : > { %3506 = vmatpush1.bf16.msra.mxu1 %v8827_v55 }
 0xa3d   : > { %3507 = vmatprep.subr.bf16.mxu1 %v8828_v60 }
 0xa40   : > { %3508 = vmatpush1.bf16.msra.mxu1 %v8829_v46 }
 0xa41   : > { %3509 = vmatprep.subr.bf16.mxu1 %v8830_v54 }
 0xa44   : > { %3510 = vmatpush1.bf16.msra.mxu1 %v8831_v8 }
 0xa45   : > { %3511 = vmatprep.subr.bf16.mxu1 %v8832_v36 }
 0xa48   : > { %3512 = vmatpush1.bf16.msra.mxu1 %v8833_v62  ;;  %v4824_v62 = vld [vmem:[%s8502_s17 + $0x4] ss:$12 sps:$4 sm:$0xff]  }
 0xa49   : > { %3513 = vmatprep.subr.bf16.mxu1 %v8834_v25  ;;  %4004 = vmatprep.mubr.bf16.mxu0 %v4824_v62 }
 0xa4c   : > { %3514 = vmatpush1.bf16.msra.mxu1 %v8835_v35 }
 0xa4d   : > { %3515 = vmatprep.subr.bf16.mxu1 %v8836_v57 }
 0xa50   : > { %3516 = vmatpush1.bf16.msra.mxu1 %v8837_v49 }
 0xa51   : > { %3517 = vmatprep.subr.bf16.mxu1 %v8838_v42 }
 0xa54   : > { %3518 = vmatpush1.bf16.msra.mxu1 %v8839_v15 }
 0xa55   : > { %3519 = vmatprep.subr.bf16.mxu1 %v8840_v21  ;;  %v4207_v21 = vld [vmem:[%s8503_s18] sm:$0xff] }
 0xa58   : > { %3520 = vmatpush1.bf16.msra.mxu1 %v8841_v11 }
 0xa59   : > { %3521 = vmatprep.subr.bf16.mxu1 %v8842_v1  ;;  %v4208_v1 = vld [vmem:[%s8503_s18 + $0x8] sm:$0xff] }
 0xa5c   : > { %3522 = vmatpush1.bf16.msra.mxu1 %v8843_v14  ;;  %v4209_v14 = vld [vmem:[%s8503_s18 + $0x10] sm:$0xff] }
 0xa5d   : > { %3544 = vmatprep.subr.bf16.mxu1 %v8844_v24 }
 0xa5f   : > { %3524 = vmatmul.mubr.bf16.vlgmr.msra.gmra.mrb[24].mxu1 %v4814_v10 }
 0xa60   : > { %3545 = vmatpush1.bf16.msra.mxu1 %v8845_v2  ;;  %3533 = vmatprep.mubr.bf16.mxu1 %v4817_v23 }
 0xa61   : > { %3546 = vmatprep.subr.bf16.mxu1 %v8846_v31 }
 0xa64   : > { %3547 = vmatpush1.bf16.msra.mxu1 %v8847_v3 }
 0xa67   : > { %3534 = vmatmul.mubr.bf16.gmra.mrb[28].mxu1 %v4819_v51 }
 0xa68   : > { %3576 = vmatprep.mubr.bf16.mxu1 %v8747_v43 }
 0xa6f   : > { %4613 = vmatmul.mubr.msk.bf16.vlgmr.msra.gmra.mrb[24].mxu1 %vm1304_vm10, %v4820_v58 }
 0xa70   : > { %3586 = vmatprep.mubr.bf16.mxu1 %v8747_v43 }
 0xa77   : > { %4614 = vmatmul.mubr.msk.bf16.gmra.mrb[28].mxu1 %vm1304_vm10, %v4821_v22 }
 0xb42   : > { %v3578_v44 = vpop.f32.mrb[24].mxu1 }
 0xb43   : > { %v3621_v0 = vadd.f32 %v3604_v63, %v3578_v44  ;;  %v3580_v12 = vpop.f32.mrb[25].mxu1 }
 0xb44   : > { %v3582_v45 = vpop.f32.mrb[26].mxu1  ;;  %v3622_v41 = vadd.f32 %v3604_v63, %v3580_v12 }
 0xb45   : > { %v7948_v61 = vmax.f32 %v3621_v0, 0.0  ;;  %v3623_v4 = vadd.f32 %v3609_v50, %v3582_v45  ;;  %v3584_v34 = vpop.f32.mrb[27].mxu1 }
 0xb46   : > { %v3624_v56 = vadd.f32 %v3609_v50, %v3584_v34  ;;  %v7970_v33 = vmax.f32 %v3622_v41, 0.0 }
 0xb47   : > { %v7950_v20 = vmax.f32 %v3623_v4, 0.0  ;;  %3637 = vrot.lane.b32.xlu1 %v7948_v61, %s8708_s0 }
 0xb48   : > { %v7974_v30 = vmax.f32 %v3624_v56, 0.0 }
 0xb49   : > { %3639 = vrot.lane.b32.xlu0 %v7950_v20, %s8708_s0 }
 0xb4a   : > { %v3588_v27 = vpop.f32.mrb[28].mxu1 }
 0xb4b   : > { %3669 = vrot.lane.b32.xlu1 %v7948_v61, %s8709_s1  ;;  %v3590_v53 = vpop.f32.mrb[29].mxu1  ;;  %v3625_v52 = vadd.f32 %v3614_v13, %v3588_v27 }
 0xb4c   : > { %v3592_v28 = vpop.f32.mrb[30].mxu1  ;;  %v3626_v46 = vadd.f32 %v3614_v13, %v3590_v53 }
 0xb4d   : > { %v3594_v29 = vpop.f32.mrb[31].mxu1  ;;  %3671 = vrot.lane.b32.xlu0 %v7950_v20, %s8709_s1  ;;  %v3627_v59 = vadd.f32 %v3619_v26, %v3592_v28  ;;  %v7990_v55 = vmax.f32 %v3625_v52, 0.0 }
 0xb4e   : > { %v3628_v54 = vadd.f32 %v3619_v26, %v3594_v29  ;;  %v8010_v8 = vmax.f32 %v3626_v46, 0.0 }
 0xb4f   : > { %3701 = vrot.lane.b32.xlu1 %v7948_v61, %s8661_s28  ;;  %v7994_v60 = vmax.f32 %v3627_v59, 0.0 }
 0xb50   : > { %v8014_v36 = vmax.f32 %v3628_v54, 0.0 }
 0xb51   : > { %3703 = vrot.lane.b32.xlu0 %v7950_v20, %s8661_s28 }
 0xb53   : > { %3733 = vrot.lane.b32.xlu1 %v7948_v61, %s8662_s23 }
 0xb55   : > { %3735 = vrot.lane.b32.xlu0 %v7950_v20, %s8662_s23 }
 0xb57   : > { %3765 = vrot.lane.b32.xlu1 %v7948_v61, %s8663_s26 }
 0xb59   : > { %3767 = vrot.lane.b32.xlu0 %v7950_v20, %s8663_s26 }
 0xb5b   : > { %3645 = vrot.lane.b32.xlu1 %v7970_v33, %s8708_s0 }
 0xb5d   : > { %3647 = vrot.lane.b32.xlu0 %v7974_v30, %s8708_s0 }
 0xb5f   : > { %3677 = vrot.lane.b32.xlu1 %v7970_v33, %s8709_s1 }
 0xb61   : > { %3679 = vrot.lane.b32.xlu0 %v7974_v30, %s8709_s1 }
 0xb63   : > { %3709 = vrot.lane.b32.xlu1 %v7970_v33, %s8661_s28 }
 0xb65   : > { %3711 = vrot.lane.b32.xlu0 %v7974_v30, %s8661_s28 }
 0xb67   : > { %3741 = vrot.lane.b32.xlu1 %v7970_v33, %s8662_s23 }
 0xb69   : > { %3743 = vrot.lane.b32.xlu0 %v7974_v30, %s8662_s23 }
 0xb6b   : > { %3641 = vrot.lane.b32.xlu1 %v7990_v55, %s8708_s0 }
 0xb6d   : > { %3643 = vrot.lane.b32.xlu0 %v7994_v60, %s8708_s0 }
 0xb6f   : > { %3673 = vrot.lane.b32.xlu1 %v7990_v55, %s8709_s1 }
 0xb71   : > { %3675 = vrot.lane.b32.xlu0 %v7994_v60, %s8709_s1 }
 0xb73   : > { %3705 = vrot.lane.b32.xlu1 %v7990_v55, %s8661_s28 }
 0xb75   : > { %3707 = vrot.lane.b32.xlu0 %v7994_v60, %s8661_s28 }
 0xb77   : > { %3737 = vrot.lane.b32.xlu1 %v7990_v55, %s8662_s23 }
 0xb79   : > { %3739 = vrot.lane.b32.xlu0 %v7994_v60, %s8662_s23 }
 0xb7b   : > { %3649 = vrot.lane.b32.xlu1 %v8010_v8, %s8708_s0 }
 0xb7d   : > { %3651 = vrot.lane.b32.xlu0 %v8014_v36, %s8708_s0 }
 0xb7f   : > { %3773 = vrot.lane.b32.xlu1 %v7970_v33, %s8663_s26 }
 0xb81   : > { %3775 = vrot.lane.b32.xlu0 %v7974_v30, %s8663_s26 }
 0xb83   : > { %3681 = vrot.lane.b32.xlu1 %v8010_v8, %s8709_s1 }
 0xb85   : > { %3683 = vrot.lane.b32.xlu0 %v8014_v36, %s8709_s1 }
 0xb87   : > { %3713 = vrot.lane.b32.xlu1 %v8010_v8, %s8661_s28 }
 0xb89   : > { %3771 = vrot.lane.b32.xlu0 %v7994_v60, %s8663_s26 }
 0xb8b   : > { %3745 = vrot.lane.b32.xlu1 %v8010_v8, %s8662_s23 }
 0xb8d   : > { %3715 = vrot.lane.b32.xlu0 %v8014_v36, %s8661_s28 }
 0xb8f   : > { %3769 = vrot.lane.b32.xlu1 %v7990_v55, %s8663_s26 }
 0xb91   : > { %3799 = vrot.lane.b32.xlu0 %v7950_v20, %s8664_s5 }
 0xb93   : > { %3777 = vrot.lane.b32.xlu1 %v8010_v8, %s8663_s26 }
 0xb95   : > { %3747 = vrot.lane.b32.xlu0 %v8014_v36, %s8662_s23 }
 0xb97   : > { %3797 = vrot.lane.b32.xlu1 %v7948_v61, %s8664_s5 }
 0xb99   : > { %3807 = vrot.lane.b32.xlu0 %v7974_v30, %s8664_s5 }
 0xb9b   : > { %3805 = vrot.lane.b32.xlu1 %v7970_v33, %s8664_s5 }
 0xb9d   : > { %3803 = vrot.lane.b32.xlu0 %v7994_v60, %s8664_s5 }
 0xb9f   : > { %3801 = vrot.lane.b32.xlu1 %v7990_v55, %s8664_s5 }
 0xba1   : > { %3831 = vrot.lane.b32.xlu0 %v7950_v20, %s8665_s30 }
 0xba3   : > { %3809 = vrot.lane.b32.xlu1 %v8010_v8, %s8664_s5 }
 0xba5   : > { %3779 = vrot.lane.b32.xlu0 %v8014_v36, %s8663_s26  ;;  %s4744_s26 = smul.u32 48, %s8888_s25 }
 0xba7   : > { %3829 = vrot.lane.b32.xlu1 %v7948_v61, %s8665_s30  ;;  %s681_s0 = scalar_lea.vmem %s8506_s21, %s4744_s26 }
 0xba9   : > { %3839 = vrot.lane.b32.xlu0 %v7974_v30, %s8665_s30 }
 0xbab   : > { %3837 = vrot.lane.b32.xlu1 %v7970_v33, %s8665_s30 }
 0xbad   : > { %3811 = vrot.lane.b32.xlu0 %v8014_v36, %s8664_s5 }
 0xbaf   : > { %3833 = vrot.lane.b32.xlu1 %v7990_v55, %s8665_s30 }
 0xbb1   : > { %3835 = vrot.lane.b32.xlu0 %v7994_v60, %s8665_s30 }
 0xbb3   : > { %3841 = vrot.lane.b32.xlu1 %v8010_v8, %s8665_s30 }
 0xbb5   : > { %3843 = vrot.lane.b32.xlu0 %v8014_v36, %s8665_s30 }
 0xbb7   : > { %3861 = vrot.lane.b32.xlu1 %v7948_v61, %s4872_s24 }
 0xbb9   : > { %v3638_v25 = vpop.permute.xlu1 %3637  ;;  %3863 = vrot.lane.b32.xlu0 %v7950_v20, %s4872_s24 }
 0xbbb   : > { %3869 = vrot.lane.b32.xlu1 %v7970_v33, %s4872_s24  ;;  %v3640_v35 = vpop.permute.xlu0 %3639 }
 0xbbd   : > { %v3670_v57 = vpop.permute.xlu1 %3669  ;;  %3871 = vrot.lane.b32.xlu0 %v7974_v30, %s4872_s24 }
 0xbbf   : > { %3865 = vrot.lane.b32.xlu1 %v7990_v55, %s4872_s24  ;;  %v3672_v49 = vpop.permute.xlu0 %3671 }
 0xbc1   : > { %v8089_v42 = vpop.permute.xlu1 %3701  ;;  %3867 = vrot.lane.b32.xlu0 %v7994_v60, %s4872_s24 }
 0xbc3   : > { %3873 = vrot.lane.b32.xlu1 %v8010_v8, %s4872_s24  ;;  %v8095_v15 = vpop.permute.xlu0 %3703 }
 0xbc5   : > { %v8100_v11 = vpop.permute.xlu1 %3733  ;;  %3875 = vrot.lane.b32.xlu0 %v8014_v36, %s4872_s24  ;;  %s8884_s24 = sld [smem:[#allocation113_spill]] }
 0xbc7   : > { %4212 = vperm.xlu1 %4763, %v4207_v21   ;;  %v8107_v10 = vpop.permute.xlu0 %3735 }
 0xbc9   : > { %v3766_v23 = vpop.permute.xlu1 %3765  ;;  %4217 = vperm.xlu0 %4762, %v4208_v1  }
 0xbcb   : > { %4222 = vperm.xlu1 %4763, %v4209_v14   ;;  %v3768_v24 = vpop.permute.xlu0 %3767 }
 0xbcd   : > { %v3646_v2 = vpop.permute.xlu1 %3645 }
 0xbce   : > { %v3653_v31 = vsel %vm695_vm1, %v3638_v25, %v3646_v2  ;;  %v3657_v51 = vsel %vm695_vm1, %v3646_v2, %v3638_v25 }
 0xbcf   : > { %v3648_v3 = vpop.permute.xlu0 %3647  ;;  %v3661_v63 = vmul.f32 %v3657_v51, %v5077_v18  ;;  %v3662_v44 = vmul.f32 %v3653_v31, %v5071_v16 }
 0xbd0   : > { %v3654_v58 = vsel %vm695_vm1, %v3640_v35, %v3648_v3  ;;  %v3658_v22 = vsel %vm695_vm1, %v3648_v3, %v3640_v35 }
 0xbd1   : > { %v3663_v0 = vmul.f32 %v3658_v22, %v5077_v18  ;;  %v3664_v12 = vmul.f32 %v3654_v58, %v5071_v16  ;;  %v3678_v50 = vpop.permute.xlu1 %3677 }
 0xbd2   : > { %v3685_v1 = vsel %vm712_vm0, %v3670_v57, %v3678_v50  ;;  %v3689_v14 = vsel %vm712_vm0, %v3678_v50, %v3670_v57 }
 0xbd3   : > { %v3893_v45 = vpack.c.bf16 %v3663_v0, %v3661_v63  ;;  %v3680_v4 = vpop.permute.xlu0 %3679  ;;  %v3894_v34 = vpack.c.bf16 %v3664_v12, %v3662_v44  ;;  %v3694_v12 = vmul.f32 %v3685_v1, %v5074_v17 }
 0xbd4   : > { %v3686_v62 = vsel %vm712_vm0, %v3672_v49, %v3680_v4  ;;  %v3690_v31 = vsel %vm712_vm0, %v3680_v4, %v3672_v49 }
 0xbd5   : > { %v8124_v27 = vpop.permute.xlu1 %3709  ;;  %3972 = vmatprep.subr.bf16.mxu0 %v3894_v34  ;;  %v3696_v51 = vmul.f32 %v3686_v62, %v5074_v17  ;;  %v3695_v4 = vmul.f32 %v3690_v31, %v5080_v19 }
 0xbd6   : > { %3973 = vmatpush1.bf16.msra.mxu0 %v3893_v45  ;;  %v3693_v45 = vmul.f32 %v3689_v14, %v5080_v19 }
 0xbd7   : > { %v3712_v53 = vpop.permute.xlu0 %3711 }
 0xbd8   : > { %v3897_v31 = vpack.c.bf16 %v3695_v4, %v3693_v45 }
 0xbd9   : > { %v8126_v28 = vpop.permute.xlu1 %3741 }
 0xbdb   : > { %v8128_v29 = vpop.permute.xlu0 %3743 }
 0xbdd   : > { %v3642_v41 = vpop.permute.xlu1 %3641 }
 0xbdf   : > { %v3644_v56 = vpop.permute.xlu0 %3643 }
 0xbe1   : > { %v3674_v13 = vpop.permute.xlu1 %3673 }
 0xbe3   : > { %v3676_v52 = vpop.permute.xlu0 %3675 }
 0xbe5   : > { %v8130_v26 = vpop.permute.xlu1 %3705 }
 0xbe7   : > { %v8132_v59 = vpop.permute.xlu0 %3707 }
 0xbe9   : > { %v8134_v46 = vpop.permute.xlu1 %3737 }
 0xbeb   : > { %v8136_v54 = vpop.permute.xlu0 %3739 }
 0xbed   : > { %v3650_v25 = vpop.permute.xlu1 %3649 }
 0xbee   : > { %v3655_v35 = vsel %vm695_vm1, %v3642_v41, %v3650_v25  ;;  %v3659_v21 = vsel %vm695_vm1, %v3650_v25, %v3642_v41  ;;  %v3898_v25 = vpack.c.bf16 %v3696_v51, %v3694_v12  ;;  %v3717_v51 = vsel %vm729_vm2, %v8089_v42, %v8124_v27 }
 0xbef   : > { %v3652_v2 = vpop.permute.xlu0 %3651  ;;  %v3665_v22 = vmul.f32 %v3659_v21, %v5077_v18  ;;  %v3666_v63 = vmul.f32 %v3655_v35, %v5071_v16 }
 0xbf0   : > { %v3656_v3 = vsel %vm695_vm1, %v3644_v56, %v3652_v2  ;;  %v3660_v58 = vsel %vm695_vm1, %v3652_v2, %v3644_v56 }
 0xbf1   : > { %v3667_v44 = vmul.f32 %v3660_v58, %v5077_v18  ;;  %v3668_v57 = vmul.f32 %v3656_v3, %v5071_v16  ;;  %v3774_v0 = vpop.permute.xlu1 %3773  ;;  %v3718_v16 = vsel %vm729_vm2, %v8095_v15, %v3712_v53 }
 0xbf2   : > { %v3781_v49 = vsel %vm763_vm4, %v3766_v23, %v3774_v0  ;;  %v3785_v50 = vsel %vm763_vm4, %v3774_v0, %v3766_v23 }
 0xbf3   : > { %v3895_v34 = vpack.c.bf16 %v3667_v44, %v3665_v22  ;;  %v3776_v41 = vpop.permute.xlu0 %3775  ;;  %v3896_v56 = vpack.c.bf16 %v3668_v57, %v3666_v63  ;;  %v8174_v23 = vmul.f32 %v3781_v49, %v5121_v47  ;;  %v8177_v35 = vmul.f32 %v3785_v50, %v5124_v48 }
 0xbf4   : > { %v3782_v18 = vsel %vm763_vm4, %v3768_v24, %v3776_v41  ;;  %v3786_v62 = vsel %vm763_vm4, %v3776_v41, %v3768_v24  ;;  %v3722_v63 = vsel %vm729_vm2, %v3712_v53, %v8095_v15  ;;  %v3721_v15 = vsel %vm729_vm2, %v8124_v27, %v8089_v42 }
 0xbf5   : > { %v8180_v21 = vmul.f32 %v3782_v18, %v5121_v47  ;;  %v8183_v1 = vmul.f32 %v3786_v62, %v5124_v48  ;;  %v3682_v14 = vpop.permute.xlu1 %3681  ;;  %3974 = vmatprep.subr.bf16.mxu0 %v3896_v56  ;;  %v3726_v53 = vmul.f32 %v3717_v51, %v5103_v38  ;;  %v3727_v4 = vmul.f32 %v3722_v63, %v5100_v37 }
 0xbf6   : > { %v3687_v2 = vsel %vm712_vm0, %v3674_v13, %v3682_v14  ;;  %v3691_v24 = vsel %vm712_vm0, %v3682_v14, %v3674_v13  ;;  %3975 = vmatpush1.bf16.msra.mxu0 %v3895_v34  ;;  %v3728_v13 = vmul.f32 %v3718_v16, %v5103_v38  ;;  %v3725_v56 = vmul.f32 %v3721_v15, %v5100_v37 }
 0xbf7   : > { %v3913_v3 = vpack.c.bf16 %v8180_v21, %v8174_v23  ;;  %3976 = vmatprep.subr.bf16.mxu0 %v3898_v25  ;;  %v3684_v58 = vpop.permute.xlu0 %3683  ;;  %v3914_v22 = vpack.c.bf16 %v8183_v1, %v8177_v35  ;;  %v3697_v0 = vmul.f32 %v3691_v24, %v5080_v19  ;;  %v3698_v12 = vmul.f32 %v3687_v2, %v5074_v17 }
 0xbf8   : > { %v3688_v44 = vsel %vm712_vm0, %v3676_v52, %v3684_v58  ;;  %v3692_v57 = vsel %vm712_vm0, %v3684_v58, %v3676_v52  ;;  %v3902_v16 = vpack.c.bf16 %v3728_v13, %v3726_v53  ;;  %v3901_v18 = vpack.c.bf16 %v3727_v4, %v3725_v56 }
 0xbf9   : > { %v3699_v49 = vmul.f32 %v3692_v57, %v5080_v19  ;;  %v3700_v50 = vmul.f32 %v3688_v44, %v5074_v17  ;;  %v3714_v45 = vpop.permute.xlu1 %3713  ;;  %v3750_v17 = vsel %vm746_vm3, %v8107_v10, %v8128_v29  ;;  %v3749_v62 = vsel %vm746_vm3, %v8100_v11, %v8126_v28 }
 0xbfa   : > { %3977 = vmatpush1.bf16.msra.mxu0 %v3897_v31  ;;  %v3719_v42 = vsel %vm729_vm2, %v8130_v26, %v3714_v45  ;;  %v3723_v27 = vsel %vm729_vm2, %v3714_v45, %v8130_v26  ;;  %v3754_v14 = vsel %vm746_vm3, %v8128_v29, %v8107_v10  ;;  %v3760_v2 = vmul.f32 %v3750_v17, %v5109_v40 }
 0xbfb   : > { %v3899_v52 = vpack.c.bf16 %v3699_v49, %v3697_v0  ;;  %v8215_v34 = vpop.permute.xlu0 %3771  ;;  %v3900_v41 = vpack.c.bf16 %v3700_v50, %v3698_v12  ;;  %v3729_v31 = vmul.f32 %v3723_v27, %v5100_v37  ;;  %v3730_v51 = vmul.f32 %v3719_v42, %v5103_v38 }
 0xbfc   : > { %v3753_v10 = vsel %vm746_vm3, %v8126_v28, %v8100_v11  ;;  %v3758_v29 = vmul.f32 %v3749_v62, %v5109_v40  ;;  %v3759_v0 = vmul.f32 %v3754_v14, %v5106_v39  ;;  %v3910_v42 = vpack.c.bf16 %v7974_v30, %v7970_v33 }
 0xbfd   : > { %v3746_v19 = vpop.permute.xlu1 %3745  ;;  %3978 = vmatprep.subr.bf16.mxu0 %v3900_v41  ;;  %v3909_v27 = vpack.c.bf16 %v7950_v20, %v7948_v61 }
 0xbfe   : > { %3979 = vmatpush1.bf16.msra.mxu0 %v3899_v52  ;;  %v3906_v49 = vpack.c.bf16 %v3760_v2, %v3758_v29  ;;  %v3755_v11 = vsel %vm746_vm3, %v3746_v19, %v8134_v46 }
 0xbff   : > { %3980 = vmatprep.subr.bf16.mxu0 %v3902_v16  ;;  %v3716_v25 = vpop.permute.xlu0 %3715  ;;  %v3761_v53 = vmul.f32 %v3755_v11, %v5106_v39 }
 0xc00   : > { %v3720_v26 = vsel %vm729_vm2, %v8132_v59, %v3716_v25  ;;  %v3724_v24 = vsel %vm729_vm2, %v3716_v25, %v8132_v59  ;;  %v3911_v25 = vpack.c.bf16 %v7994_v60, %v7990_v55 }
 0xc01   : > { %v3731_v58 = vmul.f32 %v3724_v24, %v5100_v37  ;;  %v3732_v63 = vmul.f32 %v3720_v26, %v5103_v38  ;;  %v3770_v13 = vpop.permute.xlu1 %3769  ;;  %v3757_v37 = vmul.f32 %v3753_v10, %v5106_v39  ;;  %v3751_v38 = vsel %vm746_vm3, %v8134_v46, %v3746_v19 }
 0xc02   : > { %3981 = vmatpush1.bf16.msra.mxu0 %v3901_v18  ;;  %v3762_v4 = vmul.f32 %v3751_v38, %v5109_v40 }
 0xc03   : > { %v3903_v44 = vpack.c.bf16 %v3731_v58, %v3729_v31  ;;  %v3800_v57 = vpop.permute.xlu0 %3799  ;;  %v3904_v59 = vpack.c.bf16 %v3732_v63, %v3730_v51  ;;  %v3905_v50 = vpack.c.bf16 %v3759_v0, %v3757_v37 }
 0xc05   : > { %v3778_v12 = vpop.permute.xlu1 %3777  ;;  %3982 = vmatprep.subr.bf16.mxu0 %v3904_v59 }
 0xc06   : > { %3983 = vmatpush1.bf16.msra.mxu0 %v3903_v44  ;;  %v3783_v62 = vsel %vm763_vm4, %v3770_v13, %v3778_v12  ;;  %v3787_v30 = vsel %vm763_vm4, %v3778_v12, %v3770_v13 }
 0xc07   : > { %3984 = vmatprep.subr.bf16.mxu0 %v3906_v49  ;;  %v3748_v28 = vpop.permute.xlu0 %3747  ;;  %v3793_v20 = vmul.f32 %v3783_v62, %v5121_v47  ;;  %v3794_v2 = vmul.f32 %v3787_v30, %v5124_v48  ;;  %v3939_v30 = vld [vmem:[%s8502_s17 + $0x18] sm:$0xff] }
 0xc08   : > { %v3752_v45 = vsel %vm746_vm3, %v8136_v54, %v3748_v28  ;;  %v3756_v15 = vsel %vm746_vm3, %v3748_v28, %v8136_v54 }
 0xc09   : > { %v3763_v52 = vmul.f32 %v3756_v15, %v5106_v39  ;;  %v3764_v46 = vmul.f32 %v3752_v45, %v5109_v40  ;;  %v3798_v41 = vpop.permute.xlu1 %3797  ;;  %v3912_v39 = vpack.c.bf16 %v8014_v36, %v8010_v8 }
 0xc0a   : > { %3985 = vmatpush1.bf16.msra.mxu0 %v3905_v50 }
 0xc0b   : > { %v3907_v56 = vpack.c.bf16 %v3763_v52, %v3761_v53  ;;  %v3808_v17 = vpop.permute.xlu0 %3807  ;;  %v3908_v19 = vpack.c.bf16 %v3764_v46, %v3762_v4 }
 0xc0c   : > { %v3818_v36 = vsel %vm780_vm5, %v3808_v17, %v3800_v57  ;;  %v3814_v24 = vsel %vm780_vm5, %v3800_v57, %v3808_v17 }
 0xc0d   : > { %v3806_v16 = vpop.permute.xlu1 %3805  ;;  %3986 = vmatprep.subr.bf16.mxu0 %v3908_v19  ;;  %v3824_v31 = vmul.f32 %v3818_v36, %v5146_v7 }
 0xc0e   : > { %3987 = vmatpush1.bf16.msra.mxu0 %v3907_v56  ;;  %v3817_v61 = vsel %vm780_vm5, %v3806_v16, %v3798_v41  ;;  %v3813_v55 = vsel %vm780_vm5, %v3798_v41, %v3806_v16 }
 0xc0f   : > { %3988 = vmatprep.subr.bf16.mxu0 %v3910_v42  ;;  %v3804_v54 = vpop.permute.xlu0 %3803  ;;  %v3822_v35 = vmul.f32 %v3817_v61, %v5146_v7 }
 0xc11   : > { %v3802_v18 = vpop.permute.xlu1 %3801  ;;  %v3918_v29 = vpack.c.bf16 %v3824_v31, %v3822_v35  ;;  %v4853_v35 = vld [vmem:[%s8656_s27 + $0x18] ss:$0 sm:$0xff] }
 0xc12   : > { %3989 = vmatpush1.bf16.msra.mxu0 %v3909_v27 }
 0xc13   : > { %3990 = vmatprep.subr.bf16.mxu0 %v3912_v39  ;;  %v3832_v40 = vpop.permute.xlu0 %3831 }
 0xc15   : > { %v3810_v33 = vpop.permute.xlu1 %3809 }
 0xc16   : > { %3991 = vmatpush1.bf16.msra.mxu0 %v3911_v25  ;;  %v3819_v13 = vsel %vm780_vm5, %v3810_v33, %v3802_v18 }
 0xc17   : > { %3992 = vmatprep.subr.bf16.mxu0 %v3914_v22  ;;  %v3780_v8 = vpop.permute.xlu0 %3779  ;;  %v3826_v57 = vmul.f32 %v3819_v13, %v5146_v7 }
 0xc18   : > { %v3784_v60 = vsel %vm763_vm4, %v8215_v34, %v3780_v8  ;;  %v3788_v14 = vsel %vm763_vm4, %v3780_v8, %v8215_v34  ;;  %v3821_v34 = vmul.f32 %v3813_v55, %v5143_v6  ;;  %v4619_v8 = vcombine.high %v3939_v30, %v3939_v30 }
 0xc19   : > { %v3795_v1 = vmul.f32 %v3784_v60, %v5121_v47  ;;  %v3796_v22 = vmul.f32 %v3788_v14, %v5124_v48  ;;  %v3830_v26 = vpop.permute.xlu1 %3829  ;;  %v3815_v47 = vsel %vm780_vm5, %v3802_v18, %v3810_v33  ;;  %v3823_v48 = vmul.f32 %v3814_v24, %v5143_v6  ;;  %v4852_v14 = vld [vmem:[%s8656_s27 + $0x10] ss:$0 sm:$0xff] }
 0xc1a   : > { %3993 = vmatpush1.bf16.msra.mxu0 %v3913_v3  ;;  %v3825_v3 = vmul.f32 %v3815_v47, %v5143_v6 }
 0xc1b   : > { %v3915_v51 = vpack.c.bf16 %v3795_v1, %v3793_v20  ;;  %v3840_v58 = vpop.permute.xlu0 %3839  ;;  %v3916_v63 = vpack.c.bf16 %v3796_v22, %v3794_v2  ;;  %v3917_v21 = vpack.c.bf16 %v3823_v48, %v3821_v34  ;;  %v4822_v20 = vld [vmem:[%s8502_s17] ss:$12 sps:$4 sm:$0xff]  }
 0xc1c   : > { %v3850_v59 = vsel %vm797_vm6, %v3840_v58, %v3832_v40  ;;  %v3846_v50 = vsel %vm797_vm6, %v3832_v40, %v3840_v58 }
 0xc1d   : > { %v3838_v10 = vpop.permute.xlu1 %3837  ;;  %3994 = vmatprep.subr.bf16.mxu0 %v3916_v63  ;;  %v3856_v45 = vmul.f32 %v3850_v59, %v8697_v32  ;;  %v3855_v56 = vmul.f32 %v3846_v50, %v8740_v5  ;;  %v4618_v63 = vcombine.low %v3939_v30, %v3939_v30  ;;  %v8853_v50 = vld [vmem:[#allocation11_spill] sm:$0xff]  ;;  %v8876_v30 = vld [vmem:[#allocation34_spill] sm:$0xff] }
 0xc1e   : > { %v3849_v23 = vsel %vm797_vm6, %v3838_v10, %v3830_v26  ;;  %3995 = vmatpush1.bf16.msra.mxu0 %v3915_v51  ;;  %v3845_v49 = vsel %vm797_vm6, %v3830_v26, %v3838_v10 }
 0xc1f   : > { %3996 = vmatprep.subr.bf16.mxu0 %v3918_v29  ;;  %v3812_v44 = vpop.permute.xlu0 %3811  ;;  %v3854_v37 = vmul.f32 %v3849_v23, %v8697_v32  ;;  %v3853_v52 = vmul.f32 %v3845_v49, %v8740_v5  ;;  %v8850_v49 = vld [vmem:[#allocation8_spill] sm:$0xff] }
 0xc20   : > { %v3816_v0 = vsel %vm780_vm5, %v3804_v54, %v3812_v44  ;;  %v3820_v12 = vsel %vm780_vm5, %v3812_v44, %v3804_v54 }
 0xc21   : > { %v3827_v38 = vmul.f32 %v3816_v0, %v5143_v6  ;;  %v3828_v11 = vmul.f32 %v3820_v12, %v5146_v7  ;;  %v3834_v28 = vpop.permute.xlu1 %3833  ;;  %v3922_v41 = vpack.c.bf16 %v3856_v45, %v3854_v37  ;;  %v3921_v19 = vpack.c.bf16 %v3855_v56, %v3853_v52  ;;  %v4827_v0 = vld [vmem:[%s8502_s17 + $0x8] ss:$12 sps:$4 sm:$0xff]   ;;  %v8848_v12 = vld [vmem:[#allocation6_spill] sm:$0xff]  ;;  %v4828_v37 = vld [vmem:[%s8502_s17 + $0x20] ss:$0 sps:$4 sm:$0xff]  }
 0xc22   : > { %3997 = vmatpush1.bf16.msra.mxu0 %v3917_v21  ;;  %v8854_v45 = vld [vmem:[#allocation12_spill] sm:$0xff]  ;;  %v8861_v56 = vld [vmem:[#allocation19_spill] sm:$0xff] }
 0xc23   : > { %v3919_v15 = vpack.c.bf16 %v3827_v38, %v3825_v3  ;;  %v3836_v53 = vpop.permute.xlu0 %3835  ;;  %v3920_v4 = vpack.c.bf16 %v3828_v11, %v3826_v57  ;;  %v8851_v38 = vld [vmem:[#allocation9_spill] sm:$0xff]  ;;  %v8858_v52 = vld [vmem:[#allocation16_spill] sm:$0xff] }
 0xc24   : > { %v4831_v11 = vld [vmem:[%s8501_s16 + $0x4] ss:$12 sps:$4 sm:$0xff]  }
 0xc25   : > { %v3842_v46 = vpop.permute.xlu1 %3841  ;;  %3998 = vmatprep.subr.bf16.mxu0 %v3920_v4  ;;  %v8857_v4 = vld [vmem:[#allocation15_spill] sm:$0xff] }
 0xc26   : > { %v3847_v6 = vsel %vm797_vm6, %v3834_v28, %v3842_v46  ;;  %v3851_v7 = vsel %vm797_vm6, %v3842_v46, %v3834_v28  ;;  %3999 = vmatpush1.bf16.msra.mxu0 %v3919_v15  ;;  %v8852_v28 = vld [vmem:[#allocation10_spill] sm:$0xff]  ;;  %v8855_v15 = vld [vmem:[#allocation13_spill] sm:$0xff] }
 0xc27   : > { %4000 = vmatprep.subr.bf16.mxu0 %v3922_v41  ;;  %v3844_v17 = vpop.permute.xlu0 %3843  ;;  %v3857_v54 = vmul.f32 %v3847_v6, %v8740_v5  ;;  %v3858_v27 = vmul.f32 %v3851_v7, %v8697_v32  ;;  %v8859_v46 = vld [vmem:[#allocation17_spill] sm:$0xff]  ;;  %v8860_v41 = vld [vmem:[#allocation18_spill] sm:$0xff]  ;;  %v8862_v6 = vld [vmem:[#allocation20_spill] sm:$0xff] }
 0xc28   : > { %v3848_v16 = vsel %vm797_vm6, %v3836_v53, %v3844_v17  ;;  %v3852_v42 = vsel %vm797_vm6, %v3844_v17, %v3836_v53  ;;  %v8856_v53 = vld [vmem:[#allocation14_spill] sm:$0xff]  ;;  %v8863_v7 = vld [vmem:[#allocation21_spill] sm:$0xff] }
 0xc29   : > { %v3859_v18 = vmul.f32 %v3848_v16, %v8740_v5  ;;  %v3860_v39 = vmul.f32 %v3852_v42, %v8697_v32  ;;  %v3862_v40 = vpop.permute.xlu1 %3861  ;;  %v8864_v17 = vld [vmem:[#allocation22_spill] sm:$0xff]  ;;  %v8866_v16 = vld [vmem:[#allocation24_spill] sm:$0xff]  ;;  %v8867_v42 = vld [vmem:[#allocation25_spill] sm:$0xff] }
 0xc2a   : > { %4001 = vmatpush1.bf16.msra.mxu0 %v3921_v19  ;;  %v8865_v19 = vld [vmem:[#allocation23_spill] sm:$0xff] }
 0xc2b   : > { %v3923_v62 = vpack.c.bf16 %v3859_v18, %v3857_v54  ;;  %v3864_v25 = vpop.permute.xlu0 %3863  ;;  %v3924_v33 = vpack.c.bf16 %v3860_v39, %v3858_v27  ;;  %v8868_v54 = vld [vmem:[#allocation26_spill] sm:$0xff]  ;;  %v8869_v27 = vld [vmem:[#allocation27_spill] sm:$0xff]  ;;  %v8870_v18 = vld [vmem:[#allocation5_spill] sm:$0xff] }
 0xc2c   : > { %v8871_v39 = vld [vmem:[#allocation28_spill] sm:$0xff] }
 0xc2d   : > { %v3870_v61 = vpop.permute.xlu1 %3869  ;;  %4002 = vmatprep.subr.bf16.mxu0 %v3924_v33  ;;  %v8875_v33 = vld [vmem:[#allocation33_spill] sm:$0xff] }
 0xc2e   : > { %v3877_v5 = vsel %vm814_vm7, %v3862_v40, %v3870_v61  ;;  %v3881_v32 = vsel %vm814_vm7, %v3870_v61, %v3862_v40  ;;  %4003 = vmatpush1.bf16.msra.mxu0 %v3923_v62  ;;  %v8872_v40 = vld [vmem:[#allocation30_spill] sm:$0xff]  ;;  %v8873_v62 = vld [vmem:[#allocation32_spill] sm:$0xff]  ;;  %v8877_v61 = vld [vmem:[#allocation35_spill] sm:$0xff] }
 0xc2f   : > { %v3872_v36 = vpop.permute.xlu0 %3871  ;;  %v3885_v2 = vmul.f32 %v4852_v14, %v3877_v5  ;;  %v3886_v1 = vmul.f32 %v4853_v35, %v3881_v32  ;;  %v3933_v5 = vld [vmem:[%s8501_s16 + $0x18] sm:$0xff]  ;;  %v4829_v32 = vld [vmem:[%s8501_s16] ss:$12 sps:$4 sm:$0xff]  }
 0xc30   : > { %v3878_v55 = vsel %vm814_vm7, %v3864_v25, %v3872_v36  ;;  %v3882_v60 = vsel %vm814_vm7, %v3872_v36, %v3864_v25  ;;  %v8874_v25 = vld [vmem:[#allocation4_spill] sm:$0xff]  ;;  %v4627_v36 = vcombine.high %v3933_v5, %v3933_v5 }
 0xc31   : > { %v3887_v22 = vmul.f32 %v4852_v14, %v3878_v55  ;;  %v3888_v26 = vmul.f32 %v4853_v35, %v3882_v60  ;;  %v3866_v24 = vpop.permute.xlu1 %3865  ;;  %4005 = vmatmul.mubr.bf16.vlgmr.msra.gmra.mrb[32].mxu0 %v4822_v20  ;;  %v8878_v20 = vld [vmem:[#allocation36_spill] sm:$0xff]  ;;  %v8880_v55 = vld [vmem:[#allocation31_spill] sm:$0xff]  ;;  %v8881_v60 = vld [vmem:[#allocation29_spill] sm:$0xff] }
 0xc32   : > { %4014 = vmatprep.mubr.bf16.mxu0 %v4619_v8  ;;  %v8879_v8 = vld [vmem:[#allocation37_spill] sm:$0xff] }
 0xc33   : > { %v3925_v31 = vpack.c.bf16 %v3887_v22, %v3885_v2  ;;  %v3868_v34 = vpop.permute.xlu0 %3867  ;;  %v3926_v51 = vpack.c.bf16 %v3888_v26, %v3886_v1  ;;  %v4626_v2 = vcombine.low %v3933_v5, %v3933_v5  ;;  %v4834_v1 = vld [vmem:[%s8501_s16 + $0x8] ss:$12 sps:$4 sm:$0xff]   ;;  %v4835_v22 = vld [vmem:[%s8501_s16 + $0x20] ss:$0 sps:$4 sm:$0xff]  }
 0xc35   : > { %v3874_v58 = vpop.permute.xlu1 %3873  ;;  %4023 = vmatprep.subr.bf16.mxu0 %v3926_v51 }
 0xc36   : > { %v3879_v47 = vsel %vm814_vm7, %v3866_v24, %v3874_v58  ;;  %v3883_v48 = vsel %vm814_vm7, %v3874_v58, %v3866_v24  ;;  %4024 = vmatpush1.bf16.msra.mxu0 %v3925_v31 }
 0xc37   : > { %v3876_v13 = vpop.permute.xlu0 %3875  ;;  %v3889_v23 = vmul.f32 %v4852_v14, %v3879_v47  ;;  %v3890_v21 = vmul.f32 %v4853_v35, %v3883_v48 }
 0xc38   : > { %v3880_v10 = vsel %vm814_vm7, %v3868_v34, %v3876_v13  ;;  %v3884_v29 = vsel %vm814_vm7, %v3876_v13, %v3868_v34 }
 0xc39   : > { %v3891_v3 = vmul.f32 %v4852_v14, %v3880_v10  ;;  %v3892_v44 = vmul.f32 %v4853_v35, %v3884_v29  ;;  %4015 = vmatmul.mubr.bf16.gmra.mrb[36].mxu0 %v4618_v63  ;;  %v8882_v14 = vld [vmem:[#allocation39_spill] sm:$0xff]  ;;  %v8883_v35 = vld [vmem:[#allocation38_spill] sm:$0xff] }
 0xc3a   : > { %4055 = vmatprep.mubr.bf16.mxu0 %v8747_v43 }
 0xc3b   : > { %v3927_v57 = vpack.c.bf16 %v3891_v3, %v3889_v23  ;;  %v3928_v59 = vpack.c.bf16 %v3892_v44, %v3890_v21 }
 0xc3d   : > { %4025 = vmatprep.subr.bf16.mxu0 %v3928_v59 }
 0xc3e   : > { %4026 = vmatpush1.bf16.msra.mxu0 %v3927_v57 }
 0xc3f   : > { %4105 = vmatprep.subr.bf16.mxu0 %v8848_v12 }
 0xc41   : > { %4621 = vmatmul.mubr.msk.bf16.vlgmr.msra.gmra.mrb[32].mxu0 %vm1304_vm10, %v4827_v0 }
 0xc42   : > { %4106 = vmatpush1.bf16.msra.mxu0 %v8849_v9  ;;  %4065 = vmatprep.mubr.bf16.mxu0 %v8747_v43 }
 0xc43   : > { %4107 = vmatprep.subr.bf16.mxu0 %v8850_v49 }
 0xc46   : > { %4108 = vmatpush1.bf16.msra.mxu0 %v8851_v38  ;;  %v4213_v44 = vpop.permute.xlu1 %4212 }
 0xc47   : > { %4109 = vmatprep.subr.bf16.mxu0 %v8852_v28  ;;  %v4854_v28 = vld [vmem:[%s4997_s29] sm:$0xff] }
 0xc48   : > { %v4218_v12 = vpop.permute.xlu0 %4217 }
 0xc49   : > { %4622 = vmatmul.mubr.msk.bf16.gmra.mrb[40].mxu0 %vm1304_vm10, %v4828_v37 }
 0xc4a   : > { %4110 = vmatpush1.bf16.msra.mxu0 %v8853_v50  ;;  %4137 = vmatprep.mubr.bf16.mxu0 %v4831_v11  ;;  %v4237_v50 = vmul.f32 %v4854_v28, %v4854_v28 }
 0xc4b   : > { %4111 = vmatprep.subr.bf16.mxu0 %v8854_v45  ;;  %v4855_v45 = vld [vmem:[%s4997_s29 + $0x8] sm:$0xff]  ;;  %s4634_s29 = sshll.u32 %s8888_s25, 3 }
 0xc4c   : > { %s671_s3 = scalar_lea.vmem %s8884_s24, %s4634_s29  ;;  %s676_s22 = scalar_lea.vmem %s8885_s2, %s4634_s29 }
 0xc4e   : > { %4112 = vmatpush1.bf16.msra.mxu0 %v8855_v15  ;;  %v4238_v15 = vmul.f32 %v4855_v45, %v4855_v45 }
 0xc4f   : > { %4113 = vmatprep.subr.bf16.mxu0 %v8856_v53 }
 0xc52   : > { %4114 = vmatpush1.bf16.msra.mxu0 %v8857_v4 }
 0xc53   : > { %4115 = vmatprep.subr.bf16.mxu0 %v8858_v52 }
 0xc56   : > { %4116 = vmatpush1.bf16.msra.mxu0 %v8859_v46  ;;  %v4223_v46 = vpop.permute.xlu1 %4222 }
 0xc57   : > { %4117 = vmatprep.subr.bf16.mxu0 %v8860_v41  ;;  %v4239_v41 = vsub.f32 %v4237_v50, %v4854_v28 }
 0xc5a   : > { %4118 = vmatpush1.bf16.msra.mxu0 %v8861_v56 }
 0xc5b   : > { %4119 = vmatprep.subr.bf16.mxu0 %v8862_v6 }
 0xc5e   : > { %4120 = vmatpush1.bf16.msra.mxu0 %v8863_v7  ;;  %v4240_v7 = vsub.f32 %v4238_v15, %v4855_v45 }
 0xc5f   : > { %4121 = vmatprep.subr.bf16.mxu0 %v8864_v17 }
 0xc62   : > { %4122 = vmatpush1.bf16.msra.mxu0 %v8865_v19 }
 0xc63   : > { %4123 = vmatprep.subr.bf16.mxu0 %v8866_v16 }
 0xc66   : > { %4124 = vmatpush1.bf16.msra.mxu0 %v8867_v42 }
 0xc67   : > { %4125 = vmatprep.subr.bf16.mxu0 %v8868_v54 }
 0xc6a   : > { %4126 = vmatpush1.bf16.msra.mxu0 %v8869_v27 }
 0xc6b   : > { %4127 = vmatprep.subr.bf16.mxu0 %v8870_v18 }
 0xc6e   : > { %4128 = vmatpush1.bf16.msra.mxu0 %v8871_v39 }
 0xc6f   : > { %4129 = vmatprep.subr.bf16.mxu0 %v8872_v40 }
 0xc72   : > { %4130 = vmatpush1.bf16.msra.mxu0 %v8873_v62 }
 0xc73   : > { %4131 = vmatprep.subr.bf16.mxu0 %v8874_v25 }
 0xc76   : > { %4132 = vmatpush1.bf16.msra.mxu0 %v8875_v33 }
 0xc77   : > { %4133 = vmatprep.subr.bf16.mxu0 %v8876_v30 }
 0xc7a   : > { %4134 = vmatpush1.bf16.msra.mxu0 %v8877_v61 }
 0xc7b   : > { %4135 = vmatprep.subr.bf16.mxu0 %v8878_v20 }
 0xc7e   : > { %4136 = vmatpush1.bf16.msra.mxu0 %v8879_v8 }
 0xc7f   : > { %4156 = vmatprep.subr.bf16.mxu0 %v8880_v55 }
 0xc81   : > { %4138 = vmatmul.mubr.bf16.vlgmr.msra.gmra.mrb[32].mxu0 %v4829_v32 }
 0xc82   : > { %4157 = vmatpush1.bf16.msra.mxu0 %v8881_v60  ;;  %4147 = vmatprep.mubr.bf16.mxu0 %v4627_v36 }
 0xc83   : > { %4158 = vmatprep.subr.bf16.mxu0 %v8882_v14 }
 0xc86   : > { %4159 = vmatpush1.bf16.msra.mxu0 %v8883_v35 }
 0xc89   : > { %4148 = vmatmul.mubr.bf16.gmra.mrb[44].mxu0 %v4626_v2 }
 0xc8a   : > { %4188 = vmatprep.mubr.bf16.mxu0 %v8747_v43 }
 0xc91   : > { %4629 = vmatmul.mubr.msk.bf16.vlgmr.msra.gmra.mrb[32].mxu0 %vm1304_vm10, %v4834_v1 }
 0xc92   : > { %4198 = vmatprep.mubr.bf16.mxu0 %v8747_v43 }
 0xc99   : > { %4630 = vmatmul.mubr.msk.bf16.gmra.mrb[48].mxu0 %vm1304_vm10, %v4835_v22 }
 0xd0c   : > { %v4016_v26 = vpop.f32.mrb[36].mxu0 }
 0xd0d   : > { %v4018_v24 = vpop.f32.mrb[37].mxu0 }
 0xd0e   : > { %v4020_v31 = vpop.f32.mrb[38].mxu0 }
 0xd0f   : > { %v4021_v34 = vpop.f32.mrb[39].mxu0 }
 0xd1c   : > { %v4067_v51 = vpop.f32.mrb[40].mxu0 }
 0xd1d   : > { %v4068_v58 = vadd.f32 %v4067_v51, %v4016_v26  ;;  %v4069_v63 = vpop.f32.mrb[41].mxu0 }
 0xd1e   : > { %v4070_v47 = vadd.f32 %v4069_v63, %v4018_v24  ;;  %v4071_v48 = vpop.f32.mrb[42].mxu0 }
 0xd1f   : > { %v4072_v13 = vpop.f32.mrb[43].mxu0 }
 0xd5c   : > { %v4149_v10 = vpop.f32.mrb[44].mxu0 }
 0xd5d   : > { %v4150_v29 = vadd.f32 %v4149_v10, %v4068_v58  ;;  %v4151_v23 = vpop.f32.mrb[45].mxu0 }
 0xd5e   : > { %v4152_v43 = vadd.f32 %v4151_v23, %v4070_v47  ;;  %v4153_v21 = vpop.f32.mrb[46].mxu0 }
 0xd5f   : > { %v4154_v3 = vpop.f32.mrb[47].mxu0 }
 0xd64   : > { %v4190_v57 = vpop.f32.mrb[32].mxu0 }
 0xd65   : > { %v4225_v59 = vadd.f32 %v4213_v44, %v4190_v57  ;;  %v4192_v0 = vpop.f32.mrb[33].mxu0 }
 0xd66   : > { %v4226_v9 = vadd.f32 %v4213_v44, %v4192_v0  ;;  %v4194_v49 = vpop.f32.mrb[34].mxu0 }
 0xd67   : > { %4836 = vtanh.f32 %v4225_v59  ;;  %v4227_v37 = vadd.f32 %v4218_v12, %v4194_v49  ;;  %v4196_v38 = vpop.f32.mrb[35].mxu0 }
 0xd68   : > { %4838 = vtanh.f32 %v4226_v9  ;;  %v4228_v11 = vadd.f32 %v4218_v12, %v4196_v38 }
 0xd69   : > { %4840 = vtanh.f32 %v4227_v37 }
 0xd6a   : > { %4842 = vtanh.f32 %v4228_v11 }
 0xd6c   : > { %v4200_v53 = vpop.f32.mrb[48].mxu0 }
 0xd6d   : > { %v4201_v4 = vadd.f32 %v4200_v53, %v4150_v29  ;;  %v4202_v52 = vpop.f32.mrb[49].mxu0 }
 0xd6e   : > { %v4203_v56 = vadd.f32 %v4202_v52, %v4152_v43  ;;  %v4204_v6 = vpop.f32.mrb[50].mxu0 }
 0xd6f   : > { %v4229_v17 = vadd.f32 %v4223_v46, %v4201_v4  ;;  %v4205_v19 = vpop.f32.mrb[51].mxu0 }
 0xd70   : > { %v4230_v16 = vadd.f32 %v4223_v46, %v4203_v56 }
 0xd71   : > { %v4837_v42 = vpop.eup %4836  ;;  %4844 = vtanh.f32 %v4229_v17 }
 0xd72   : > { %v4839_v54 = vpop.eup %4838  ;;  %v4241_v27 = vmul.f32 %v4837_v42, %v4239_v41  ;;  %4413 = vst [vmem:[%s681_s0] sm:$0xff] %v4837_v42  ;;  %4846 = vtanh.f32 %v4230_v16 }
 0xd73   : > { %v8445_v18 = vpop.eup %4840  ;;  %v4242_v39 = vmul.f32 %v4839_v54, %v4240_v7  ;;  %4414 = vst [vmem:[%s681_s0 + $0x8] sm:$0xff] %v4839_v54 }
 0xd74   : > { %v8447_v40 = vpop.eup %4842  ;;  %v4243_v62 = vadd.f32 %v4854_v28, %v4241_v27  ;;  %4415 = vst [vmem:[%s681_s0 + $0x10] sm:$0xff] %v8445_v18 }
 0xd75   : > { %v4244_v25 = vadd.f32 %v4855_v45, %v4242_v39  ;;  %4416 = vst [vmem:[%s681_s0 + $0x18] sm:$0xff] %v8447_v40 }
 0xd76   : > { %v4245_v33 = vmul.f32 %v4243_v62, %v4243_v62 }
 0xd77   : > { %v4246_v30 = vmul.f32 %v4244_v25, %v4244_v25 }
 0xd78   : > { %v4247_v61 = vsub.f32 %v4245_v33, %v4243_v62 }
 0xd79   : > { %v4248_v20 = vsub.f32 %v4246_v30, %v4244_v25 }
 0xd7a   : > { %v4251_v5 = vrot.slane %v4247_v61, 5 }
 0xd7b   : > { %v8451_v32 = vpop.eup %4844  ;;  %v4252_v8 = vrot.slane %v4248_v20, 5 }
 0xd7c   : > { %v8453_v36 = vpop.eup %4846  ;;  %v4255_v55 = vmul.f32 %v4837_v42, %v4251_v5  ;;  %4417 = vst [vmem:[%s681_s0 + $0x20] sm:$0xff] %v8451_v32 }
 0xd7d   : > { %v4256_v60 = vmul.f32 %v4839_v54, %v4252_v8  ;;  %4418 = vst [vmem:[%s681_s0 + $0x28] sm:$0xff] %v8453_v36 }
 0xd7e   : > { %v4259_v14 = vrot.slane %v4255_v55, 3 }
 0xd7f   : > { %v4260_v2 = vrot.slane %v4256_v60, 3 }
 0xd80   : > { %v4263_v35 = vadd.f32 %v4259_v14, %v4243_v62 }
 0xd81   : > { %v4264_v1 = vadd.f32 %v4260_v2, %v4244_v25 }
 0xd82   : > { %v4265_v22 = vmul.f32 %v4263_v35, %v4263_v35 }
 0xd83   : > { %v4266_v26 = vmul.f32 %v4264_v1, %v4264_v1 }
 0xd84   : > { %v4267_v24 = vsub.f32 %v4265_v22, %v4263_v35 }
 0xd85   : > { %v4268_v31 = vsub.f32 %v4266_v26, %v4264_v1 }
 0xd86   : > { %v4271_v34 = vrot.slane %v4267_v24, 2 }
 0xd87   : > { %v4272_v51 = vrot.slane %v4268_v31, 2 }
 0xd88   : > { %v4275_v58 = vmul.f32 %v4837_v42, %v4271_v34  ;;  %v4277_v63 = vmul.f32 %v8445_v18, %v4271_v34 }
 0xd89   : > { %v4276_v47 = vmul.f32 %v4839_v54, %v4272_v51  ;;  %v4278_v48 = vmul.f32 %v8447_v40, %v4272_v51 }
 0xd8a   : > { %v4284_v13 = vrot.slane %v4275_v58, 6  ;;  %v4285_v10 = vrot.slane %v4277_v63, 6 }
 0xd8b   : > { %v4287_v29 = vrot.slane %v4276_v47, 6  ;;  %v4288_v23 = vrot.slane %v4278_v48, 6 }
 0xd8c   : > { %v4286_v43 = vsel %vm4283_vm11, %v4284_v13, %v4285_v10 }
 0xd8d   : > { %v4292_v21 = vadd.f32 %v4286_v43, %v4263_v35  ;;  %v4289_v3 = vsel %vm4283_vm11, %v4287_v29, %v4288_v23 }
 0xd8e   : > { %v4293_v44 = vadd.f32 %v4289_v3, %v4264_v1 }
 0xd8f   : > { %v4294_v57 = vmul.f32 %v4292_v21, %v4292_v21 }
 0xd90   : > { %v4295_v59 = vmul.f32 %v4293_v44, %v4293_v44 }
 0xd91   : > { %v4296_v0 = vsub.f32 %v4294_v57, %v4292_v21 }
 0xd92   : > { %v4297_v12 = vsub.f32 %v4295_v59, %v4293_v44 }
 0xd93   : > { %v4300_v9 = vrot.slane %v4296_v0, 7 }
 0xd94   : > { %v4301_v49 = vrot.slane %v4297_v12, 7 }
 0xd95   : > { %v4304_v37 = vmul.f32 %v8445_v18, %v4300_v9 }
 0xd96   : > { %v4305_v38 = vmul.f32 %v8447_v40, %v4301_v49 }
 0xd97   : > { %v4308_v11 = vrot.slane %v4304_v37, 1 }
 0xd98   : > { %v4309_v28 = vrot.slane %v4305_v38, 1 }
 0xd99   : > { %v4312_v50 = vadd.f32 %v4308_v11, %v4292_v21 }
 0xd9a   : > { %v4313_v45 = vadd.f32 %v4309_v28, %v4293_v44 }
 0xd9b   : > { %v4314_v15 = vmul.f32 %v4312_v50, %v4312_v50 }
 0xd9c   : > { %v4315_v53 = vmul.f32 %v4313_v45, %v4313_v45  ;;  %v4405_v4 = vcombine.low %v4312_v50, %v4313_v45 }
 0xd9d   : > { %v4316_v52 = vsub.f32 %v4314_v15, %v4312_v50 }
 0xd9e   : > { %v4317_v46 = vsub.f32 %v4315_v53, %v4313_v45  ;;  %4407 = vst [vmem:[%s671_s3] sm:$0x77] %v4405_v4 }
 0xd9f   : > { %v4320_v41 = vrot.slane %v4316_v52, 4 }
 0xda0   : > { %v4321_v56 = vrot.slane %v4317_v46, 4 }
 0xda1   : > { %v4324_v6 = vmul.f32 %v8445_v18, %v4320_v41 }
 0xda2   : > { %v4325_v7 = vmul.f32 %v8447_v40, %v4321_v56 }
 0xda3   : > { %v4328_v17 = vrot.slane %v4324_v6, 4 }
 0xda4   : > { %v4329_v19 = vrot.slane %v4325_v7, 4 }
 0xda5   : > { %v4332_v16 = vadd.f32 %v4328_v17, %v4312_v50 }
 0xda6   : > { %v4333_v42 = vadd.f32 %v4329_v19, %v4313_v45 }
 0xda7   : > { %v4334_v54 = vmul.f32 %v4332_v16, %v4332_v16 }
 0xda8   : > { %v4335_v27 = vmul.f32 %v4333_v42, %v4333_v42 }
 0xda9   : > { %v4336_v39 = vsub.f32 %v4334_v54, %v4332_v16 }
 0xdaa   : > { %v4337_v62 = vsub.f32 %v4335_v27, %v4333_v42 }
 0xdab   : > { %v4340_v25 = vrot.slane %v4336_v39, 1 }
 0xdac   : > { %v4341_v33 = vrot.slane %v4337_v62, 1 }
 0xdad   : > { %v4344_v30 = vmul.f32 %v8445_v18, %v4340_v25  ;;  %v4346_v61 = vmul.f32 %v8451_v32, %v4340_v25 }
 0xdae   : > { %v4345_v20 = vmul.f32 %v8447_v40, %v4341_v33  ;;  %v4347_v5 = vmul.f32 %v8453_v36, %v4341_v33 }
 0xdaf   : > { %v4353_v8 = vrot.slane %v4344_v30, 7  ;;  %v4354_v55 = vrot.slane %v4346_v61, 7 }
 0xdb0   : > { %v4356_v60 = vrot.slane %v4345_v20, 7  ;;  %v4357_v14 = vrot.slane %v4347_v5, 7 }
 0xdb1   : > { %v4355_v2 = vsel %vm4352_vm12, %v4353_v8, %v4354_v55 }
 0xdb2   : > { %v4361_v35 = vadd.f32 %v4355_v2, %v4332_v16  ;;  %v4358_v1 = vsel %vm4352_vm12, %v4356_v60, %v4357_v14 }
 0xdb3   : > { %v4362_v22 = vadd.f32 %v4358_v1, %v4333_v42 }
 0xdb4   : > { %v4363_v26 = vmul.f32 %v4361_v35, %v4361_v35 }
 0xdb5   : > { %v4364_v24 = vmul.f32 %v4362_v22, %v4362_v22 }
 0xdb6   : > { %v4365_v31 = vsub.f32 %v4363_v26, %v4361_v35 }
 0xdb7   : > { %v4366_v34 = vsub.f32 %v4364_v24, %v4362_v22 }
 0xdb8   : > { %v4369_v18 = vrot.slane %v4365_v31, 6 }
 0xdb9   : > { %v4370_v51 = vrot.slane %v4366_v34, 6 }
 0xdba   : > { %v4373_v58 = vmul.f32 %v8451_v32, %v4369_v18 }
 0xdbb   : > { %v4374_v40 = vmul.f32 %v8453_v36, %v4370_v51 }
 0xdbc   : > { %v4377_v63 = vrot.slane %v4373_v58, 2 }
 0xdbd   : > { %v4378_v47 = vrot.slane %v4374_v40, 2 }
 0xdbe   : > { %v4381_v48 = vadd.f32 %v4377_v63, %v4361_v35 }
 0xdbf   : > { %v4382_v13 = vadd.f32 %v4378_v47, %v4362_v22 }
 0xdc0   : > { %v4383_v10 = vmul.f32 %v4381_v48, %v4381_v48 }
 0xdc1   : > { %v4384_v29 = vmul.f32 %v4382_v13, %v4382_v13 }
 0xdc2   : > { %v4385_v23 = vsub.f32 %v4383_v10, %v4381_v48 }
 0xdc3   : > { %v4386_v43 = vsub.f32 %v4384_v29, %v4382_v13 }
 0xdc4   : > { %v4389_v21 = vrot.slane %v4385_v23, 3 }
 0xdc5   : > { %v4390_v3 = vrot.slane %v4386_v43, 3 }
 0xdc6   : > { %v4393_v44 = vmul.f32 %v8451_v32, %v4389_v21 }
 0xdc7   : > { %v4394_v57 = vmul.f32 %v8453_v36, %v4390_v3 }
 0xdc8   : > { %v4397_v59 = vrot.slane %v4393_v44, 5 }
 0xdc9   : > { %v4398_v0 = vrot.slane %v4394_v57, 5 }
 0xdca   : > { %v4401_v12 = vadd.f32 %v4397_v59, %v4381_v48 }
 0xdcb   : > { %v4402_v9 = vadd.f32 %v4398_v0, %v4382_v13 }
 0xdcd   : > { %v4410_v49 = vcombine.low %v4401_v12, %v4402_v9 }
 0xdcf   : > { %4412 = vst [vmem:[%s676_s22] sm:$0x77] %v4410_v49 }
 0xdd0 PF: > { %s8886_s28 = sld [smem:[#allocation2_spill]] }
 0xdd6   : > { %s32_s2 = sadd.s32 1, %s8886_s28  }
 0xdd7   : > { %p29_p4 = scmp.ge.s32.totalorder %s32_s2, 4  }
 0xdd9   :  { %31 = sbr.rel (!%p29_p4) target bundleno = 9 (0x9), region = 150 }

</bundles_post_ra>
